<compile_context>
chip_gen: v6e
topology: v6e:2x2x1
jax: 0.10.0
libtpu: 0.0.40
codegen_flags: <defaults>
</compile_context>

<pallas_src>
import jax
import jax.numpy as jnp
from jax.experimental import pallas as pl
from jax.experimental.pallas import tpu as pltpu

_NEG_SLOPE = 0.01   # nn.LeakyReLU() default
_BN_EPS = 1e-5      # nn.BatchNorm2d default


def _leaky_relu(y):
    return jnp.where(y >= 0, y, _NEG_SLOPE * y)


# ----------------------------------------------------------------------------
# Kernel 1: fused [bilinear upsample + channel concat + 3x3 conv + bias]
#           + per-tile BatchNorm partial statistics.
# ----------------------------------------------------------------------------
def _conv1_kernel(ah_ref, aw_ref, x_ref, cmain_ref, ctop_ref, cbot_ref,
                  wx_ref, wc_ref, b_ref, z_ref, st_ref):
    it = pl.program_id(1)
    nt = pl.num_programs(1)
    th, w = z_ref.shape[1], z_ref.shape[2]
    hin, win, cx = x_ref.shape[1], x_ref.shape[2], x_ref.shape[3]
    cc = cmain_ref.shape[3]
    cout = z_ref.shape[3]

    # --- bilinear upsample (align_corners=True) of the small low-res input for
    #     the th+2 rows (incl. the 1-row conv halo) this tile needs; the Ah row
    #     slab already contains zero rows at the image border, so the conv's
    #     zero padding in H for the upsampled branch comes for free.
    ah = ah_ref[0]                                          # (th+2, hin), f32
    x3 = x_ref[0].astype(jnp.float32)                       # (hin, win, cx)
    uh = jnp.dot(ah, x3.reshape(hin, win * cx),
                 preferred_element_type=jnp.float32).reshape(th + 2, win, cx)
    up = jnp.einsum('twc,ow->toc', uh, aw_ref[...])         # (th+2, w, cx) f32
    zc_x = jnp.zeros((th + 2, 1, cx), jnp.float32)
    up_p = jnp.concatenate([zc_x, up, zc_x], axis=1).astype(jnp.bfloat16)

    # --- skip-connection tile: main rows + masked 1-row halos, zero-padded in
    #     W.  (This replaces the HBM concat: the conv below accumulates the
    #     up_x and concat_with contributions with w1 split along Cin.)
    top_ok = jnp.where(it == 0, 0.0, 1.0)
    bot_ok = jnp.where(it == nt - 1, 0.0, 1.0)
    ct = jnp.concatenate([ctop_ref[0].astype(jnp.float32) * top_ok,
                          cmain_ref[0].astype(jnp.float32),
                          cbot_ref[0].astype(jnp.float32) * bot_ok], axis=0)
    zc_c = jnp.zeros((th + 2, 1, cc), jnp.float32)
    c_p = jnp.concatenate([zc_c, ct, zc_c], axis=1).astype(jnp.bfloat16)

    # --- 3x3 conv = 9 taps x 2 inputs, each a (th*w, Cin) @ (Cin, Cout) MXU
    #     matmul with bf16 inputs and f32 accumulation.
    # TODO(synk): when Cin % 128 == 0, replace the dx value-slices with
    # pltpu.roll along the lane axis to avoid the shifted-copy relayouts.
    acc = jnp.zeros((th * w, cout), jnp.float32)
    for dy in range(3):
        for dx in range(3):
            pu = up_p[dy:dy + th, dx:dx + w, :].reshape(th * w, cx)
            pc = c_p[dy:dy + th, dx:dx + w, :].reshape(th * w, cc)
            acc += jnp.dot(pu, wx_ref[dy, dx], preferred_element_type=jnp.float32)
            acc += jnp.dot(pc, wc_ref[dy, dx], preferred_element_type=jnp.float32)
    acc += b_ref[...]                                       # (1, cout) broadcast

    # --- per-tile BN partial statistics (globally reduced in the wrapper).
    ssum = jnp.sum(acc, axis=0, keepdims=True)              # (1, cout)
    ssq = jnp.sum(acc * acc, axis=0, keepdims=True)
    st_ref[...] = jnp.concatenate([ssum, ssq], axis=0).reshape(1, 1, 2, cout)

    z_ref[...] = acc.reshape(1, th, w, cout).astype(z_ref.dtype)


# ----------------------------------------------------------------------------
# Kernel 2: applies BN1 affine + LeakyReLU on the fly to its (pre-BN) input
#           tile, then 3x3 conv + bias + per-tile BN partial statistics.
# ----------------------------------------------------------------------------
def _conv2_kernel(zmain_ref, ztop_ref, zbot_ref, sc_ref, sh_ref,
                  w_ref, b_ref, z_ref, st_ref):
    it = pl.program_id(1)
    nt = pl.num_programs(1)
    th, w = z_ref.shape[1], z_ref.shape[2]
    c1 = zmain_ref.shape[3]
    c2 = z_ref.shape[3]

    sc = sc_ref[...].reshape(1, 1, c1)
    sh = sh_ref[...].reshape(1, 1, c1)

    def bn_act(z):   # folded BN affine + LeakyReLU, f32 math
        return _leaky_relu(z.astype(jnp.float32) * sc + sh)

    top_ok = jnp.where(it == 0, 0.0, 1.0)
    bot_ok = jnp.where(it == nt - 1, 0.0, 1.0)
    yt = jnp.concatenate([bn_act(ztop_ref[0]) * top_ok,
                          bn_act(zmain_ref[0]),
                          bn_act(zbot_ref[0]) * bot_ok], axis=0)   # (th+2, w, c1)
    zc = jnp.zeros((th + 2, 1, c1), jnp.float32)
    y_p = jnp.concatenate([zc, yt, zc], axis=1).astype(jnp.bfloat16)

    acc = jnp.zeros((th * w, c2), jnp.float32)
    for dy in range(3):
        for dx in range(3):
            p = y_p[dy:dy + th, dx:dx + w, :].reshape(th * w, c1)
            acc += jnp.dot(p, w_ref[dy, dx], preferred_element_type=jnp.float32)
    acc += b_ref[...]

    ssum = jnp.sum(acc, axis=0, keepdims=True)
    ssq = jnp.sum(acc * acc, axis=0, keepdims=True)
    st_ref[...] = jnp.concatenate([ssum, ssq], axis=0).reshape(1, 1, 2, c2)
    z_ref[...] = acc.reshape(1, th, w, c2).astype(z_ref.dtype)


# ----------------------------------------------------------------------------
# Kernel 3: elementwise BN2 affine + LeakyReLU (final epilogue).
# ----------------------------------------------------------------------------
def _bn_act_kernel(z_ref, sc_ref, sh_ref, o_ref):
    c = z_ref.shape[3]
    y = z_ref[...].astype(jnp.float32) * sc_ref[...].reshape(1, 1, 1, c) \
        + sh_ref[...].reshape(1, 1, 1, c)
    o_ref[...] = _leaky_relu(y).astype(o_ref.dtype)


# ----------------------------------------------------------------------------
# pallas_call wrappers
# ----------------------------------------------------------------------------
def _block_bytes(shape, dtype):
    n = 1
    for s in shape:
        n *= int(s)
    return n * jnp.dtype(dtype).itemsize


def _vmem_limit(bytes_in_flight):
    # double-buffered pipeline blocks + working headroom, clamped to sane range
    return int(min(max(2 * bytes_in_flight + (8 << 20), 32 << 20), 96 << 20))


def conv1_up_concat(x, c, ah_tiles, aw, wx, wc, b, tile_h):
    n, hin, win, cx = x.shape
    _, h, w, cc = c.shape
    cout = wx.shape[-1]
    t = h // tile_h

    im_main = lambda ni, i: (ni, i, 0, 0)
    im_top = lambda ni, i: (ni, jnp.maximum(i * tile_h - 1, 0), 0, 0)
    im_bot = lambda ni, i: (ni, jnp.minimum((i + 1) * tile_h, h - 1), 0, 0)

    blocks = [
        ((1, tile_h + 2, hin), jnp.float32), ((w, win), jnp.float32),
        ((1, hin, win, cx), x.dtype),
        ((1, tile_h, w, cc), c.dtype), ((1, 1, w, cc), c.dtype), ((1, 1, w, cc), c.dtype),
        ((3, 3, cx, cout), wx.dtype), ((3, 3, cc, cout), wc.dtype), ((1, cout), b.dtype),
        ((1, tile_h, w, cout), jnp.bfloat16), ((1, 1, 2, cout), jnp.float32),
    ]
    vmem = _vmem_limit(sum(_block_bytes(s, d) for s, d in blocks))

    return pl.pallas_call(
        _conv1_kernel,
        out_shape=(jax.ShapeDtypeStruct((n, h, w, cout), jnp.bfloat16),
                   jax.ShapeDtypeStruct((n, t, 2, cout), jnp.float32)),
        grid=(n, t),
        in_specs=[
            pl.BlockSpec((1, tile_h + 2, hin), lambda ni, i: (i, 0, 0)),   # Ah row slab
            pl.BlockSpec((w, win), lambda ni, i: (0, 0)),                  # Aw
            pl.BlockSpec((1, hin, win, cx), lambda ni, i: (ni, 0, 0, 0)),  # x (small, full)
            pl.BlockSpec((1, tile_h, w, cc), im_main),                     # concat_with main rows
            pl.BlockSpec((1, 1, w, cc), im_top),                           # concat_with top halo row
            pl.BlockSpec((1, 1, w, cc), im_bot),                           # concat_with bottom halo row
            pl.BlockSpec((3, 3, cx, cout), lambda ni, i: (0, 0, 0, 0)),
            pl.BlockSpec((3, 3, cc, cout), lambda ni, i: (0, 0, 0, 0)),
            pl.BlockSpec((1, cout), lambda ni, i: (0, 0)),
        ],
        out_specs=[
            pl.BlockSpec((1, tile_h, w, cout), im_main),
            pl.BlockSpec((1, 1, 2, cout), lambda ni, i: (ni, i, 0, 0)),
        ],
        compiler_params=pltpu.CompilerParams(
            dimension_semantics=("parallel", "parallel"),
            vmem_limit_bytes=vmem),
    )(ah_tiles, aw, x, c, c, c, wx, wc, b)


def conv_bn_act_conv(z1, sc1, sh1, w2, b2, tile_h):
    n, h, w, c1 = z1.shape
    c2 = w2.shape[-1]
    t = h // tile_h

    im_main = lambda ni, i: (ni, i, 0, 0)
    im_top = lambda ni, i: (ni, jnp.maximum(i * tile_h - 1, 0), 0, 0)
    im_bot = lambda ni, i: (ni, jnp.minimum((i + 1) * tile_h, h - 1), 0, 0)

    blocks = [
        ((1, tile_h, w, c1), z1.dtype), ((1, 1, w, c1), z1.dtype), ((1, 1, w, c1), z1.dtype),
        ((1, c1), jnp.float32), ((1, c1), jnp.float32),
        ((3, 3, c1, c2), w2.dtype), ((1, c2), jnp.float32),
        ((1, tile_h, w, c2), jnp.bfloat16), ((1, 1, 2, c2), jnp.float32),
    ]
    vmem = _vmem_limit(sum(_block_bytes(s, d) for s, d in blocks))

    return pl.pallas_call(
        _conv2_kernel,
        out_shape=(jax.ShapeDtypeStruct((n, h, w, c2), jnp.bfloat16),
                   jax.ShapeDtypeStruct((n, t, 2, c2), jnp.float32)),
        grid=(n, t),
        in_specs=[
            pl.BlockSpec((1, tile_h, w, c1), im_main),
            pl.BlockSpec((1, 1, w, c1), im_top),
            pl.BlockSpec((1, 1, w, c1), im_bot),
            pl.BlockSpec((1, c1), lambda ni, i: (0, 0)),
            pl.BlockSpec((1, c1), lambda ni, i: (0, 0)),
            pl.BlockSpec((3, 3, c1, c2), lambda ni, i: (0, 0, 0, 0)),
            pl.BlockSpec((1, c2), lambda ni, i: (0, 0)),
        ],
        out_specs=[
            pl.BlockSpec((1, tile_h, w, c2), im_main),
            pl.BlockSpec((1, 1, 2, c2), lambda ni, i: (ni, i, 0, 0)),
        ],
        compiler_params=pltpu.CompilerParams(
            dimension_semantics=("parallel", "parallel"),
            vmem_limit_bytes=vmem),
    )(z1, z1, z1, sc1, sh1, w2, b2)


def bn_act(z, sc, sh, tile_h):
    n, h, w, c = z.shape
    t = h // tile_h
    return pl.pallas_call(
        _bn_act_kernel,
        out_shape=jax.ShapeDtypeStruct((n, h, w, c), jnp.float32),
        grid=(n, t),
        in_specs=[
            pl.BlockSpec((1, tile_h, w, c), lambda ni, i: (ni, i, 0, 0)),
            pl.BlockSpec((1, c), lambda ni, i: (0, 0)),
            pl.BlockSpec((1, c), lambda ni, i: (0, 0)),
        ],
        out_specs=pl.BlockSpec((1, tile_h, w, c), lambda ni, i: (ni, i, 0, 0)),
        compiler_params=pltpu.CompilerParams(
            dimension_semantics=("parallel", "parallel")),
    )(z, sc, sh)


# ----------------------------------------------------------------------------
# Glue: interpolation matrices, BN folding, parameter setup.
# ----------------------------------------------------------------------------
def interp_matrix(n_out, n_in):
    # bilinear, align_corners=True: src = i * (n_in - 1) / (n_out - 1)
    if n_out == 1:
        src = jnp.zeros((1,), jnp.float32)
    else:
        src = jnp.arange(n_out, dtype=jnp.float32) * (n_in - 1) / (n_out - 1)
    lo = jnp.clip(jnp.floor(src).astype(jnp.int32), 0, n_in - 1)
    hi = jnp.minimum(lo + 1, n_in - 1)
    frac = src - lo.astype(jnp.float32)
    return ((1.0 - frac)[:, None] * jax.nn.one_hot(lo, n_in, dtype=jnp.float32)
            + frac[:, None] * jax.nn.one_hot(hi, n_in, dtype=jnp.float32))


def _pick_tile_h(h):
    # largest sublane-friendly divisor of H (gives >=2 row tiles when possible)
    for th in (64, 56, 48, 40, 32, 24, 16, 8):
        if th < h and h % th == 0:
            return th
    return h


def _fold_bn(stats, gamma, beta, count):
    # stats: (N, T, 2, C) per-tile [sum, sum of squares] -> folded scale/shift
    s = jnp.sum(stats[:, :, 0, :], axis=(0, 1))
    sq = jnp.sum(stats[:, :, 1, :], axis=(0, 1))
    mean = s / count
    var = jnp.maximum(sq / count - mean * mean, 0.0)     # biased batch variance
    scale = gamma * jax.lax.rsqrt(var + _BN_EPS)
    shift = beta - mean * scale
    return (scale.reshape(1, -1).astype(jnp.float32),
            shift.reshape(1, -1).astype(jnp.float32))


@jax.jit
def upsample_bn_forward(x_nchw, concat_nchw, params):
    # NCHW -> NHWC (channels on the lane axis inside the kernels)
    x = jnp.transpose(x_nchw, (0, 2, 3, 1)).astype(jnp.float32)
    c = jnp.transpose(concat_nchw, (0, 2, 3, 1)).astype(jnp.bfloat16)
    n, hin, win, cx = x.shape
    _, h, w, cc = c.shape

    tile_h = _pick_tile_h(h)
    t = h // tile_h

    # interpolation matrices (align_corners=True); per-row-tile slabs carrying
    # the conv's zero-padding rows at the image border (tiny, duplicated 2/TH).
    ah = interp_matrix(h, hin)
    aw = interp_matrix(w, win)
    ah_pad = jnp.pad(ah, ((1, 1), (0, 0)))
    ah_tiles = jnp.stack(
        [ah_pad[i * tile_h:i * tile_h + tile_h + 2] for i in range(t)], axis=0)

    # splitting w1 along Cin fuses the channel concat into conv1
    w1 = params['w1'].astype(jnp.bfloat16)
    w1x, w1c = w1[:, :, :cx, :], w1[:, :, cx:, :]
    w2 = params['w2'].astype(jnp.bfloat16)
    b1 = params['b1'].reshape(1, -1).astype(jnp.float32)
    b2 = params['b2'].reshape(1, -1).astype(jnp.float32)

    count = float(n * h * w)
    z1, st1 = conv1_up_concat(x, c, ah_tiles, aw, w1x, w1c, b1, tile_h)
    sc1, sh1 = _fold_bn(st1, params['g1'], params['be1'], count)
    z2, st2 = conv_bn_act_conv(z1, sc1, sh1, w2, b2, tile_h)
    sc2, sh2 = _fold_bn(st2, params['g2'], params['be2'], count)
    y = bn_act(z2, sc2, sh2, tile_h)

    # TODO(synk): PyTorch training-mode BN would also update running_mean/var;
    # only the forward activations are produced here.
    return jnp.transpose(y, (0, 3, 1, 2))   # NHWC -> NCHW


def init_params(key, skip_input, output_features):
    ks = jax.random.split(key, 8)

    def conv_w(k, cin, cout):
        # torch layout (Cout, Cin, 3, 3) -> kernel layout (3, 3, Cin, Cout)
        wt = 0.1 * jax.random.normal(k, (cout, cin, 3, 3), jnp.float32)
        return jnp.transpose(wt, (2, 3, 1, 0))

    return {
        'w1': conv_w(ks[0], skip_input, output_features),
        'b1': 0.1 * jax.random.normal(ks[1], (output_features,), jnp.float32),
        'g1': 1.0 + 0.1 * jax.random.normal(ks[2], (output_features,), jnp.float32),
        'be1': 0.1 * jax.random.normal(ks[3], (output_features,), jnp.float32),
        'w2': conv_w(ks[4], output_features, output_features),
        'b2': 0.1 * jax.random.normal(ks[5], (output_features,), jnp.float32),
        'g2': 1.0 + 0.1 * jax.random.normal(ks[6], (output_features,), jnp.float32),
        'be2': 0.1 * jax.random.normal(ks[7], (output_features,), jnp.float32),
    }


if __name__ == "__main__":
    key = jax.random.PRNGKey(0)
    kx, kc, kp = jax.random.split(key, 3)

    # NCHW inputs, matching the PyTorch convention.
    x = jax.random.normal(kx, (2, 4, 8, 8), jnp.float32)              # low-res features
    concat_with = jax.random.normal(kc, (2, 4, 16, 16), jnp.float32)  # skip connection

    skip_input = x.shape[1] + concat_with.shape[1]    # 8
    output_features = 8
    params = init_params(kp, skip_input, output_features)

    out = upsample_bn_forward(x, concat_with, params)
    out = jax.block_until_ready(out)

    assert out.shape == (2, output_features, 16, 16), out.shape
    assert jnp.all(jnp.isfinite(out))
    print("KERNEL_OK")
</pallas_src>

<mosaic_0001>
module attributes {stable_mosaic.version = 11 : i64} {
  func.func @_conv1_kernel(%arg0: i32, %arg1: i32, %arg2: memref<1x10x8xf32, #tpu.memory_space<vmem>>, %arg3: memref<16x8xf32, #tpu.memory_space<vmem>>, %arg4: memref<1x8x8x4xf32, #tpu.memory_space<vmem>>, %arg5: memref<1x8x16x4xbf16, #tpu.memory_space<vmem>>, %arg6: memref<1x1x16x4xbf16, #tpu.memory_space<vmem>>, %arg7: memref<1x1x16x4xbf16, #tpu.memory_space<vmem>>, %arg8: memref<3x3x4x8xbf16, #tpu.memory_space<vmem>>, %arg9: memref<3x3x4x8xbf16, #tpu.memory_space<vmem>>, %arg10: memref<1x8xf32, #tpu.memory_space<vmem>>, %arg11: memref<1x8x16x8xbf16, #tpu.memory_space<vmem>>, %arg12: memref<1x1x2x8xf32, #tpu.memory_space<vmem>>) attributes {dimension_semantics = [#tpu.dimension_semantics<parallel>, #tpu.dimension_semantics<parallel>], iteration_bounds = array<i64: 2, 2>, scalar_prefetch = 0 : i64, scratch_operands = 0 : i64, tpu.core_type = #tpu.core_type<tc>, window_params = [{transform_indices = @transform_0, window_bounds = array<i64: 1, 10, 8>}, {pipeline_mode = #tpu.pipeline_mode<synchronous>, transform_indices = @transform_1, window_bounds = array<i64: 16, 8>}, {transform_indices = @transform_2, window_bounds = array<i64: 1, 8, 8, 4>}, {transform_indices = @transform_3, window_bounds = array<i64: 1, 8, 16, 4>}, {transform_indices = @transform_4, window_bounds = array<i64: 1, 1, 16, 4>}, {transform_indices = @transform_5, window_bounds = array<i64: 1, 1, 16, 4>}, {pipeline_mode = #tpu.pipeline_mode<synchronous>, transform_indices = @transform_6, window_bounds = array<i64: 3, 3, 4, 8>}, {pipeline_mode = #tpu.pipeline_mode<synchronous>, transform_indices = @transform_7, window_bounds = array<i64: 3, 3, 4, 8>}, {pipeline_mode = #tpu.pipeline_mode<synchronous>, transform_indices = @transform_8, window_bounds = array<i64: 1, 8>}, {transform_indices = @transform_9, window_bounds = array<i64: 1, 8, 16, 8>}, {transform_indices = @transform_10, window_bounds = array<i64: 1, 1, 2, 8>}]} {
    %c0 = arith.constant 0 : index
    %c0_0 = arith.constant 0 : index
    %c0_1 = arith.constant 0 : index
    %0 = vector.load %arg2[%c0, %c0_0, %c0_1] : memref<1x10x8xf32, #tpu.memory_space<vmem>>, vector<1x10x8xf32>
    %1 = vector.shape_cast %0 : vector<1x10x8xf32> to vector<10x8xf32>
    %c0_2 = arith.constant 0 : index
    %c0_3 = arith.constant 0 : index
    %c0_4 = arith.constant 0 : index
    %c0_5 = arith.constant 0 : index
    %2 = vector.load %arg4[%c0_2, %c0_3, %c0_4, %c0_5] : memref<1x8x8x4xf32, #tpu.memory_space<vmem>>, vector<1x8x8x4xf32>
    %3 = vector.shape_cast %2 : vector<1x8x8x4xf32> to vector<8x8x4xf32>
    %4 = vector.shape_cast %3 : vector<8x8x4xf32> to vector<8x32xf32>
    %cst = arith.constant dense<0.000000e+00> : vector<10x32xf32>
    %5 = tpu.matmul %1, %4, %cst {dimension_numbers = #tpu.dot_dimension_numbers<[1], [0], [0], [1], [0, 0, 1, 1], [], []>} : vector<10x8xf32>, vector<8x32xf32>, vector<10x32xf32> -> vector<10x32xf32>
    %6 = vector.shape_cast %5 : vector<10x32xf32> to vector<10x8x4xf32>
    %c0_6 = arith.constant 0 : index
    %c0_7 = arith.constant 0 : index
    %7 = vector.load %arg3[%c0_6, %c0_7] : memref<16x8xf32, #tpu.memory_space<vmem>>, vector<16x8xf32>
    "tpu.trace_start"() <{level = 10 : i32, message = "twc,ow->toc"}> : () -> ()
    %cst_8 = arith.constant dense<0.000000e+00> : vector<16x10x4xf32>
    %8 = tpu.matmul %7, %6, %cst_8 {dimension_numbers = #tpu.dot_dimension_numbers<[1], [1], [0], [0, 2], [0, 0, 1, 0, 1, 2], [], []>} : vector<16x8xf32>, vector<10x8x4xf32>, vector<16x10x4xf32> -> vector<16x10x4xf32>
    %9 = tpu.transpose %8, [1, 0, 2] : vector<16x10x4xf32> -> vector<10x16x4xf32>
    %cst_9 = arith.constant 0.000000e+00 : f32
    "tpu.trace_stop"() : () -> ()
    %10 = vector.broadcast %cst_9 : f32 to vector<10x1x4xf32>
    %11 = tpu.concatenate %10, %9, %10 in 1 : vector<10x1x4xf32>, vector<10x16x4xf32>, vector<10x1x4xf32> -> vector<10x18x4xf32>
    %12 = arith.truncf %11 : vector<10x18x4xf32> to vector<10x18x4xbf16>
    %c0_i32 = arith.constant 0 : i32
    %13 = arith.cmpi eq, %arg1, %c0_i32 : i32
    %cst_10 = arith.constant 0.000000e+00 : f32
    %cst_11 = arith.constant 1.000000e+00 : f32
    %14 = arith.select %13, %cst_10, %cst_11 : f32
    %c1_i32 = arith.constant 1 : i32
    %15 = arith.cmpi eq, %arg1, %c1_i32 : i32
    %cst_12 = arith.constant 0.000000e+00 : f32
    %cst_13 = arith.constant 1.000000e+00 : f32
    %16 = arith.select %15, %cst_12, %cst_13 : f32
    %c0_14 = arith.constant 0 : index
    %c0_15 = arith.constant 0 : index
    %c0_16 = arith.constant 0 : index
    %c0_17 = arith.constant 0 : index
    %17 = vector.load %arg6[%c0_14, %c0_15, %c0_16, %c0_17] : memref<1x1x16x4xbf16, #tpu.memory_space<vmem>>, vector<1x1x16x4xbf16>
    %18 = vector.shape_cast %17 : vector<1x1x16x4xbf16> to vector<1x16x4xbf16>
    %19 = arith.extf %18 : vector<1x16x4xbf16> to vector<1x16x4xf32>
    %20 = vector.broadcast %14 : f32 to vector<1x16x4xf32>
    %21 = arith.mulf %19, %20 : vector<1x16x4xf32>
    %c0_18 = arith.constant 0 : index
    %c0_19 = arith.constant 0 : index
    %c0_20 = arith.constant 0 : index
    %c0_21 = arith.constant 0 : index
    %22 = vector.load %arg5[%c0_18, %c0_19, %c0_20, %c0_21] : memref<1x8x16x4xbf16, #tpu.memory_space<vmem>>, vector<1x8x16x4xbf16>
    %23 = vector.shape_cast %22 : vector<1x8x16x4xbf16> to vector<8x16x4xbf16>
    %24 = arith.extf %23 : vector<8x16x4xbf16> to vector<8x16x4xf32>
    %c0_22 = arith.constant 0 : index
    %c0_23 = arith.constant 0 : index
    %c0_24 = arith.constant 0 : index
    %c0_25 = arith.constant 0 : index
    %25 = vector.load %arg7[%c0_22, %c0_23, %c0_24, %c0_25] : memref<1x1x16x4xbf16, #tpu.memory_space<vmem>>, vector<1x1x16x4xbf16>
    %26 = vector.shape_cast %25 : vector<1x1x16x4xbf16> to vector<1x16x4xbf16>
    %27 = arith.extf %26 : vector<1x16x4xbf16> to vector<1x16x4xf32>
    %28 = vector.broadcast %16 : f32 to vector<1x16x4xf32>
    %29 = arith.mulf %27, %28 : vector<1x16x4xf32>
    %30 = tpu.concatenate %21, %24, %29 in 0 : vector<1x16x4xf32>, vector<8x16x4xf32>, vector<1x16x4xf32> -> vector<10x16x4xf32>
    %cst_26 = arith.constant 0.000000e+00 : f32
    %31 = vector.broadcast %cst_26 : f32 to vector<10x1x4xf32>
    %32 = tpu.concatenate %31, %30, %31 in 1 : vector<10x1x4xf32>, vector<10x16x4xf32>, vector<10x1x4xf32> -> vector<10x18x4xf32>
    %33 = arith.truncf %32 : vector<10x18x4xf32> to vector<10x18x4xbf16>
    %cst_27 = arith.constant 0.000000e+00 : f32
    %34 = vector.broadcast %cst_27 : f32 to vector<128x8xf32>
    %35 = vector.extract_strided_slice %12 {offsets = [0, 0, 0], sizes = [8, 16, 4], strides = [1, 1, 1]} : vector<10x18x4xbf16> to vector<8x16x4xbf16>
    %36 = vector.shape_cast %35 : vector<8x16x4xbf16> to vector<128x4xbf16>
    %37 = vector.extract_strided_slice %33 {offsets = [0, 0, 0], sizes = [8, 16, 4], strides = [1, 1, 1]} : vector<10x18x4xbf16> to vector<8x16x4xbf16>
    %38 = vector.shape_cast %37 : vector<8x16x4xbf16> to vector<128x4xbf16>
    %c0_28 = arith.constant 0 : index
    %c0_29 = arith.constant 0 : index
    %c0_30 = arith.constant 0 : index
    %c0_31 = arith.constant 0 : index
    %39 = vector.load %arg8[%c0_28, %c0_29, %c0_30, %c0_31] : memref<3x3x4x8xbf16, #tpu.memory_space<vmem>>, vector<1x1x4x8xbf16>
    %40 = vector.shape_cast %39 : vector<1x1x4x8xbf16> to vector<4x8xbf16>
    %cst_32 = arith.constant dense<0.000000e+00> : vector<128x8xf32>
    %41 = tpu.matmul %36, %40, %cst_32 {dimension_numbers = #tpu.dot_dimension_numbers<[1], [0], [0], [1], [0, 0, 1, 1], [], []>} : vector<128x4xbf16>, vector<4x8xbf16>, vector<128x8xf32> -> vector<128x8xf32>
    %42 = arith.addf %34, %41 : vector<128x8xf32>
    %c0_33 = arith.constant 0 : index
    %c0_34 = arith.constant 0 : index
    %c0_35 = arith.constant 0 : index
    %c0_36 = arith.constant 0 : index
    %43 = vector.load %arg9[%c0_33, %c0_34, %c0_35, %c0_36] : memref<3x3x4x8xbf16, #tpu.memory_space<vmem>>, vector<1x1x4x8xbf16>
    %44 = vector.shape_cast %43 : vector<1x1x4x8xbf16> to vector<4x8xbf16>
    %cst_37 = arith.constant dense<0.000000e+00> : vector<128x8xf32>
    %45 = tpu.matmul %38, %44, %cst_37 {dimension_numbers = #tpu.dot_dimension_numbers<[1], [0], [0], [1], [0, 0, 1, 1], [], []>} : vector<128x4xbf16>, vector<4x8xbf16>, vector<128x8xf32> -> vector<128x8xf32>
    %46 = arith.addf %42, %45 : vector<128x8xf32>
    %47 = vector.extract_strided_slice %12 {offsets = [0, 1, 0], sizes = [8, 16, 4], strides = [1, 1, 1]} : vector<10x18x4xbf16> to vector<8x16x4xbf16>
    %48 = vector.shape_cast %47 : vector<8x16x4xbf16> to vector<128x4xbf16>
    %49 = vector.extract_strided_slice %33 {offsets = [0, 1, 0], sizes = [8, 16, 4], strides = [1, 1, 1]} : vector<10x18x4xbf16> to vector<8x16x4xbf16>
    %50 = vector.shape_cast %49 : vector<8x16x4xbf16> to vector<128x4xbf16>
    %c0_38 = arith.constant 0 : index
    %c1 = arith.constant 1 : index
    %c0_39 = arith.constant 0 : index
    %c0_40 = arith.constant 0 : index
    %51 = vector.load %arg8[%c0_38, %c1, %c0_39, %c0_40] : memref<3x3x4x8xbf16, #tpu.memory_space<vmem>>, vector<1x1x4x8xbf16>
    %52 = vector.shape_cast %51 : vector<1x1x4x8xbf16> to vector<4x8xbf16>
    %cst_41 = arith.constant dense<0.000000e+00> : vector<128x8xf32>
    %53 = tpu.matmul %48, %52, %cst_41 {dimension_numbers = #tpu.dot_dimension_numbers<[1], [0], [0], [1], [0, 0, 1, 1], [], []>} : vector<128x4xbf16>, vector<4x8xbf16>, vector<128x8xf32> -> vector<128x8xf32>
    %54 = arith.addf %46, %53 : vector<128x8xf32>
    %c0_42 = arith.constant 0 : index
    %c1_43 = arith.constant 1 : index
    %c0_44 = arith.constant 0 : index
    %c0_45 = arith.constant 0 : index
    %55 = vector.load %arg9[%c0_42, %c1_43, %c0_44, %c0_45] : memref<3x3x4x8xbf16, #tpu.memory_space<vmem>>, vector<1x1x4x8xbf16>
    %56 = vector.shape_cast %55 : vector<1x1x4x8xbf16> to vector<4x8xbf16>
    %cst_46 = arith.constant dense<0.000000e+00> : vector<128x8xf32>
    %57 = tpu.matmul %50, %56, %cst_46 {dimension_numbers = #tpu.dot_dimension_numbers<[1], [0], [0], [1], [0, 0, 1, 1], [], []>} : vector<128x4xbf16>, vector<4x8xbf16>, vector<128x8xf32> -> vector<128x8xf32>
    %58 = arith.addf %54, %57 : vector<128x8xf32>
    %59 = vector.extract_strided_slice %12 {offsets = [0, 2, 0], sizes = [8, 16, 4], strides = [1, 1, 1]} : vector<10x18x4xbf16> to vector<8x16x4xbf16>
    %60 = vector.shape_cast %59 : vector<8x16x4xbf16> to vector<128x4xbf16>
    %61 = vector.extract_strided_slice %33 {offsets = [0, 2, 0], sizes = [8, 16, 4], strides = [1, 1, 1]} : vector<10x18x4xbf16> to vector<8x16x4xbf16>
    %62 = vector.shape_cast %61 : vector<8x16x4xbf16> to vector<128x4xbf16>
    %c0_47 = arith.constant 0 : index
    %c2 = arith.constant 2 : index
    %c0_48 = arith.constant 0 : index
    %c0_49 = arith.constant 0 : index
    %63 = vector.load %arg8[%c0_47, %c2, %c0_48, %c0_49] : memref<3x3x4x8xbf16, #tpu.memory_space<vmem>>, vector<1x1x4x8xbf16>
    %64 = vector.shape_cast %63 : vector<1x1x4x8xbf16> to vector<4x8xbf16>
    %cst_50 = arith.constant dense<0.000000e+00> : vector<128x8xf32>
    %65 = tpu.matmul %60, %64, %cst_50 {dimension_numbers = #tpu.dot_dimension_numbers<[1], [0], [0], [1], [0, 0, 1, 1], [], []>} : vector<128x4xbf16>, vector<4x8xbf16>, vector<128x8xf32> -> vector<128x8xf32>
    %66 = arith.addf %58, %65 : vector<128x8xf32>
    %c0_51 = arith.constant 0 : index
    %c2_52 = arith.constant 2 : index
    %c0_53 = arith.constant 0 : index
    %c0_54 = arith.constant 0 : index
    %67 = vector.load %arg9[%c0_51, %c2_52, %c0_53, %c0_54] : memref<3x3x4x8xbf16, #tpu.memory_space<vmem>>, vector<1x1x4x8xbf16>
    %68 = vector.shape_cast %67 : vector<1x1x4x8xbf16> to vector<4x8xbf16>
    %cst_55 = arith.constant dense<0.000000e+00> : vector<128x8xf32>
    %69 = tpu.matmul %62, %68, %cst_55 {dimension_numbers = #tpu.dot_dimension_numbers<[1], [0], [0], [1], [0, 0, 1, 1], [], []>} : vector<128x4xbf16>, vector<4x8xbf16>, vector<128x8xf32> -> vector<128x8xf32>
    %70 = arith.addf %66, %69 : vector<128x8xf32>
    %71 = vector.extract_strided_slice %12 {offsets = [1, 0, 0], sizes = [8, 16, 4], strides = [1, 1, 1]} : vector<10x18x4xbf16> to vector<8x16x4xbf16>
    %72 = vector.shape_cast %71 : vector<8x16x4xbf16> to vector<128x4xbf16>
    %73 = vector.extract_strided_slice %33 {offsets = [1, 0, 0], sizes = [8, 16, 4], strides = [1, 1, 1]} : vector<10x18x4xbf16> to vector<8x16x4xbf16>
    %74 = vector.shape_cast %73 : vector<8x16x4xbf16> to vector<128x4xbf16>
    %c1_56 = arith.constant 1 : index
    %c0_57 = arith.constant 0 : index
    %c0_58 = arith.constant 0 : index
    %c0_59 = arith.constant 0 : index
    %75 = vector.load %arg8[%c1_56, %c0_57, %c0_58, %c0_59] : memref<3x3x4x8xbf16, #tpu.memory_space<vmem>>, vector<1x1x4x8xbf16>
    %76 = vector.shape_cast %75 : vector<1x1x4x8xbf16> to vector<4x8xbf16>
    %cst_60 = arith.constant dense<0.000000e+00> : vector<128x8xf32>
    %77 = tpu.matmul %72, %76, %cst_60 {dimension_numbers = #tpu.dot_dimension_numbers<[1], [0], [0], [1], [0, 0, 1, 1], [], []>} : vector<128x4xbf16>, vector<4x8xbf16>, vector<128x8xf32> -> vector<128x8xf32>
    %78 = arith.addf %70, %77 : vector<128x8xf32>
    %c1_61 = arith.constant 1 : index
    %c0_62 = arith.constant 0 : index
    %c0_63 = arith.constant 0 : index
    %c0_64 = arith.constant 0 : index
    %79 = vector.load %arg9[%c1_61, %c0_62, %c0_63, %c0_64] : memref<3x3x4x8xbf16, #tpu.memory_space<vmem>>, vector<1x1x4x8xbf16>
    %80 = vector.shape_cast %79 : vector<1x1x4x8xbf16> to vector<4x8xbf16>
    %cst_65 = arith.constant dense<0.000000e+00> : vector<128x8xf32>
    %81 = tpu.matmul %74, %80, %cst_65 {dimension_numbers = #tpu.dot_dimension_numbers<[1], [0], [0], [1], [0, 0, 1, 1], [], []>} : vector<128x4xbf16>, vector<4x8xbf16>, vector<128x8xf32> -> vector<128x8xf32>
    %82 = arith.addf %78, %81 : vector<128x8xf32>
    %83 = vector.extract_strided_slice %12 {offsets = [1, 1, 0], sizes = [8, 16, 4], strides = [1, 1, 1]} : vector<10x18x4xbf16> to vector<8x16x4xbf16>
    %84 = vector.shape_cast %83 : vector<8x16x4xbf16> to vector<128x4xbf16>
    %85 = vector.extract_strided_slice %33 {offsets = [1, 1, 0], sizes = [8, 16, 4], strides = [1, 1, 1]} : vector<10x18x4xbf16> to vector<8x16x4xbf16>
    %86 = vector.shape_cast %85 : vector<8x16x4xbf16> to vector<128x4xbf16>
    %c1_66 = arith.constant 1 : index
    %c1_67 = arith.constant 1 : index
    %c0_68 = arith.constant 0 : index
    %c0_69 = arith.constant 0 : index
    %87 = vector.load %arg8[%c1_66, %c1_67, %c0_68, %c0_69] : memref<3x3x4x8xbf16, #tpu.memory_space<vmem>>, vector<1x1x4x8xbf16>
    %88 = vector.shape_cast %87 : vector<1x1x4x8xbf16> to vector<4x8xbf16>
    %cst_70 = arith.constant dense<0.000000e+00> : vector<128x8xf32>
    %89 = tpu.matmul %84, %88, %cst_70 {dimension_numbers = #tpu.dot_dimension_numbers<[1], [0], [0], [1], [0, 0, 1, 1], [], []>} : vector<128x4xbf16>, vector<4x8xbf16>, vector<128x8xf32> -> vector<128x8xf32>
    %90 = arith.addf %82, %89 : vector<128x8xf32>
    %c1_71 = arith.constant 1 : index
    %c1_72 = arith.constant 1 : index
    %c0_73 = arith.constant 0 : index
    %c0_74 = arith.constant 0 : index
    %91 = vector.load %arg9[%c1_71, %c1_72, %c0_73, %c0_74] : memref<3x3x4x8xbf16, #tpu.memory_space<vmem>>, vector<1x1x4x8xbf16>
    %92 = vector.shape_cast %91 : vector<1x1x4x8xbf16> to vector<4x8xbf16>
    %cst_75 = arith.constant dense<0.000000e+00> : vector<128x8xf32>
    %93 = tpu.matmul %86, %92, %cst_75 {dimension_numbers = #tpu.dot_dimension_numbers<[1], [0], [0], [1], [0, 0, 1, 1], [], []>} : vector<128x4xbf16>, vector<4x8xbf16>, vector<128x8xf32> -> vector<128x8xf32>
    %94 = arith.addf %90, %93 : vector<128x8xf32>
    %95 = vector.extract_strided_slice %12 {offsets = [1, 2, 0], sizes = [8, 16, 4], strides = [1, 1, 1]} : vector<10x18x4xbf16> to vector<8x16x4xbf16>
    %96 = vector.shape_cast %95 : vector<8x16x4xbf16> to vector<128x4xbf16>
    %97 = vector.extract_strided_slice %33 {offsets = [1, 2, 0], sizes = [8, 16, 4], strides = [1, 1, 1]} : vector<10x18x4xbf16> to vector<8x16x4xbf16>
    %98 = vector.shape_cast %97 : vector<8x16x4xbf16> to vector<128x4xbf16>
    %c1_76 = arith.constant 1 : index
    %c2_77 = arith.constant 2 : index
    %c0_78 = arith.constant 0 : index
    %c0_79 = arith.constant 0 : index
    %99 = vector.load %arg8[%c1_76, %c2_77, %c0_78, %c0_79] : memref<3x3x4x8xbf16, #tpu.memory_space<vmem>>, vector<1x1x4x8xbf16>
    %100 = vector.shape_cast %99 : vector<1x1x4x8xbf16> to vector<4x8xbf16>
    %cst_80 = arith.constant dense<0.000000e+00> : vector<128x8xf32>
    %101 = tpu.matmul %96, %100, %cst_80 {dimension_numbers = #tpu.dot_dimension_numbers<[1], [0], [0], [1], [0, 0, 1, 1], [], []>} : vector<128x4xbf16>, vector<4x8xbf16>, vector<128x8xf32> -> vector<128x8xf32>
    %102 = arith.addf %94, %101 : vector<128x8xf32>
    %c1_81 = arith.constant 1 : index
    %c2_82 = arith.constant 2 : index
    %c0_83 = arith.constant 0 : index
    %c0_84 = arith.constant 0 : index
    %103 = vector.load %arg9[%c1_81, %c2_82, %c0_83, %c0_84] : memref<3x3x4x8xbf16, #tpu.memory_space<vmem>>, vector<1x1x4x8xbf16>
    %104 = vector.shape_cast %103 : vector<1x1x4x8xbf16> to vector<4x8xbf16>
    %cst_85 = arith.constant dense<0.000000e+00> : vector<128x8xf32>
    %105 = tpu.matmul %98, %104, %cst_85 {dimension_numbers = #tpu.dot_dimension_numbers<[1], [0], [0], [1], [0, 0, 1, 1], [], []>} : vector<128x4xbf16>, vector<4x8xbf16>, vector<128x8xf32> -> vector<128x8xf32>
    %106 = arith.addf %102, %105 : vector<128x8xf32>
    %107 = vector.extract_strided_slice %12 {offsets = [2, 0, 0], sizes = [8, 16, 4], strides = [1, 1, 1]} : vector<10x18x4xbf16> to vector<8x16x4xbf16>
    %108 = vector.shape_cast %107 : vector<8x16x4xbf16> to vector<128x4xbf16>
    %109 = vector.extract_strided_slice %33 {offsets = [2, 0, 0], sizes = [8, 16, 4], strides = [1, 1, 1]} : vector<10x18x4xbf16> to vector<8x16x4xbf16>
    %110 = vector.shape_cast %109 : vector<8x16x4xbf16> to vector<128x4xbf16>
    %c2_86 = arith.constant 2 : index
    %c0_87 = arith.constant 0 : index
    %c0_88 = arith.constant 0 : index
    %c0_89 = arith.constant 0 : index
    %111 = vector.load %arg8[%c2_86, %c0_87, %c0_88, %c0_89] : memref<3x3x4x8xbf16, #tpu.memory_space<vmem>>, vector<1x1x4x8xbf16>
    %112 = vector.shape_cast %111 : vector<1x1x4x8xbf16> to vector<4x8xbf16>
    %cst_90 = arith.constant dense<0.000000e+00> : vector<128x8xf32>
    %113 = tpu.matmul %108, %112, %cst_90 {dimension_numbers = #tpu.dot_dimension_numbers<[1], [0], [0], [1], [0, 0, 1, 1], [], []>} : vector<128x4xbf16>, vector<4x8xbf16>, vector<128x8xf32> -> vector<128x8xf32>
    %114 = arith.addf %106, %113 : vector<128x8xf32>
    %c2_91 = arith.constant 2 : index
    %c0_92 = arith.constant 0 : index
    %c0_93 = arith.constant 0 : index
    %c0_94 = arith.constant 0 : index
    %115 = vector.load %arg9[%c2_91, %c0_92, %c0_93, %c0_94] : memref<3x3x4x8xbf16, #tpu.memory_space<vmem>>, vector<1x1x4x8xbf16>
    %116 = vector.shape_cast %115 : vector<1x1x4x8xbf16> to vector<4x8xbf16>
    %cst_95 = arith.constant dense<0.000000e+00> : vector<128x8xf32>
    %117 = tpu.matmul %110, %116, %cst_95 {dimension_numbers = #tpu.dot_dimension_numbers<[1], [0], [0], [1], [0, 0, 1, 1], [], []>} : vector<128x4xbf16>, vector<4x8xbf16>, vector<128x8xf32> -> vector<128x8xf32>
    %118 = arith.addf %114, %117 : vector<128x8xf32>
    %119 = vector.extract_strided_slice %12 {offsets = [2, 1, 0], sizes = [8, 16, 4], strides = [1, 1, 1]} : vector<10x18x4xbf16> to vector<8x16x4xbf16>
    %120 = vector.shape_cast %119 : vector<8x16x4xbf16> to vector<128x4xbf16>
    %121 = vector.extract_strided_slice %33 {offsets = [2, 1, 0], sizes = [8, 16, 4], strides = [1, 1, 1]} : vector<10x18x4xbf16> to vector<8x16x4xbf16>
    %122 = vector.shape_cast %121 : vector<8x16x4xbf16> to vector<128x4xbf16>
    %c2_96 = arith.constant 2 : index
    %c1_97 = arith.constant 1 : index
    %c0_98 = arith.constant 0 : index
    %c0_99 = arith.constant 0 : index
    %123 = vector.load %arg8[%c2_96, %c1_97, %c0_98, %c0_99] : memref<3x3x4x8xbf16, #tpu.memory_space<vmem>>, vector<1x1x4x8xbf16>
    %124 = vector.shape_cast %123 : vector<1x1x4x8xbf16> to vector<4x8xbf16>
    %cst_100 = arith.constant dense<0.000000e+00> : vector<128x8xf32>
    %125 = tpu.matmul %120, %124, %cst_100 {dimension_numbers = #tpu.dot_dimension_numbers<[1], [0], [0], [1], [0, 0, 1, 1], [], []>} : vector<128x4xbf16>, vector<4x8xbf16>, vector<128x8xf32> -> vector<128x8xf32>
    %126 = arith.addf %118, %125 : vector<128x8xf32>
    %c2_101 = arith.constant 2 : index
    %c1_102 = arith.constant 1 : index
    %c0_103 = arith.constant 0 : index
    %c0_104 = arith.constant 0 : index
    %127 = vector.load %arg9[%c2_101, %c1_102, %c0_103, %c0_104] : memref<3x3x4x8xbf16, #tpu.memory_space<vmem>>, vector<1x1x4x8xbf16>
    %128 = vector.shape_cast %127 : vector<1x1x4x8xbf16> to vector<4x8xbf16>
    %cst_105 = arith.constant dense<0.000000e+00> : vector<128x8xf32>
    %129 = tpu.matmul %122, %128, %cst_105 {dimension_numbers = #tpu.dot_dimension_numbers<[1], [0], [0], [1], [0, 0, 1, 1], [], []>} : vector<128x4xbf16>, vector<4x8xbf16>, vector<128x8xf32> -> vector<128x8xf32>
    %130 = arith.addf %126, %129 : vector<128x8xf32>
    %131 = vector.extract_strided_slice %12 {offsets = [2, 2, 0], sizes = [8, 16, 4], strides = [1, 1, 1]} : vector<10x18x4xbf16> to vector<8x16x4xbf16>
    %132 = vector.shape_cast %131 : vector<8x16x4xbf16> to vector<128x4xbf16>
    %133 = vector.extract_strided_slice %33 {offsets = [2, 2, 0], sizes = [8, 16, 4], strides = [1, 1, 1]} : vector<10x18x4xbf16> to vector<8x16x4xbf16>
    %134 = vector.shape_cast %133 : vector<8x16x4xbf16> to vector<128x4xbf16>
    %c2_106 = arith.constant 2 : index
    %c2_107 = arith.constant 2 : index
    %c0_108 = arith.constant 0 : index
    %c0_109 = arith.constant 0 : index
    %135 = vector.load %arg8[%c2_106, %c2_107, %c0_108, %c0_109] : memref<3x3x4x8xbf16, #tpu.memory_space<vmem>>, vector<1x1x4x8xbf16>
    %136 = vector.shape_cast %135 : vector<1x1x4x8xbf16> to vector<4x8xbf16>
    %cst_110 = arith.constant dense<0.000000e+00> : vector<128x8xf32>
    %137 = tpu.matmul %132, %136, %cst_110 {dimension_numbers = #tpu.dot_dimension_numbers<[1], [0], [0], [1], [0, 0, 1, 1], [], []>} : vector<128x4xbf16>, vector<4x8xbf16>, vector<128x8xf32> -> vector<128x8xf32>
    %138 = arith.addf %130, %137 : vector<128x8xf32>
    %c2_111 = arith.constant 2 : index
    %c2_112 = arith.constant 2 : index
    %c0_113 = arith.constant 0 : index
    %c0_114 = arith.constant 0 : index
    %139 = vector.load %arg9[%c2_111, %c2_112, %c0_113, %c0_114] : memref<3x3x4x8xbf16, #tpu.memory_space<vmem>>, vector<1x1x4x8xbf16>
    %140 = vector.shape_cast %139 : vector<1x1x4x8xbf16> to vector<4x8xbf16>
    %cst_115 = arith.constant dense<0.000000e+00> : vector<128x8xf32>
    %141 = tpu.matmul %134, %140, %cst_115 {dimension_numbers = #tpu.dot_dimension_numbers<[1], [0], [0], [1], [0, 0, 1, 1], [], []>} : vector<128x4xbf16>, vector<4x8xbf16>, vector<128x8xf32> -> vector<128x8xf32>
    %142 = arith.addf %138, %141 : vector<128x8xf32>
    %c0_116 = arith.constant 0 : index
    %c0_117 = arith.constant 0 : index
    %143 = vector.load %arg10[%c0_116, %c0_117] : memref<1x8xf32, #tpu.memory_space<vmem>>, vector<1x8xf32>
    %144 = vector.broadcast %143 : vector<1x8xf32> to vector<128x8xf32>
    %145 = arith.addf %142, %144 : vector<128x8xf32>
    %cst_118 = arith.constant dense<0.000000e+00> : vector<8xf32>
    %146 = vector.multi_reduction <add>, %145, %cst_118 [0] : vector<128x8xf32> to vector<8xf32>
    %147 = vector.shape_cast %146 : vector<8xf32> to vector<1x8xf32>
    %148 = arith.mulf %145, %145 : vector<128x8xf32>
    %cst_119 = arith.constant dense<0.000000e+00> : vector<8xf32>
    %149 = vector.multi_reduction <add>, %148, %cst_119 [0] : vector<128x8xf32> to vector<8xf32>
    %150 = vector.shape_cast %149 : vector<8xf32> to vector<1x8xf32>
    %151 = tpu.concatenate %147, %150 in 0 : vector<1x8xf32>, vector<1x8xf32> -> vector<2x8xf32>
    %152 = vector.shape_cast %151 : vector<2x8xf32> to vector<1x1x2x8xf32>
    %c0_120 = arith.constant 0 : index
    %c0_121 = arith.constant 0 : index
    %c0_122 = arith.constant 0 : index
    %c0_123 = arith.constant 0 : index
    %153 = vector.load %arg12[%c0_120, %c0_121, %c0_122, %c0_123] : memref<1x1x2x8xf32, #tpu.memory_space<vmem>>, vector<1x1x2x8xf32>
    tpu.vector_store %arg12[%c0_120, %c0_121, %c0_122, %c0_123], %152 {strides = array<i32>} : memref<1x1x2x8xf32, #tpu.memory_space<vmem>>, vector<1x1x2x8xf32>,
    %154 = vector.shape_cast %145 : vector<128x8xf32> to vector<1x8x16x8xf32>
    %155 = arith.truncf %154 : vector<1x8x16x8xf32> to vector<1x8x16x8xbf16>
    %c0_124 = arith.constant 0 : index
    %c0_125 = arith.constant 0 : index
    %c0_126 = arith.constant 0 : index
    %c0_127 = arith.constant 0 : index
    %156 = vector.load %arg11[%c0_124, %c0_125, %c0_126, %c0_127] : memref<1x8x16x8xbf16, #tpu.memory_space<vmem>>, vector<1x8x16x8xbf16>
    tpu.vector_store %arg11[%c0_124, %c0_125, %c0_126, %c0_127], %155 {strides = array<i32>} : memref<1x8x16x8xbf16, #tpu.memory_space<vmem>>, vector<1x8x16x8xbf16>,
    return
  }
  func.func @transform_0(%arg0: i32, %arg1: i32) -> (i32, i32, i32) {
    %c0_i32 = arith.constant 0 : i32
    %c0_i32_0 = arith.constant 0 : i32
    %c0_i32_1 = arith.constant 0 : i32
    return %arg1, %c0_i32, %c0_i32_0 : i32, i32, i32
  }
  func.func @transform_1(%arg0: i32, %arg1: i32) -> (i32, i32) {
    %c0_i32 = arith.constant 0 : i32
    %c0_i32_0 = arith.constant 0 : i32
    %c0_i32_1 = arith.constant 0 : i32
    return %c0_i32, %c0_i32_0 : i32, i32
  }
  func.func @transform_2(%arg0: i32, %arg1: i32) -> (i32, i32, i32, i32) {
    %c0_i32 = arith.constant 0 : i32
    %c0_i32_0 = arith.constant 0 : i32
    %c0_i32_1 = arith.constant 0 : i32
    %c0_i32_2 = arith.constant 0 : i32
    return %arg0, %c0_i32, %c0_i32_0, %c0_i32_1 : i32, i32, i32, i32
  }
  func.func @transform_3(%arg0: i32, %arg1: i32) -> (i32, i32, i32, i32) {
    %c0_i32 = arith.constant 0 : i32
    %c0_i32_0 = arith.constant 0 : i32
    %c0_i32_1 = arith.constant 0 : i32
    return %arg0, %arg1, %c0_i32, %c0_i32_0 : i32, i32, i32, i32
  }
  func.func @transform_4(%arg0: i32, %arg1: i32) -> (i32, i32, i32, i32) {
    %c8_i32 = arith.constant 8 : i32
    %0 = arith.muli %arg1, %c8_i32 : i32
    %c1_i32 = arith.constant 1 : i32
    %1 = arith.subi %0, %c1_i32 : i32
    %c0_i32 = arith.constant 0 : i32
    %2 = arith.maxsi %1, %c0_i32 : i32
    %c0_i32_0 = arith.constant 0 : i32
    %c0_i32_1 = arith.constant 0 : i32
    %c0_i32_2 = arith.constant 0 : i32
    return %arg0, %2, %c0_i32_0, %c0_i32_1 : i32, i32, i32, i32
  }
  func.func @transform_5(%arg0: i32, %arg1: i32) -> (i32, i32, i32, i32) {
    %c1_i32 = arith.constant 1 : i32
    %0 = arith.addi %arg1, %c1_i32 : i32
    %c8_i32 = arith.constant 8 : i32
    %1 = arith.muli %0, %c8_i32 : i32
    %c15_i32 = arith.constant 15 : i32
    %2 = arith.minsi %1, %c15_i32 : i32
    %c0_i32 = arith.constant 0 : i32
    %c0_i32_0 = arith.constant 0 : i32
    %c0_i32_1 = arith.constant 0 : i32
    return %arg0, %2, %c0_i32, %c0_i32_0 : i32, i32, i32, i32
  }
  func.func @transform_6(%arg0: i32, %arg1: i32) -> (i32, i32, i32, i32) {
    %c0_i32 = arith.constant 0 : i32
    %c0_i32_0 = arith.constant 0 : i32
    %c0_i32_1 = arith.constant 0 : i32
    %c0_i32_2 = arith.constant 0 : i32
    %c0_i32_3 = arith.constant 0 : i32
    return %c0_i32, %c0_i32_0, %c0_i32_1, %c0_i32_2 : i32, i32, i32, i32
  }
  func.func @transform_7(%arg0: i32, %arg1: i32) -> (i32, i32, i32, i32) {
    %c0_i32 = arith.constant 0 : i32
    %c0_i32_0 = arith.constant 0 : i32
    %c0_i32_1 = arith.constant 0 : i32
    %c0_i32_2 = arith.constant 0 : i32
    %c0_i32_3 = arith.constant 0 : i32
    return %c0_i32, %c0_i32_0, %c0_i32_1, %c0_i32_2 : i32, i32, i32, i32
  }
  func.func @transform_8(%arg0: i32, %arg1: i32) -> (i32, i32) {
    %c0_i32 = arith.constant 0 : i32
    %c0_i32_0 = arith.constant 0 : i32
    %c0_i32_1 = arith.constant 0 : i32
    return %c0_i32, %c0_i32_0 : i32, i32
  }
  func.func @transform_9(%arg0: i32, %arg1: i32) -> (i32, i32, i32, i32) {
    %c0_i32 = arith.constant 0 : i32
    %c0_i32_0 = arith.constant 0 : i32
    %c0_i32_1 = arith.constant 0 : i32
    return %arg0, %arg1, %c0_i32, %c0_i32_0 : i32, i32, i32, i32
  }
  func.func @transform_10(%arg0: i32, %arg1: i32) -> (i32, i32, i32, i32) {
    %c0_i32 = arith.constant 0 : i32
    %c0_i32_0 = arith.constant 0 : i32
    %c0_i32_1 = arith.constant 0 : i32
    return %arg0, %arg1, %c0_i32, %c0_i32_0 : i32, i32, i32, i32
  }
}

module attributes {stable_mosaic.version = 11 : i64} {
  func.func @_bn_act_kernel(%arg0: i32, %arg1: i32, %arg2: memref<1x8x16x8xbf16, #tpu.memory_space<vmem>>, %arg3: memref<1x8xf32, #tpu.memory_space<vmem>>, %arg4: memref<1x8xf32, #tpu.memory_space<vmem>>, %arg5: memref<1x8x16x8xf32, #tpu.memory_space<vmem>>) attributes {dimension_semantics = [#tpu.dimension_semantics<parallel>, #tpu.dimension_semantics<parallel>], iteration_bounds = array<i64: 2, 2>, scalar_prefetch = 0 : i64, scratch_operands = 0 : i64, tpu.core_type = #tpu.core_type<tc>, window_params = [{transform_indices = @transform_0, window_bounds = array<i64: 1, 8, 16, 8>}, {pipeline_mode = #tpu.pipeline_mode<synchronous>, transform_indices = @transform_1, window_bounds = array<i64: 1, 8>}, {pipeline_mode = #tpu.pipeline_mode<synchronous>, transform_indices = @transform_2, window_bounds = array<i64: 1, 8>}, {transform_indices = @transform_3, window_bounds = array<i64: 1, 8, 16, 8>}]} {
    %c0 = arith.constant 0 : index
    %c0_0 = arith.constant 0 : index
    %c0_1 = arith.constant 0 : index
    %c0_2 = arith.constant 0 : index
    %0 = vector.load %arg2[%c0, %c0_0, %c0_1, %c0_2] : memref<1x8x16x8xbf16, #tpu.memory_space<vmem>>, vector<1x8x16x8xbf16>
    %1 = arith.extf %0 : vector<1x8x16x8xbf16> to vector<1x8x16x8xf32>
    %c0_3 = arith.constant 0 : index
    %c0_4 = arith.constant 0 : index
    %2 = vector.load %arg3[%c0_3, %c0_4] : memref<1x8xf32, #tpu.memory_space<vmem>>, vector<1x8xf32>
    %3 = vector.shape_cast %2 : vector<1x8xf32> to vector<1x1x1x8xf32>
    %4 = vector.broadcast %3 : vector<1x1x1x8xf32> to vector<1x8x16x8xf32>
    %5 = arith.mulf %1, %4 : vector<1x8x16x8xf32>
    %c0_5 = arith.constant 0 : index
    %c0_6 = arith.constant 0 : index
    %6 = vector.load %arg4[%c0_5, %c0_6] : memref<1x8xf32, #tpu.memory_space<vmem>>, vector<1x8xf32>
    %7 = vector.shape_cast %6 : vector<1x8xf32> to vector<1x1x1x8xf32>
    %8 = vector.broadcast %7 : vector<1x1x1x8xf32> to vector<1x8x16x8xf32>
    %9 = arith.addf %5, %8 : vector<1x8x16x8xf32>
    %cst = arith.constant 0.000000e+00 : f32
    %10 = vector.broadcast %cst : f32 to vector<1x8x16x8xf32>
    %11 = arith.cmpf oge, %9, %10 : vector<1x8x16x8xf32>
    %cst_7 = arith.constant 0.00999999977 : f32
    %12 = vector.broadcast %cst_7 : f32 to vector<1x8x16x8xf32>
    %13 = arith.mulf %12, %9 : vector<1x8x16x8xf32>
    %14 = arith.select %11, %9, %13 : vector<1x8x16x8xi1>, vector<1x8x16x8xf32>
    %c0_8 = arith.constant 0 : index
    %c0_9 = arith.constant 0 : index
    %c0_10 = arith.constant 0 : index
    %c0_11 = arith.constant 0 : index
    %15 = vector.load %arg5[%c0_8, %c0_9, %c0_10, %c0_11] : memref<1x8x16x8xf32, #tpu.memory_space<vmem>>, vector<1x8x16x8xf32>
    tpu.vector_store %arg5[%c0_8, %c0_9, %c0_10, %c0_11], %14 {strides = array<i32>} : memref<1x8x16x8xf32, #tpu.memory_space<vmem>>, vector<1x8x16x8xf32>,
    return
  }
  func.func @transform_0(%arg0: i32, %arg1: i32) -> (i32, i32, i32, i32) {
    %c0_i32 = arith.constant 0 : i32
    %c0_i32_0 = arith.constant 0 : i32
    %c0_i32_1 = arith.constant 0 : i32
    return %arg0, %arg1, %c0_i32, %c0_i32_0 : i32, i32, i32, i32
  }
  func.func @transform_1(%arg0: i32, %arg1: i32) -> (i32, i32) {
    %c0_i32 = arith.constant 0 : i32
    %c0_i32_0 = arith.constant 0 : i32
    %c0_i32_1 = arith.constant 0 : i32
    return %c0_i32, %c0_i32_0 : i32, i32
  }
  func.func @transform_2(%arg0: i32, %arg1: i32) -> (i32, i32) {
    %c0_i32 = arith.constant 0 : i32
    %c0_i32_0 = arith.constant 0 : i32
    %c0_i32_1 = arith.constant 0 : i32
    return %c0_i32, %c0_i32_0 : i32, i32
  }
  func.func @transform_3(%arg0: i32, %arg1: i32) -> (i32, i32, i32, i32) {
    %c0_i32 = arith.constant 0 : i32
    %c0_i32_0 = arith.constant 0 : i32
    %c0_i32_1 = arith.constant 0 : i32
    return %arg0, %arg1, %c0_i32, %c0_i32_0 : i32, i32, i32, i32
  }
}

module attributes {stable_mosaic.version = 11 : i64} {
  func.func @_conv2_kernel(%arg0: i32, %arg1: i32, %arg2: memref<1x8x16x8xbf16, #tpu.memory_space<vmem>>, %arg3: memref<1x1x16x8xbf16, #tpu.memory_space<vmem>>, %arg4: memref<1x1x16x8xbf16, #tpu.memory_space<vmem>>, %arg5: memref<1x8xf32, #tpu.memory_space<vmem>>, %arg6: memref<1x8xf32, #tpu.memory_space<vmem>>, %arg7: memref<3x3x8x8xbf16, #tpu.memory_space<vmem>>, %arg8: memref<1x8xf32, #tpu.memory_space<vmem>>, %arg9: memref<1x8x16x8xbf16, #tpu.memory_space<vmem>>, %arg10: memref<1x1x2x8xf32, #tpu.memory_space<vmem>>) attributes {dimension_semantics = [#tpu.dimension_semantics<parallel>, #tpu.dimension_semantics<parallel>], iteration_bounds = array<i64: 2, 2>, scalar_prefetch = 0 : i64, scratch_operands = 0 : i64, tpu.core_type = #tpu.core_type<tc>, window_params = [{transform_indices = @transform_0, window_bounds = array<i64: 1, 8, 16, 8>}, {transform_indices = @transform_1, window_bounds = array<i64: 1, 1, 16, 8>}, {transform_indices = @transform_2, window_bounds = array<i64: 1, 1, 16, 8>}, {pipeline_mode = #tpu.pipeline_mode<synchronous>, transform_indices = @transform_3, window_bounds = array<i64: 1, 8>}, {pipeline_mode = #tpu.pipeline_mode<synchronous>, transform_indices = @transform_4, window_bounds = array<i64: 1, 8>}, {pipeline_mode = #tpu.pipeline_mode<synchronous>, transform_indices = @transform_5, window_bounds = array<i64: 3, 3, 8, 8>}, {pipeline_mode = #tpu.pipeline_mode<synchronous>, transform_indices = @transform_6, window_bounds = array<i64: 1, 8>}, {transform_indices = @transform_7, window_bounds = array<i64: 1, 8, 16, 8>}, {transform_indices = @transform_8, window_bounds = array<i64: 1, 1, 2, 8>}]} {
    %c0 = arith.constant 0 : index
    %c0_0 = arith.constant 0 : index
    %0 = vector.load %arg5[%c0, %c0_0] : memref<1x8xf32, #tpu.memory_space<vmem>>, vector<1x8xf32>
    %1 = vector.shape_cast %0 : vector<1x8xf32> to vector<1x1x8xf32>
    %c0_1 = arith.constant 0 : index
    %c0_2 = arith.constant 0 : index
    %2 = vector.load %arg6[%c0_1, %c0_2] : memref<1x8xf32, #tpu.memory_space<vmem>>, vector<1x8xf32>
    %3 = vector.shape_cast %2 : vector<1x8xf32> to vector<1x1x8xf32>
    %c0_i32 = arith.constant 0 : i32
    %4 = arith.cmpi eq, %arg1, %c0_i32 : i32
    %cst = arith.constant 0.000000e+00 : f32
    %cst_3 = arith.constant 1.000000e+00 : f32
    %5 = arith.select %4, %cst, %cst_3 : f32
    %c1_i32 = arith.constant 1 : i32
    %6 = arith.cmpi eq, %arg1, %c1_i32 : i32
    %cst_4 = arith.constant 0.000000e+00 : f32
    %cst_5 = arith.constant 1.000000e+00 : f32
    %7 = arith.select %6, %cst_4, %cst_5 : f32
    %c0_6 = arith.constant 0 : index
    %c0_7 = arith.constant 0 : index
    %c0_8 = arith.constant 0 : index
    %c0_9 = arith.constant 0 : index
    %8 = vector.load %arg3[%c0_6, %c0_7, %c0_8, %c0_9] : memref<1x1x16x8xbf16, #tpu.memory_space<vmem>>, vector<1x1x16x8xbf16>
    %9 = vector.shape_cast %8 : vector<1x1x16x8xbf16> to vector<1x16x8xbf16>
    %10 = arith.extf %9 : vector<1x16x8xbf16> to vector<1x16x8xf32>
    %11 = vector.broadcast %1 : vector<1x1x8xf32> to vector<1x16x8xf32>
    %12 = arith.mulf %10, %11 : vector<1x16x8xf32>
    %13 = vector.broadcast %3 : vector<1x1x8xf32> to vector<1x16x8xf32>
    %14 = arith.addf %12, %13 : vector<1x16x8xf32>
    %cst_10 = arith.constant 0.000000e+00 : f32
    %15 = vector.broadcast %cst_10 : f32 to vector<1x16x8xf32>
    %16 = arith.cmpf oge, %14, %15 : vector<1x16x8xf32>
    %cst_11 = arith.constant 0.00999999977 : f32
    %17 = vector.broadcast %cst_11 : f32 to vector<1x16x8xf32>
    %18 = arith.mulf %17, %14 : vector<1x16x8xf32>
    %19 = arith.select %16, %14, %18 : vector<1x16x8xi1>, vector<1x16x8xf32>
    %20 = vector.broadcast %5 : f32 to vector<1x16x8xf32>
    %21 = arith.mulf %19, %20 : vector<1x16x8xf32>
    %c0_12 = arith.constant 0 : index
    %c0_13 = arith.constant 0 : index
    %c0_14 = arith.constant 0 : index
    %c0_15 = arith.constant 0 : index
    %22 = vector.load %arg2[%c0_12, %c0_13, %c0_14, %c0_15] : memref<1x8x16x8xbf16, #tpu.memory_space<vmem>>, vector<1x8x16x8xbf16>
    %23 = vector.shape_cast %22 : vector<1x8x16x8xbf16> to vector<8x16x8xbf16>
    %24 = arith.extf %23 : vector<8x16x8xbf16> to vector<8x16x8xf32>
    %25 = vector.broadcast %1 : vector<1x1x8xf32> to vector<8x16x8xf32>
    %26 = arith.mulf %24, %25 : vector<8x16x8xf32>
    %27 = vector.broadcast %3 : vector<1x1x8xf32> to vector<8x16x8xf32>
    %28 = arith.addf %26, %27 : vector<8x16x8xf32>
    %cst_16 = arith.constant 0.000000e+00 : f32
    %29 = vector.broadcast %cst_16 : f32 to vector<8x16x8xf32>
    %30 = arith.cmpf oge, %28, %29 : vector<8x16x8xf32>
    %cst_17 = arith.constant 0.00999999977 : f32
    %31 = vector.broadcast %cst_17 : f32 to vector<8x16x8xf32>
    %32 = arith.mulf %31, %28 : vector<8x16x8xf32>
    %33 = arith.select %30, %28, %32 : vector<8x16x8xi1>, vector<8x16x8xf32>
    %c0_18 = arith.constant 0 : index
    %c0_19 = arith.constant 0 : index
    %c0_20 = arith.constant 0 : index
    %c0_21 = arith.constant 0 : index
    %34 = vector.load %arg4[%c0_18, %c0_19, %c0_20, %c0_21] : memref<1x1x16x8xbf16, #tpu.memory_space<vmem>>, vector<1x1x16x8xbf16>
    %35 = vector.shape_cast %34 : vector<1x1x16x8xbf16> to vector<1x16x8xbf16>
    %36 = arith.extf %35 : vector<1x16x8xbf16> to vector<1x16x8xf32>
    %37 = vector.broadcast %1 : vector<1x1x8xf32> to vector<1x16x8xf32>
    %38 = arith.mulf %36, %37 : vector<1x16x8xf32>
    %39 = vector.broadcast %3 : vector<1x1x8xf32> to vector<1x16x8xf32>
    %40 = arith.addf %38, %39 : vector<1x16x8xf32>
    %cst_22 = arith.constant 0.000000e+00 : f32
    %41 = vector.broadcast %cst_22 : f32 to vector<1x16x8xf32>
    %42 = arith.cmpf oge, %40, %41 : vector<1x16x8xf32>
    %cst_23 = arith.constant 0.00999999977 : f32
    %43 = vector.broadcast %cst_23 : f32 to vector<1x16x8xf32>
    %44 = arith.mulf %43, %40 : vector<1x16x8xf32>
    %45 = arith.select %42, %40, %44 : vector<1x16x8xi1>, vector<1x16x8xf32>
    %46 = vector.broadcast %7 : f32 to vector<1x16x8xf32>
    %47 = arith.mulf %45, %46 : vector<1x16x8xf32>
    %48 = tpu.concatenate %21, %33, %47 in 0 : vector<1x16x8xf32>, vector<8x16x8xf32>, vector<1x16x8xf32> -> vector<10x16x8xf32>
    %cst_24 = arith.constant 0.000000e+00 : f32
    %49 = vector.broadcast %cst_24 : f32 to vector<10x1x8xf32>
    %50 = tpu.concatenate %49, %48, %49 in 1 : vector<10x1x8xf32>, vector<10x16x8xf32>, vector<10x1x8xf32> -> vector<10x18x8xf32>
    %51 = arith.truncf %50 : vector<10x18x8xf32> to vector<10x18x8xbf16>
    %cst_25 = arith.constant 0.000000e+00 : f32
    %52 = vector.broadcast %cst_25 : f32 to vector<128x8xf32>
    %53 = vector.extract_strided_slice %51 {offsets = [0, 0, 0], sizes = [8, 16, 8], strides = [1, 1, 1]} : vector<10x18x8xbf16> to vector<8x16x8xbf16>
    %54 = vector.shape_cast %53 : vector<8x16x8xbf16> to vector<128x8xbf16>
    %c0_26 = arith.constant 0 : index
    %c0_27 = arith.constant 0 : index
    %c0_28 = arith.constant 0 : index
    %c0_29 = arith.constant 0 : index
    %55 = vector.load %arg7[%c0_26, %c0_27, %c0_28, %c0_29] : memref<3x3x8x8xbf16, #tpu.memory_space<vmem>>, vector<1x1x8x8xbf16>
    %56 = vector.shape_cast %55 : vector<1x1x8x8xbf16> to vector<8x8xbf16>
    %cst_30 = arith.constant dense<0.000000e+00> : vector<128x8xf32>
    %57 = tpu.matmul %54, %56, %cst_30 {dimension_numbers = #tpu.dot_dimension_numbers<[1], [0], [0], [1], [0, 0, 1, 1], [], []>} : vector<128x8xbf16>, vector<8x8xbf16>, vector<128x8xf32> -> vector<128x8xf32>
    %58 = arith.addf %52, %57 : vector<128x8xf32>
    %59 = vector.extract_strided_slice %51 {offsets = [0, 1, 0], sizes = [8, 16, 8], strides = [1, 1, 1]} : vector<10x18x8xbf16> to vector<8x16x8xbf16>
    %60 = vector.shape_cast %59 : vector<8x16x8xbf16> to vector<128x8xbf16>
    %c0_31 = arith.constant 0 : index
    %c1 = arith.constant 1 : index
    %c0_32 = arith.constant 0 : index
    %c0_33 = arith.constant 0 : index
    %61 = vector.load %arg7[%c0_31, %c1, %c0_32, %c0_33] : memref<3x3x8x8xbf16, #tpu.memory_space<vmem>>, vector<1x1x8x8xbf16>
    %62 = vector.shape_cast %61 : vector<1x1x8x8xbf16> to vector<8x8xbf16>
    %cst_34 = arith.constant dense<0.000000e+00> : vector<128x8xf32>
    %63 = tpu.matmul %60, %62, %cst_34 {dimension_numbers = #tpu.dot_dimension_numbers<[1], [0], [0], [1], [0, 0, 1, 1], [], []>} : vector<128x8xbf16>, vector<8x8xbf16>, vector<128x8xf32> -> vector<128x8xf32>
    %64 = arith.addf %58, %63 : vector<128x8xf32>
    %65 = vector.extract_strided_slice %51 {offsets = [0, 2, 0], sizes = [8, 16, 8], strides = [1, 1, 1]} : vector<10x18x8xbf16> to vector<8x16x8xbf16>
    %66 = vector.shape_cast %65 : vector<8x16x8xbf16> to vector<128x8xbf16>
    %c0_35 = arith.constant 0 : index
    %c2 = arith.constant 2 : index
    %c0_36 = arith.constant 0 : index
    %c0_37 = arith.constant 0 : index
    %67 = vector.load %arg7[%c0_35, %c2, %c0_36, %c0_37] : memref<3x3x8x8xbf16, #tpu.memory_space<vmem>>, vector<1x1x8x8xbf16>
    %68 = vector.shape_cast %67 : vector<1x1x8x8xbf16> to vector<8x8xbf16>
    %cst_38 = arith.constant dense<0.000000e+00> : vector<128x8xf32>
    %69 = tpu.matmul %66, %68, %cst_38 {dimension_numbers = #tpu.dot_dimension_numbers<[1], [0], [0], [1], [0, 0, 1, 1], [], []>} : vector<128x8xbf16>, vector<8x8xbf16>, vector<128x8xf32> -> vector<128x8xf32>
    %70 = arith.addf %64, %69 : vector<128x8xf32>
    %71 = vector.extract_strided_slice %51 {offsets = [1, 0, 0], sizes = [8, 16, 8], strides = [1, 1, 1]} : vector<10x18x8xbf16> to vector<8x16x8xbf16>
    %72 = vector.shape_cast %71 : vector<8x16x8xbf16> to vector<128x8xbf16>
    %c1_39 = arith.constant 1 : index
    %c0_40 = arith.constant 0 : index
    %c0_41 = arith.constant 0 : index
    %c0_42 = arith.constant 0 : index
    %73 = vector.load %arg7[%c1_39, %c0_40, %c0_41, %c0_42] : memref<3x3x8x8xbf16, #tpu.memory_space<vmem>>, vector<1x1x8x8xbf16>
    %74 = vector.shape_cast %73 : vector<1x1x8x8xbf16> to vector<8x8xbf16>
    %cst_43 = arith.constant dense<0.000000e+00> : vector<128x8xf32>
    %75 = tpu.matmul %72, %74, %cst_43 {dimension_numbers = #tpu.dot_dimension_numbers<[1], [0], [0], [1], [0, 0, 1, 1], [], []>} : vector<128x8xbf16>, vector<8x8xbf16>, vector<128x8xf32> -> vector<128x8xf32>
    %76 = arith.addf %70, %75 : vector<128x8xf32>
    %77 = vector.extract_strided_slice %51 {offsets = [1, 1, 0], sizes = [8, 16, 8], strides = [1, 1, 1]} : vector<10x18x8xbf16> to vector<8x16x8xbf16>
    %78 = vector.shape_cast %77 : vector<8x16x8xbf16> to vector<128x8xbf16>
    %c1_44 = arith.constant 1 : index
    %c1_45 = arith.constant 1 : index
    %c0_46 = arith.constant 0 : index
    %c0_47 = arith.constant 0 : index
    %79 = vector.load %arg7[%c1_44, %c1_45, %c0_46, %c0_47] : memref<3x3x8x8xbf16, #tpu.memory_space<vmem>>, vector<1x1x8x8xbf16>
    %80 = vector.shape_cast %79 : vector<1x1x8x8xbf16> to vector<8x8xbf16>
    %cst_48 = arith.constant dense<0.000000e+00> : vector<128x8xf32>
    %81 = tpu.matmul %78, %80, %cst_48 {dimension_numbers = #tpu.dot_dimension_numbers<[1], [0], [0], [1], [0, 0, 1, 1], [], []>} : vector<128x8xbf16>, vector<8x8xbf16>, vector<128x8xf32> -> vector<128x8xf32>
    %82 = arith.addf %76, %81 : vector<128x8xf32>
    %83 = vector.extract_strided_slice %51 {offsets = [1, 2, 0], sizes = [8, 16, 8], strides = [1, 1, 1]} : vector<10x18x8xbf16> to vector<8x16x8xbf16>
    %84 = vector.shape_cast %83 : vector<8x16x8xbf16> to vector<128x8xbf16>
    %c1_49 = arith.constant 1 : index
    %c2_50 = arith.constant 2 : index
    %c0_51 = arith.constant 0 : index
    %c0_52 = arith.constant 0 : index
    %85 = vector.load %arg7[%c1_49, %c2_50, %c0_51, %c0_52] : memref<3x3x8x8xbf16, #tpu.memory_space<vmem>>, vector<1x1x8x8xbf16>
    %86 = vector.shape_cast %85 : vector<1x1x8x8xbf16> to vector<8x8xbf16>
    %cst_53 = arith.constant dense<0.000000e+00> : vector<128x8xf32>
    %87 = tpu.matmul %84, %86, %cst_53 {dimension_numbers = #tpu.dot_dimension_numbers<[1], [0], [0], [1], [0, 0, 1, 1], [], []>} : vector<128x8xbf16>, vector<8x8xbf16>, vector<128x8xf32> -> vector<128x8xf32>
    %88 = arith.addf %82, %87 : vector<128x8xf32>
    %89 = vector.extract_strided_slice %51 {offsets = [2, 0, 0], sizes = [8, 16, 8], strides = [1, 1, 1]} : vector<10x18x8xbf16> to vector<8x16x8xbf16>
    %90 = vector.shape_cast %89 : vector<8x16x8xbf16> to vector<128x8xbf16>
    %c2_54 = arith.constant 2 : index
    %c0_55 = arith.constant 0 : index
    %c0_56 = arith.constant 0 : index
    %c0_57 = arith.constant 0 : index
    %91 = vector.load %arg7[%c2_54, %c0_55, %c0_56, %c0_57] : memref<3x3x8x8xbf16, #tpu.memory_space<vmem>>, vector<1x1x8x8xbf16>
    %92 = vector.shape_cast %91 : vector<1x1x8x8xbf16> to vector<8x8xbf16>
    %cst_58 = arith.constant dense<0.000000e+00> : vector<128x8xf32>
    %93 = tpu.matmul %90, %92, %cst_58 {dimension_numbers = #tpu.dot_dimension_numbers<[1], [0], [0], [1], [0, 0, 1, 1], [], []>} : vector<128x8xbf16>, vector<8x8xbf16>, vector<128x8xf32> -> vector<128x8xf32>
    %94 = arith.addf %88, %93 : vector<128x8xf32>
    %95 = vector.extract_strided_slice %51 {offsets = [2, 1, 0], sizes = [8, 16, 8], strides = [1, 1, 1]} : vector<10x18x8xbf16> to vector<8x16x8xbf16>
    %96 = vector.shape_cast %95 : vector<8x16x8xbf16> to vector<128x8xbf16>
    %c2_59 = arith.constant 2 : index
    %c1_60 = arith.constant 1 : index
    %c0_61 = arith.constant 0 : index
    %c0_62 = arith.constant 0 : index
    %97 = vector.load %arg7[%c2_59, %c1_60, %c0_61, %c0_62] : memref<3x3x8x8xbf16, #tpu.memory_space<vmem>>, vector<1x1x8x8xbf16>
    %98 = vector.shape_cast %97 : vector<1x1x8x8xbf16> to vector<8x8xbf16>
    %cst_63 = arith.constant dense<0.000000e+00> : vector<128x8xf32>
    %99 = tpu.matmul %96, %98, %cst_63 {dimension_numbers = #tpu.dot_dimension_numbers<[1], [0], [0], [1], [0, 0, 1, 1], [], []>} : vector<128x8xbf16>, vector<8x8xbf16>, vector<128x8xf32> -> vector<128x8xf32>
    %100 = arith.addf %94, %99 : vector<128x8xf32>
    %101 = vector.extract_strided_slice %51 {offsets = [2, 2, 0], sizes = [8, 16, 8], strides = [1, 1, 1]} : vector<10x18x8xbf16> to vector<8x16x8xbf16>
    %102 = vector.shape_cast %101 : vector<8x16x8xbf16> to vector<128x8xbf16>
    %c2_64 = arith.constant 2 : index
    %c2_65 = arith.constant 2 : index
    %c0_66 = arith.constant 0 : index
    %c0_67 = arith.constant 0 : index
    %103 = vector.load %arg7[%c2_64, %c2_65, %c0_66, %c0_67] : memref<3x3x8x8xbf16, #tpu.memory_space<vmem>>, vector<1x1x8x8xbf16>
    %104 = vector.shape_cast %103 : vector<1x1x8x8xbf16> to vector<8x8xbf16>
    %cst_68 = arith.constant dense<0.000000e+00> : vector<128x8xf32>
    %105 = tpu.matmul %102, %104, %cst_68 {dimension_numbers = #tpu.dot_dimension_numbers<[1], [0], [0], [1], [0, 0, 1, 1], [], []>} : vector<128x8xbf16>, vector<8x8xbf16>, vector<128x8xf32> -> vector<128x8xf32>
    %106 = arith.addf %100, %105 : vector<128x8xf32>
    %c0_69 = arith.constant 0 : index
    %c0_70 = arith.constant 0 : index
    %107 = vector.load %arg8[%c0_69, %c0_70] : memref<1x8xf32, #tpu.memory_space<vmem>>, vector<1x8xf32>
    %108 = vector.broadcast %107 : vector<1x8xf32> to vector<128x8xf32>
    %109 = arith.addf %106, %108 : vector<128x8xf32>
    %cst_71 = arith.constant dense<0.000000e+00> : vector<8xf32>
    %110 = vector.multi_reduction <add>, %109, %cst_71 [0] : vector<128x8xf32> to vector<8xf32>
    %111 = vector.shape_cast %110 : vector<8xf32> to vector<1x8xf32>
    %112 = arith.mulf %109, %109 : vector<128x8xf32>
    %cst_72 = arith.constant dense<0.000000e+00> : vector<8xf32>
    %113 = vector.multi_reduction <add>, %112, %cst_72 [0] : vector<128x8xf32> to vector<8xf32>
    %114 = vector.shape_cast %113 : vector<8xf32> to vector<1x8xf32>
    %115 = tpu.concatenate %111, %114 in 0 : vector<1x8xf32>, vector<1x8xf32> -> vector<2x8xf32>
    %116 = vector.shape_cast %115 : vector<2x8xf32> to vector<1x1x2x8xf32>
    %c0_73 = arith.constant 0 : index
    %c0_74 = arith.constant 0 : index
    %c0_75 = arith.constant 0 : index
    %c0_76 = arith.constant 0 : index
    %117 = vector.load %arg10[%c0_73, %c0_74, %c0_75, %c0_76] : memref<1x1x2x8xf32, #tpu.memory_space<vmem>>, vector<1x1x2x8xf32>
    tpu.vector_store %arg10[%c0_73, %c0_74, %c0_75, %c0_76], %116 {strides = array<i32>} : memref<1x1x2x8xf32, #tpu.memory_space<vmem>>, vector<1x1x2x8xf32>,
    %118 = vector.shape_cast %109 : vector<128x8xf32> to vector<1x8x16x8xf32>
    %119 = arith.truncf %118 : vector<1x8x16x8xf32> to vector<1x8x16x8xbf16>
    %c0_77 = arith.constant 0 : index
    %c0_78 = arith.constant 0 : index
    %c0_79 = arith.constant 0 : index
    %c0_80 = arith.constant 0 : index
    %120 = vector.load %arg9[%c0_77, %c0_78, %c0_79, %c0_80] : memref<1x8x16x8xbf16, #tpu.memory_space<vmem>>, vector<1x8x16x8xbf16>
    tpu.vector_store %arg9[%c0_77, %c0_78, %c0_79, %c0_80], %119 {strides = array<i32>} : memref<1x8x16x8xbf16, #tpu.memory_space<vmem>>, vector<1x8x16x8xbf16>,
    return
  }
  func.func @transform_0(%arg0: i32, %arg1: i32) -> (i32, i32, i32, i32) {
    %c0_i32 = arith.constant 0 : i32
    %c0_i32_0 = arith.constant 0 : i32
    %c0_i32_1 = arith.constant 0 : i32
    return %arg0, %arg1, %c0_i32, %c0_i32_0 : i32, i32, i32, i32
  }
  func.func @transform_1(%arg0: i32, %arg1: i32) -> (i32, i32, i32, i32) {
    %c8_i32 = arith.constant 8 : i32
    %0 = arith.muli %arg1, %c8_i32 : i32
    %c1_i32 = arith.constant 1 : i32
    %1 = arith.subi %0, %c1_i32 : i32
    %c0_i32 = arith.constant 0 : i32
    %2 = arith.maxsi %1, %c0_i32 : i32
    %c0_i32_0 = arith.constant 0 : i32
    %c0_i32_1 = arith.constant 0 : i32
    %c0_i32_2 = arith.constant 0 : i32
    return %arg0, %2, %c0_i32_0, %c0_i32_1 : i32, i32, i32, i32
  }
  func.func @transform_2(%arg0: i32, %arg1: i32) -> (i32, i32, i32, i32) {
    %c1_i32 = arith.constant 1 : i32
    %0 = arith.addi %arg1, %c1_i32 : i32
    %c8_i32 = arith.constant 8 : i32
    %1 = arith.muli %0, %c8_i32 : i32
    %c15_i32 = arith.constant 15 : i32
    %2 = arith.minsi %1, %c15_i32 : i32
    %c0_i32 = arith.constant 0 : i32
    %c0_i32_0 = arith.constant 0 : i32
    %c0_i32_1 = arith.constant 0 : i32
    return %arg0, %2, %c0_i32, %c0_i32_0 : i32, i32, i32, i32
  }
  func.func @transform_3(%arg0: i32, %arg1: i32) -> (i32, i32) {
    %c0_i32 = arith.constant 0 : i32
    %c0_i32_0 = arith.constant 0 : i32
    %c0_i32_1 = arith.constant 0 : i32
    return %c0_i32, %c0_i32_0 : i32, i32
  }
  func.func @transform_4(%arg0: i32, %arg1: i32) -> (i32, i32) {
    %c0_i32 = arith.constant 0 : i32
    %c0_i32_0 = arith.constant 0 : i32
    %c0_i32_1 = arith.constant 0 : i32
    return %c0_i32, %c0_i32_0 : i32, i32
  }
  func.func @transform_5(%arg0: i32, %arg1: i32) -> (i32, i32, i32, i32) {
    %c0_i32 = arith.constant 0 : i32
    %c0_i32_0 = arith.constant 0 : i32
    %c0_i32_1 = arith.constant 0 : i32
    %c0_i32_2 = arith.constant 0 : i32
    %c0_i32_3 = arith.constant 0 : i32
    return %c0_i32, %c0_i32_0, %c0_i32_1, %c0_i32_2 : i32, i32, i32, i32
  }
  func.func @transform_6(%arg0: i32, %arg1: i32) -> (i32, i32) {
    %c0_i32 = arith.constant 0 : i32
    %c0_i32_0 = arith.constant 0 : i32
    %c0_i32_1 = arith.constant 0 : i32
    return %c0_i32, %c0_i32_0 : i32, i32
  }
  func.func @transform_7(%arg0: i32, %arg1: i32) -> (i32, i32, i32, i32) {
    %c0_i32 = arith.constant 0 : i32
    %c0_i32_0 = arith.constant 0 : i32
    %c0_i32_1 = arith.constant 0 : i32
    return %arg0, %arg1, %c0_i32, %c0_i32_0 : i32, i32, i32, i32
  }
  func.func @transform_8(%arg0: i32, %arg1: i32) -> (i32, i32, i32, i32) {
    %c0_i32 = arith.constant 0 : i32
    %c0_i32_0 = arith.constant 0 : i32
    %c0_i32_1 = arith.constant 0 : i32
    return %arg0, %arg1, %c0_i32, %c0_i32_0 : i32, i32, i32, i32
  }
}

</mosaic_0001>

<bundles_post_ra>
// kernel: upsample_bn_forward.5
= control target key start
LH: loop header
LB: loop body
LE: loop exit
PB: predicated region body
PF: predicated region fallthrough
CT: control target
= control target key end

     0   :  { %s613_s12 = smov 0   ;;  %s615_s13 = smov 0   ;;  %s754_s0 = inlined_call_operand.vmem [shape: bf16[2,16,16,8], index: 0, kind: input, shape index: {}]   ;;  %s755_s1 = inlined_call_operand.vmem [shape: f32[1,8], index: 1, kind: input, shape index: {}]   ;;  %s756_s2 = inlined_call_operand.vmem [shape: f32[1,8], index: 2, kind: input, shape index: {}]   ;;  %s757_s3 = inlined_call_operand.vmem [shape: f32[2,16,16,8], index: 3, kind: output, shape index: {}]  }
   0x1   :  { %s617_s14 = smov 0   ;;  %s619_s15 = smov 0  }
   0x2   :  { %s621_s16 = smov 0  }
   0x3 LB: > { %s22_s17 = sadd.s32 1, %s583_s14  ;;  %s25_s18 = sadd.s32 1, %s587_s15  ;;  %s591_s16 = sphi %s621_s16, %s13_s16   ;;  %s587_s15 = sphi %s619_s15, %s761_s15   ;;  %s583_s14 = sphi %s617_s14, %s760_s14   ;;  %s579_s13 = sphi %s615_s13, %s759_s13   ;;  %s575_s12 = sphi %s613_s12, %s758_s12  }
   0x4   : > { %p23_p0 = scmp.ge.s32.totalorder %s22_s17, 2  ;;  %p461_p1 = scmp.ge.s32.totalorder %s591_s16, 1 }
   0x5   : > { %p159_p2 = scmp.lt.s32.totalorder %s591_s16, 5 }
   0x6   : > { %s763_s17 = smov (%p23_p0, %s22_s17), 0  ;;  %s765_s18 = smov (!%p23_p0, %s25_s18), %s587_s15 }
   0x7   : > { %p160_p3 = pnand %p461_p1, %p159_p2  ;;  %p27_p4 = scmp.ge.s32.totalorder %s765_s18, 2 }
   0x8   : > { %s462_s19 = sshll.u32 (!%p160_p3), %s575_s12, 3  ;;  %p194_p5 = scmp.lt.s32.totalorder (!%p160_p3), %s579_s13, 1 }
   0x9   : > { %s767_s18 = smov (%p27_p4, %s765_s18), 0  ;;  %163 = sbr.rel (%p160_p3) target bundleno = 49 (0x31), region = 32 }
   0xa   : > { %p196_p6 = scmp.lt.s32.totalorder (!%p160_p3), %s462_s19, 15 }
   0xe   : > { %s769_s13 = smov (!%p194_p5, %s579_s13), 1  ;;  %s771_s19 = smov (!%p196_p6, %s462_s19), 15  ;;  %v654_v0 = vld [vmem:[%s755_s1] ss:$0 sm:$0xff]  ;;  %vm341_vm0 = vcmask 64512  }
   0xf   : > { %s464_s20 = sshll.u32 %s769_s13, 5  ;;  %s463_s21 = sshll.u32 %s771_s19, 1  ;;  %v663_v9 = vld [vmem:[%s756_s2] ss:$0 sm:$0xff] }
  0x10   : > { %s643_s22 = sadd.s32 %s464_s20, %s463_s21 }
  0x11   : > { %s465_s23 = sshll.u32 %s643_s22, 2  ;;  %s469_s4 = sshll.u32 %s643_s22, 3 }
  0x12   : > { %s649_s26 = scalar_lea.vmem %s754_s0, %s465_s23  ;;  %s685_s7 = scalar_lea.vmem %s757_s3, %s469_s4 }
  0x13   : > { %v475_v1 = vld [vmem:[%s649_s26] sm:$0xff]   ;;  %v506_v2 = vld [vmem:[%s649_s26 + $0x8] sm:$0xff]   ;;  %v507_v3 = vld [vmem:[%s649_s26 + $0x10] sm:$0xff]  }
  0x14   : > { %v476_v4 = vunpack.c.l.bf16 %v475_v1  ;;  %v477_v5 = vunpack.c.h.bf16 %v475_v1  ;;  %v480_v6 = vunpack.c.l.bf16 %v506_v2  ;;  %v481_v7 = vunpack.c.h.bf16 %v506_v2  ;;  %v508_v8 = vld [vmem:[%s649_s26 + $0x18] sm:$0xff]   ;;  %v509_v37 = vld [vmem:[%s649_s26 + $0x20] sm:$0xff]   ;;  %v510_v41 = vld [vmem:[%s649_s26 + $0x28] sm:$0xff]  }
  0x15   : > { %v484_v10 = vunpack.c.l.bf16 %v507_v3  ;;  %v485_v11 = vunpack.c.h.bf16 %v507_v3  ;;  %v488_v12 = vunpack.c.l.bf16 %v508_v8  ;;  %v489_v13 = vunpack.c.h.bf16 %v508_v8  ;;  %v511_v42 = vld [vmem:[%s649_s26 + $0x30] sm:$0xff]   ;;  %v512_v49 = vld [vmem:[%s649_s26 + $0x38] sm:$0xff]  }
  0x16   : > { %v254_v14 = vmul.f32 %v476_v4, %v654_v0  ;;  %v255_v15 = vmul.f32 %v477_v5, %v654_v0  ;;  %v256_v16 = vmul.f32 %v480_v6, %v654_v0  ;;  %v257_v17 = vmul.f32 %v481_v7, %v654_v0 }
  0x17   : > { %v258_v18 = vmul.f32 %v484_v10, %v654_v0  ;;  %v259_v19 = vmul.f32 %v485_v11, %v654_v0  ;;  %v260_v20 = vmul.f32 %v488_v12, %v654_v0  ;;  %v261_v21 = vmul.f32 %v489_v13, %v654_v0 }
  0x18   : > { %v277_v22 = vadd.f32 %v663_v9, %v254_v14  ;;  %v278_v23 = vadd.f32 %v663_v9, %v255_v15  ;;  %v279_v24 = vadd.f32 %v663_v9, %v256_v16  ;;  %v280_v25 = vadd.f32 %v663_v9, %v257_v17 }
  0x19   : > { %v281_v26 = vadd.f32 %v663_v9, %v258_v18  ;;  %v282_v27 = vadd.f32 %v663_v9, %v259_v19  ;;  %v283_v28 = vadd.f32 %v663_v9, %v260_v20  ;;  %v284_v29 = vadd.f32 %v663_v9, %v261_v21 }
  0x1a   : > { %vm293_vm1 = vcmp.ge.f32.partialorder %v277_v22, 0.0  ;;  %v309_v30 = vmul.f32 0.01, %v277_v22  ;;  %vm294_vm2 = vcmp.ge.f32.partialorder %v278_v23, 0.0  ;;  %v310_v31 = vmul.f32 0.01, %v278_v23 }
  0x1b   : > { %vm295_vm3 = vcmp.ge.f32.partialorder %v279_v24, 0.0  ;;  %v311_v32 = vmul.f32 0.01, %v279_v24  ;;  %vm296_vm4 = vcmp.ge.f32.partialorder %v280_v25, 0.0  ;;  %v312_v33 = vmul.f32 0.01, %v280_v25 }
  0x1c   : > { %v325_v34 = vsel %vm293_vm1, %v277_v22, %v309_v30  ;;  %v326_v35 = vsel %vm294_vm2, %v278_v23, %v310_v31  ;;  %vm297_vm5 = vcmp.ge.f32.partialorder %v281_v26, 0.0  ;;  %v313_v36 = vmul.f32 0.01, %v281_v26 }
  0x1d   : > { %342 = vst.msk [vmem:[%s685_s7] sm:$0xff] %vm341_vm0, %v325_v34  ;;  %343 = vst.msk [vmem:[%s685_s7 + $0x8] sm:$0xff] %vm341_vm0, %v326_v35  ;;  %v327_v38 = vsel %vm295_vm3, %v279_v24, %v311_v32  ;;  %v328_v39 = vsel %vm296_vm4, %v280_v25, %v312_v33  ;;  %vm298_vm6 = vcmp.ge.f32.partialorder %v282_v27, 0.0  ;;  %v314_v40 = vmul.f32 0.01, %v282_v27 }
  0x1e   : > { %344 = vst.msk [vmem:[%s685_s7 + $0x10] sm:$0xff] %vm341_vm0, %v327_v38  ;;  %345 = vst.msk [vmem:[%s685_s7 + $0x18] sm:$0xff] %vm341_vm0, %v328_v39  ;;  %v329_v43 = vsel %vm297_vm5, %v281_v26, %v313_v36  ;;  %vm299_vm7 = vcmp.ge.f32.partialorder %v283_v28, 0.0  ;;  %v315_v44 = vmul.f32 0.01, %v283_v28  ;;  %vm300_vm8 = vcmp.ge.f32.partialorder %v284_v29, 0.0 }
  0x1f   : > { %346 = vst.msk [vmem:[%s685_s7 + $0x20] sm:$0xff] %vm341_vm0, %v329_v43  ;;  %v330_v45 = vsel %vm298_vm6, %v282_v27, %v314_v40  ;;  %v316_v46 = vmul.f32 0.01, %v284_v29  ;;  %v492_v47 = vunpack.c.l.bf16 %v509_v37  ;;  %v493_v48 = vunpack.c.h.bf16 %v509_v37 }
  0x20   : > { %347 = vst.msk [vmem:[%s685_s7 + $0x28] sm:$0xff] %vm341_vm0, %v330_v45  ;;  %v331_v50 = vsel %vm299_vm7, %v283_v28, %v315_v44  ;;  %v496_v51 = vunpack.c.l.bf16 %v510_v41  ;;  %v497_v52 = vunpack.c.h.bf16 %v510_v41  ;;  %v500_v53 = vunpack.c.l.bf16 %v511_v42 }
  0x21   : > { %348 = vst.msk [vmem:[%s685_s7 + $0x30] sm:$0xff] %vm341_vm0, %v331_v50  ;;  %v332_v54 = vsel %vm300_vm8, %v284_v29, %v316_v46  ;;  %v262_v55 = vmul.f32 %v492_v47, %v654_v0  ;;  %v263_v56 = vmul.f32 %v493_v48, %v654_v0  ;;  %v501_v57 = vunpack.c.h.bf16 %v511_v42 }
  0x22   : > { %349 = vst.msk [vmem:[%s685_s7 + $0x38] sm:$0xff] %vm341_vm0, %v332_v54  ;;  %v264_v58 = vmul.f32 %v496_v51, %v654_v0  ;;  %v265_v59 = vmul.f32 %v497_v52, %v654_v0  ;;  %v266_v60 = vmul.f32 %v500_v53, %v654_v0  ;;  %v504_v61 = vunpack.c.l.bf16 %v512_v49 }
  0x23   : > { %v285_v62 = vadd.f32 %v663_v9, %v262_v55  ;;  %v286_v63 = vadd.f32 %v663_v9, %v263_v56  ;;  %v267_v1 = vmul.f32 %v501_v57, %v654_v0  ;;  %v505_v2 = vunpack.c.h.bf16 %v512_v49 }
  0x24   : > { %v287_v3 = vadd.f32 %v663_v9, %v264_v58  ;;  %v288_v4 = vadd.f32 %v663_v9, %v265_v59  ;;  %v289_v5 = vadd.f32 %v663_v9, %v266_v60  ;;  %v268_v6 = vmul.f32 %v504_v61, %v654_v0 }
  0x25   : > { %vm301_vm9 = vcmp.ge.f32.partialorder %v285_v62, 0.0  ;;  %v317_v7 = vmul.f32 0.01, %v285_v62  ;;  %vm302_vm10 = vcmp.ge.f32.partialorder %v286_v63, 0.0  ;;  %v318_v8 = vmul.f32 0.01, %v286_v63 }
  0x26   : > { %vm303_vm11 = vcmp.ge.f32.partialorder %v287_v3, 0.0  ;;  %v319_v10 = vmul.f32 0.01, %v287_v3  ;;  %vm304_vm12 = vcmp.ge.f32.partialorder %v288_v4, 0.0  ;;  %v320_v11 = vmul.f32 0.01, %v288_v4 }
  0x27   : > { %v333_v12 = vsel %vm301_vm9, %v285_v62, %v317_v7  ;;  %v334_v13 = vsel %vm302_vm10, %v286_v63, %v318_v8  ;;  %vm305_vm13 = vcmp.ge.f32.partialorder %v289_v5, 0.0  ;;  %v321_v14 = vmul.f32 0.01, %v289_v5 }
  0x28   : > { %350 = vst.msk [vmem:[%s685_s7 + $0x40] sm:$0xff] %vm341_vm0, %v333_v12  ;;  %351 = vst.msk [vmem:[%s685_s7 + $0x48] sm:$0xff] %vm341_vm0, %v334_v13  ;;  %v335_v15 = vsel %vm303_vm11, %v287_v3, %v319_v10  ;;  %v336_v16 = vsel %vm304_vm12, %v288_v4, %v320_v11  ;;  %v290_v17 = vadd.f32 %v663_v9, %v267_v1 }
  0x29   : > { %v291_v18 = vadd.f32 %v663_v9, %v268_v6  ;;  %352 = vst.msk [vmem:[%s685_s7 + $0x50] sm:$0xff] %vm341_vm0, %v335_v15  ;;  %353 = vst.msk [vmem:[%s685_s7 + $0x58] sm:$0xff] %vm341_vm0, %v336_v16  ;;  %v337_v19 = vsel %vm305_vm13, %v289_v5, %v321_v14  ;;  %v269_v20 = vmul.f32 %v505_v2, %v654_v0 }
  0x2a   : > { %354 = vst.msk [vmem:[%s685_s7 + $0x60] sm:$0xff] %vm341_vm0, %v337_v19  ;;  %vm306_vm14 = vcmp.ge.f32.partialorder %v290_v17, 0.0  ;;  %v322_v21 = vmul.f32 0.01, %v290_v17 }
  0x2b   : > { %vm307_vm15 = vcmp.ge.f32.partialorder %v291_v18, 0.0  ;;  %v323_v22 = vmul.f32 0.01, %v291_v18  ;;  %v292_v23 = vadd.f32 %v663_v9, %v269_v20 }
  0x2c   : > { %v338_v24 = vsel %vm306_vm14, %v290_v17, %v322_v21 }
  0x2d   : > { %v339_v25 = vsel %vm307_vm15, %v291_v18, %v323_v22  ;;  %355 = vst.msk [vmem:[%s685_s7 + $0x68] sm:$0xff] %vm341_vm0, %v338_v24  ;;  %vm308_vm1 = vcmp.ge.f32.partialorder %v292_v23, 0.0  ;;  %v324_v26 = vmul.f32 0.01, %v292_v23 }
  0x2e   : > { %356 = vst.msk [vmem:[%s685_s7 + $0x70] sm:$0xff] %vm341_vm0, %v339_v25 }
  0x2f   : > { %v340_v27 = vsel %vm308_vm1, %v292_v23, %v324_v26 }
  0x30   : > { %357 = vst.msk [vmem:[%s685_s7 + $0x78] sm:$0xff] %vm341_vm0, %v340_v27 }
  0x31 PF: > { %s13_s16 = sadd.s32 1, %s591_s16   ;;  %s758_s12 = smov %s583_s14 }
  0x32   : > { %p10_p7 = scmp.ge.s32.totalorder %s13_s16, 6   ;;  %s759_s13 = smov %s587_s15 }
  0x33   : > { %s760_s14 = smov %s763_s17  ;;  %s761_s15 = smov %s767_s18 }
  0x34   :  { %12 = sbr.rel (!%p10_p7) target bundleno = 3 (0x3), region = 62 }

// kernel: upsample_bn_forward.4
= control target key start
LH: loop header
LB: loop body
LE: loop exit
PB: predicated region body
PF: predicated region fallthrough
CT: control target
= control target key end

     0   :  { %s3039_s27 = smov 0   ;;  %s3041_s28 = smov 0   ;;  %s3916_s0 = inlined_call_operand.vmem [shape: bf16[2,16,16,8], index: 0, kind: input, shape index: {}, may-alias: {0,1,2}]   ;;  %s3917_s1 = inlined_call_operand.vmem [shape: bf16[2,16,16,8], index: 1, kind: input, shape index: {}, may-alias: {0,1,2}]   ;;  %s3918_s2 = inlined_call_operand.vmem [shape: bf16[2,16,16,8], index: 2, kind: input, shape index: {}, may-alias: {0,1,2}]   ;;  %s3919_s3 = inlined_call_operand.vmem [shape: f32[1,8], index: 3, kind: input, shape index: {}]   ;;  %s3920_s4 = inlined_call_operand.vmem [shape: f32[1,8], index: 4, kind: input, shape index: {}]   ;;  %s3921_s5 = inlined_call_operand.vmem [shape: bf16[3,3,8,8], index: 5, kind: input, shape index: {}]   ;;  %s3922_s6 = inlined_call_operand.vmem [shape: f32[1,8], index: 6, kind: input, shape index: {}]   ;;  %s3923_s7 = inlined_call_operand.vmem [shape: bf16[2,16,16,8], index: 7, kind: output, shape index: {0}]   ;;  %s3924_s8 = inlined_call_operand.vmem [shape: f32[2,2,2,8], index: 8, kind: output, shape index: {1}]  }
   0x1   :  { %s3043_s29 = smov 0   ;;  %s3045_s30 = smov 0  }
   0x2   :  { %s3047_s9 = smov 0  }
   0x3 LB: > { %s28_s10 = sadd.s32 1, %s2984_s29  ;;  %s31_s11 = sadd.s32 1, %s2988_s30  ;;  %s2992_s9 = sphi %s3047_s9, %s19_s9   ;;  %s2988_s30 = sphi %s3045_s30, %s3973_s30   ;;  %s2984_s29 = sphi %s3043_s29, %s3972_s29   ;;  %s2980_s28 = sphi %s3041_s28, %s3971_s28   ;;  %s2976_s27 = sphi %s3039_s27, %s3970_s27  }
   0x4   : > { %p29_p0 = scmp.ge.s32.totalorder %s28_s10, 2  ;;  %p2459_p1 = scmp.ge.s32.totalorder %s2992_s9, 1 }
   0x5   : > { %p353_p2 = scmp.lt.s32.totalorder %s2992_s9, 5 }
   0x6   : > { %s3975_s10 = smov (%p29_p0, %s28_s10), 0  ;;  %s3977_s11 = smov (!%p29_p0, %s31_s11), %s2988_s30 }
   0x7   : > { %p354_p3 = pnand %p2459_p1, %p353_p2  ;;  %p33_p4 = scmp.ge.s32.totalorder %s3977_s11, 2 }
   0x9   : > { %s3979_s11 = smov (%p33_p4, %s3977_s11), 0  ;;  %357 = sbr.rel (%p354_p3) target bundleno = 439 (0x1b7), region = 48 }
   0xe   : > { %v2489_v0 = vld [vmem:[%s3921_s5 + $0x4] sm:$0xf]  ;;  %vm906_vm0 = vcmask 1043456   ;;  %s3075_s14 = sshll.u32 %s2976_s27, 3  ;;  %p432_p5 = scmp.lt.s32.totalorder %s2980_s28, 1  ;;  %vm680_vm1 = vcmask 1040384  }
   0xf   : > { %2905 = vmatprep.subr.msk.bf16.mxu1 %vm906_vm0, %v2489_v0  ;;  %v908_v1 = vsel %vm906_vm0, %v2489_v0, 0  ;;  %p434_p6 = scmp.lt.s32.totalorder %s3075_s14, 15  ;;  %2904 = vmatprep.subr.msk.bf16.mxu0 %vm906_vm0, %v2489_v0  ;;  %v781_v2 = vld [vmem:[%s3921_s5] sm:$0xf]  ;;  %v3091_v3 = vld [vmem:[%s3921_s5 + $0x8] sm:$0xf] }
  0x10   : > { %2903 = vmatpush3.bf16.msra.mxu1 %v908_v1  ;;  %s3981_s28 = smov (!%p432_p5, %s2980_s28), 1  ;;  %2741 = vmatpush3.bf16.msra.mxu0 %v908_v1  ;;  %s2465_s21 = sadd.s32 4294967295, %s3075_s14  ;;  %v3114_v4 = vld [vmem:[%s3919_s3] ss:$0 sm:$0xff]  ;;  %v3119_v7 = vsel %vm906_vm0, %v781_v2, 0  ;;  %vm881_vm9 = vcmask 64512  }
  0x11   : > { %s435_s17 = scalar_select %p434_p6, %s3075_s14, 15  ;;  %2906 = vmatprep.subr.msk.bf16.mxu1 %vm906_vm0, %v781_v2  ;;  %2907 = vmatprep.subr.msk.bf16.mxu0 %vm906_vm0, %v3091_v3  ;;  %v3128_v14 = vld [vmem:[%s3920_s4] ss:$0 sm:$0xff]  ;;  %vm782_vm8 = vsmask.f32 7424 }
  0x12   : > { %s3094_s20 = sshll.u32 %s3981_s28, 5  ;;  %p444_p7 = scmp.gt.s32.totalorder %s2465_s21, 0 }
  0x13   : > { %s2461_s22 = sshll.u32 %s435_s17, 1  ;;  %p2466_p8 = scmp.lt.s32.totalorder %s2465_s21, 15 }
  0x14   : > { %s3100_s23 = sadd.s32 %s3094_s20, %s2461_s22  ;;  %p498_p9 = scmp.eq.s32.totalorder %s2976_s27, 0 }
  0x15   : > { %s2463_s24 = sshll.u32 %s3100_s23, 2  ;;  %s2595_s22 = sadd.s32 8, %s3075_s14 }
  0x16   : > { %s3109_s12 = scalar_lea.vmem %s3916_s0, %s2463_s24  ;;  %p3147_p10 = scmp.lt.s32.totalorder %s2595_s22, 15 }
  0x17   : > { %v2654_v5 = vld [vmem:[%s3109_s12 + $0x18] sm:$0xff]   ;;  %v2655_v6 = vld [vmem:[%s3109_s12 + $0x20] sm:$0xff]   ;;  %s445_s16 = scalar_select %p444_p7, %s2465_s21, 0  ;;  %v2656_v13 = vld [vmem:[%s3109_s12 + $0x28] sm:$0xff]  }
  0x18   : > { %v2617_v8 = vld [vmem:[%s3109_s12] sm:$0xff]   ;;  %v2630_v9 = vunpack.c.l.bf16 %v2654_v5  ;;  %v2631_v10 = vunpack.c.h.bf16 %v2654_v5  ;;  %v2634_v11 = vunpack.c.l.bf16 %v2655_v6  ;;  %v2635_v12 = vunpack.c.h.bf16 %v2655_v6  ;;  %s3122_s17 = scalar_select %p498_p9, 0.0, 1.0 }
  0x19   : > { %s3983_s16 = smov (!%p2466_p8, %s445_s16), 15  ;;  %v2618_v15 = vunpack.c.l.bf16 %v2617_v8  ;;  %v2619_v16 = vunpack.c.h.bf16 %v2617_v8  ;;  %v2638_v17 = vunpack.c.l.bf16 %v2656_v13  ;;  %v2639_v18 = vunpack.c.h.bf16 %v2656_v13  ;;  %s3985_s22 = smov (!%p3147_p10, %s2595_s22), 15 }
  0x1a   : > { %v569_v19 = vmul.f32 %v2630_v9, %v3114_v4  ;;  %v570_v20 = vmul.f32 %v2631_v10, %v3114_v4  ;;  %v571_v21 = vmul.f32 %v2634_v11, %v3114_v4  ;;  %v572_v22 = vmul.f32 %v2635_v12, %v3114_v4  ;;  %s2471_s25 = sshll.u32 %s3983_s16, 1  ;;  %s3987_s22 = smov (!%p3147_p10, %s3985_s22), 15 }
  0x1b   : > { %v528_v23 = vstv %s3122_s17  ;;  %v563_v24 = vmul.f32 %v2618_v15, %v3114_v4  ;;  %v564_v25 = vmul.f32 %v2619_v16, %v3114_v4  ;;  %v573_v26 = vmul.f32 %v2638_v17, %v3114_v4  ;;  %s452_s21 = sadd.s32 %s2471_s25, %s3094_s20  ;;  %s3184_s14 = sshll.u32 %s3987_s22, 1 }
  0x1c   : > { %v585_v27 = vadd.f32 %v3128_v14, %v569_v19  ;;  %v586_v28 = vadd.f32 %v3128_v14, %v570_v20  ;;  %v587_v29 = vadd.f32 %v3128_v14, %v571_v21  ;;  %v588_v30 = vadd.f32 %v3128_v14, %v572_v22  ;;  %s2473_s13 = sshll.u32 %s452_s21, 2  ;;  %s469_s19 = sadd.s32 %s3184_s14, %s3094_s20 }
  0x1d   : > { %v3152_v31 = vadd.f32 %v3128_v14, %v563_v24  ;;  %v3155_v32 = vadd.f32 %v3128_v14, %v564_v25  ;;  %v3158_v33 = vmul.f32 %v2639_v18, %v3114_v4  ;;  %v3161_v34 = vadd.f32 %v3128_v14, %v573_v26  ;;  %s454_s18 = scalar_lea.vmem %s3917_s1, %s2473_s13  ;;  %s2480_s26 = sshll.u32 %s469_s19, 2 }
  0x1e   : > { %vm601_vm2 = vcmp.ge.f32.partialorder %v585_v27, 0.0  ;;  %vm602_vm3 = vcmp.ge.f32.partialorder %v586_v28, 0.0  ;;  %v617_v35 = vmul.f32 0.01, %v585_v27  ;;  %v618_v36 = vmul.f32 0.01, %v586_v28  ;;  %s471_s15 = scalar_lea.vmem %s3918_s2, %s2480_s26  ;;  %s3790_s16 = scalar_lea.vmem %s3923_s7, %s2463_s24 }
  0x1f   : > { %vm603_vm4 = vcmp.ge.f32.partialorder %v587_v29, 0.0  ;;  %vm604_vm5 = vcmp.ge.f32.partialorder %v588_v30, 0.0  ;;  %v619_v37 = vmul.f32 0.01, %v587_v29  ;;  %v620_v38 = vmul.f32 0.01, %v588_v30 }
  0x20   : > { %v633_v39 = vsel %vm601_vm2, %v585_v27, %v617_v35  ;;  %v634_v40 = vsel %vm602_vm3, %v586_v28, %v618_v36  ;;  %v2613_v41 = vld [vmem:[%s454_s18] sm:$0xff]   ;;  %vm595_vm6 = vcmp.ge.f32.partialorder %v3152_v31, 0.0  ;;  %vm596_vm7 = vcmp.ge.f32.partialorder %v3155_v32, 0.0  ;;  %v2657_v35 = vld [vmem:[%s3109_s12 + $0x30] sm:$0xff]   ;;  %v3229_v36 = vld [vmem:[%s3921_s5 + $0xc] sm:$0xf] }
  0x21   : > { %v693_v42 = vrot.slane %v633_v39, 7  ;;  %v694_v43 = vrot.slane %v634_v40, 7  ;;  %v635_v44 = vsel %vm603_vm4, %v587_v29, %v619_v37  ;;  %v636_v45 = vsel %vm604_vm5, %v588_v30, %v620_v38  ;;  %p500_p11 = scmp.eq.s32.totalorder %s2976_s27, 1  ;;  %p489_p12 = scmp.lt.s32.totalorder %s2976_s27, 1 }
  0x22   : > { %v696_v46 = vrot.slane %v635_v44, 7  ;;  %v697_v47 = vrot.slane %v636_v45, 7  ;;  %v2614_v48 = vunpack.c.l.bf16 %v2613_v41  ;;  %v2615_v49 = vunpack.c.h.bf16 %v2613_v41  ;;  %s2485_s23 = sshll.u32 %s3981_s28, 1 }
  0x23   : > { %v695_v50 = vsel %vm680_vm1, %v693_v42, %v694_v43  ;;  %v745_v51 = vsel %vm680_vm1, 0.0, %v693_v42  ;;  %v755_v52 = vsel %vm680_vm1, %v694_v43, 0.0  ;;  %v611_v53 = vmul.f32 0.01, %v3152_v31  ;;  %s3989_s27 = smov (!%p489_p12, %s2976_s27), 1 }
  0x24   : > { %v3178_v54 = vpack.c.bf16 %v695_v50, %v745_v51  ;;  %v3180_v55 = vpack.c.bf16 %v755_v52, %v755_v52  ;;  %v698_v56 = vsel %vm680_vm1, %v696_v46, %v697_v47  ;;  %v746_v57 = vsel %vm680_vm1, 0.0, %v696_v46  ;;  %s492_s24 = sadd.s32 %s2485_s23, %s3989_s27 }
  0x25   : > { %v756_v58 = vsel %vm680_vm1, %v697_v47, 0.0  ;;  %v3187_v59 = vpack.c.bf16 %v698_v56, %v746_v57  ;;  %v512_v60 = vmul.f32 %v2614_v48, %v3114_v4  ;;  %v513_v61 = vmul.f32 %v2615_v49, %v3114_v4  ;;  %s2486_s18 = sshll.u32 %s492_s24, 1 }
  0x26   : > { %v832_v62 = vshrl.u32 %v3178_v54, 16  ;;  %v834_v63 = vshll.u32 %v3178_v54, 16  ;;  %v839_v0 = vshll.u32 %v3180_v55, 16  ;;  %v3196_v1 = vpack.c.bf16 %v756_v58, %v756_v58  ;;  %v2652_v58 = vld [vmem:[%s3109_s12 + $0x8] sm:$0xff]   ;;  %s494_s19 = scalar_lea.vmem %s3924_s8, %s2486_s18 }
  0x27   : > { %v844_v2 = vshrl.u32 %v3187_v59, 16  ;;  %v846_v5 = vshll.u32 %v3187_v59, 16  ;;  %v520_v6 = vadd.f32 %v3128_v14, %v512_v60  ;;  %v521_v8 = vadd.f32 %v3128_v14, %v513_v61 }
  0x28   : > { %v836_v9 = vrot.slane %v834_v63, 1  ;;  %v841_v10 = vrot.slane %v839_v0, 1  ;;  %v851_v11 = vshll.u32 %v3196_v1, 16  ;;  %v612_v12 = vmul.f32 0.01, %v3155_v32 }
  0x29   : > { %v848_v13 = vrot.slane %v846_v5, 1  ;;  %vm522_vm10 = vcmp.ge.f32.partialorder %v520_v6, 0.0  ;;  %vm523_vm11 = vcmp.ge.f32.partialorder %v521_v8, 0.0  ;;  %v524_v15 = vmul.f32 0.01, %v520_v6 }
  0x2a   : > { %v837_v16 = vor.u32 %v836_v9, %v832_v62  ;;  %v853_v17 = vrot.slane %v851_v11, 1  ;;  %v525_v18 = vmul.f32 0.01, %v521_v8  ;;  %v627_v19 = vsel %vm595_vm6, %v3152_v31, %v611_v53 }
  0x2b   : > { %v849_v20 = vor.u32 %v848_v13, %v844_v2  ;;  %v526_v21 = vsel %vm522_vm10, %v520_v6, %v524_v15  ;;  %v628_v22 = vsel %vm596_vm7, %v3155_v32, %v612_v12  ;;  %v684_v24 = vrot.slane %v627_v19, 7 }
  0x2c   : > { %v3211_v25 = vsel %vm782_vm8, %v837_v16, %v841_v10  ;;  %v527_v26 = vsel %vm523_vm11, %v521_v8, %v525_v18  ;;  %v529_v27 = vmul.f32 %v528_v23, %v526_v21  ;;  %v685_v28 = vrot.slane %v628_v22, 7  ;;  %v2653_v10 = vld [vmem:[%s3109_s12 + $0x10] sm:$0xff]  }
  0x2d   : > { %2750 = vmatprep.mubr.msk.bf16.mxu1 %vm881_vm9, %v3211_v25  ;;  %v3218_v29 = vsel %vm782_vm8, %v849_v20, %v853_v17  ;;  %v530_v30 = vmul.f32 %v528_v23, %v527_v26  ;;  %v742_v31 = vsel %vm680_vm1, 0.0, %v684_v24  ;;  %v590_v32 = vadd.f32 %v3128_v14, %v3158_v33 }
  0x2e   : > { %2751 = vmatmul.mubr.msk.bf16.vlgmr.msra.gmra.mxu1 %vm881_vm9, %v3218_v29  ;;  %v681_v37 = vrot.slane %v529_v27, 7  ;;  %v686_v38 = vsel %vm680_vm1, %v684_v24, %v685_v28  ;;  %v752_v39 = vsel %vm680_vm1, %v685_v28, 0.0  ;;  %vm605_vm12 = vcmp.ge.f32.partialorder %v3161_v34, 0.0 }
  0x2f   : > { %2759 = vmatpush3.bf16.msra.mxu1 %v3119_v7  ;;  %v682_v23 = vrot.slane %v530_v30, 7  ;;  %v3237_v33 = vpack.c.bf16 %v686_v38, %v742_v31  ;;  %v3239_v40 = vpack.c.bf16 %v752_v39, %v752_v39  ;;  %vm606_vm13 = vcmp.ge.f32.partialorder %v590_v32, 0.0  ;;  %v3287_v31 = vld [vmem:[%s3921_s5 + $0x10] sm:$0xf] }
  0x30   : > { %v741_v41 = vsel %vm680_vm1, 0.0, %v681_v37  ;;  %v621_v42 = vmul.f32 0.01, %v3161_v34  ;;  %v622_v43 = vmul.f32 0.01, %v590_v32  ;;  %v2642_v44 = vunpack.c.l.bf16 %v2657_v35  ;;  %2908 = vmatprep.subr.msk.bf16.mxu1 %vm906_vm0, %v3229_v36 }
  0x31   : > { %v683_v45 = vsel %vm680_vm1, %v681_v37, %v682_v23  ;;  %v751_v7 = vsel %vm680_vm1, %v682_v23, 0.0  ;;  %v796_v46 = vshrl.u32 %v3237_v33, 16  ;;  %v798_v47 = vshll.u32 %v3237_v33, 16 }
  0x32   : > { %v3249_v48 = vpack.c.bf16 %v683_v45, %v741_v41  ;;  %v3251_v49 = vpack.c.bf16 %v751_v7, %v751_v7  ;;  %v803_v50 = vshll.u32 %v3239_v40, 16  ;;  %v1191_v51 = vsel %vm906_vm0, %v3091_v3, 0 }
  0x33   : > { %v800_v52 = vrot.slane %v798_v47, 1  ;;  %v637_v53 = vsel %vm605_vm12, %v3161_v34, %v621_v42  ;;  %v638_v56 = vsel %vm606_vm13, %v590_v32, %v622_v43  ;;  %v2643_v57 = vunpack.c.h.bf16 %v2657_v35 }
  0x34   : > { %v784_v60 = vshrl.u32 %v3249_v48, 16  ;;  %v786_v61 = vshll.u32 %v3249_v48, 16  ;;  %v791_v62 = vshll.u32 %v3251_v49, 16  ;;  %v805_v63 = vrot.slane %v803_v50, 1 }
  0x35   : > { %v801_v0 = vor.u32 %v800_v52, %v796_v46  ;;  %v699_v2 = vrot.slane %v637_v53, 7  ;;  %v700_v3 = vrot.slane %v638_v56, 7  ;;  %v575_v5 = vmul.f32 %v2642_v44, %v3114_v4 }
  0x36   : > { %v788_v6 = vrot.slane %v786_v61, 1  ;;  %v793_v8 = vrot.slane %v791_v62, 1  ;;  %v576_v34 = vmul.f32 %v2643_v57, %v3114_v4  ;;  %v2622_v9 = vunpack.c.l.bf16 %v2652_v58 }
  0x37   : > { %v3268_v11 = vsel %vm782_vm8, %v801_v0, %v805_v63  ;;  %v701_v12 = vsel %vm680_vm1, %v699_v2, %v700_v3  ;;  %v747_v13 = vsel %vm680_vm1, 0.0, %v699_v2  ;;  %v757_v15 = vsel %vm680_vm1, %v700_v3, 0.0 }
  0x38   : > { %v789_v16 = vor.u32 %v788_v6, %v784_v60  ;;  %v3273_v17 = vpack.c.bf16 %v701_v12, %v747_v13  ;;  %v3275_v18 = vpack.c.bf16 %v757_v15, %v757_v15  ;;  %v591_v19 = vadd.f32 %v3128_v14, %v575_v5 }
  0x39   : > { %v592_v20 = vadd.f32 %v3128_v14, %v576_v34  ;;  %v2623_v21 = vunpack.c.h.bf16 %v2652_v58  ;;  %v565_v22 = vmul.f32 %v2622_v9, %v3114_v4  ;;  %v2626_v24 = vunpack.c.l.bf16 %v2653_v10 }
  0x3a   : > { %v794_v26 = vsel %vm782_vm8, %v789_v16, %v793_v8  ;;  %v856_v27 = vshrl.u32 %v3273_v17, 16  ;;  %v858_v28 = vshll.u32 %v3273_v17, 16  ;;  %v863_v30 = vshll.u32 %v3275_v18, 16 }
  0x3b   : > { %2742 = vmatprep.mubr.msk.bf16.mxu0 %vm881_vm9, %v794_v26  ;;  %vm607_vm14 = vcmp.ge.f32.partialorder %v591_v19, 0.0  ;;  %vm608_vm15 = vcmp.ge.f32.partialorder %v592_v20, 0.0  ;;  %v623_v32 = vmul.f32 0.01, %v591_v19  ;;  %v624_v35 = vmul.f32 0.01, %v592_v20 }
  0x3c   : > { %2743 = vmatmul.mubr.msk.bf16.vlgmr.msra.gmra.mxu0 %vm881_vm9, %v3268_v11  ;;  %v860_v37 = vrot.slane %v858_v28, 1  ;;  %v865_v38 = vrot.slane %v863_v30, 1  ;;  %v566_v39 = vmul.f32 %v2623_v21, %v3114_v4  ;;  %v581_v23 = vadd.f32 %v3128_v14, %v565_v22 }
  0x3d   : > { %2777 = vmatpush3.bf16.msra.mxu0 %v1191_v51  ;;  %v639_v41 = vsel %vm607_vm14, %v591_v19, %v623_v32  ;;  %v640_v42 = vsel %vm608_vm15, %v592_v20, %v624_v35  ;;  %v2627_v43 = vunpack.c.h.bf16 %v2653_v10  ;;  %v567_v44 = vmul.f32 %v2626_v24, %v3114_v4 }
  0x3e   : > { %v861_v45 = vor.u32 %v860_v37, %v856_v27  ;;  %v702_v7 = vrot.slane %v639_v41, 7  ;;  %v703_v46 = vrot.slane %v640_v42, 7  ;;  %v582_v47 = vadd.f32 %v3128_v14, %v566_v39  ;;  %2909 = vmatprep.subr.msk.bf16.mxu0 %vm906_vm0, %v3287_v31 }
  0x3f   : > { %vm597_vm2 = vcmp.ge.f32.partialorder %v581_v23, 0.0  ;;  %v613_v50 = vmul.f32 0.01, %v581_v23  ;;  %v568_v52 = vmul.f32 %v2627_v43, %v3114_v4  ;;  %v583_v53 = vadd.f32 %v3128_v14, %v567_v44 }
  0x40   : > { %v3301_v51 = vsel %vm782_vm8, %v861_v45, %v865_v38  ;;  %v704_v56 = vsel %vm680_vm1, %v702_v7, %v703_v46  ;;  %v748_v57 = vsel %vm680_vm1, 0.0, %v702_v7  ;;  %v758_v58 = vsel %vm680_vm1, %v703_v46, 0.0 }
  0x41   : > { %2754 = vmatprep.mubr.msk.bf16.mxu1 %vm881_vm9, %v3301_v51  ;;  %v3308_v60 = vpack.c.bf16 %v704_v56, %v748_v57  ;;  %v3310_v61 = vpack.c.bf16 %v758_v58, %v758_v58  ;;  %vm598_vm3 = vcmp.ge.f32.partialorder %v582_v47, 0.0  ;;  %v614_v62 = vmul.f32 0.01, %v582_v47 }
  0x42   : > { %v629_v63 = vsel %vm597_vm2, %v581_v23, %v613_v50  ;;  %v584_v0 = vadd.f32 %v3128_v14, %v568_v52  ;;  %vm599_vm4 = vcmp.ge.f32.partialorder %v583_v53, 0.0  ;;  %v615_v2 = vmul.f32 0.01, %v583_v53 }
  0x43   : > { %v868_v3 = vshrl.u32 %v3308_v60, 16  ;;  %v870_v5 = vshll.u32 %v3308_v60, 16  ;;  %v875_v6 = vshll.u32 %v3310_v61, 16  ;;  %v630_v8 = vsel %vm598_vm3, %v582_v47, %v614_v62 }
  0x44   : > { %v687_v34 = vrot.slane %v629_v63, 7  ;;  %v688_v9 = vrot.slane %v630_v8, 7  ;;  %vm600_vm5 = vcmp.ge.f32.partialorder %v584_v0, 0.0  ;;  %v616_v10 = vmul.f32 0.01, %v584_v0  ;;  %v2649_v63 = vld [vmem:[%s471_s15] sm:$0xff]  }
  0x45   : > { %v872_v12 = vrot.slane %v870_v5, 1  ;;  %v877_v13 = vrot.slane %v875_v6, 1  ;;  %v631_v15 = vsel %vm599_vm4, %v583_v53, %v615_v2  ;;  %v1140_v50 = vrot.slane %v3249_v48, 1  ;;  %v2658_v53 = vld [vmem:[%s3109_s12 + $0x38] sm:$0xff]   ;;  %s3389_s12 = scalar_select %p500_p11, 0.0, 1.0 }
  0x46   : > { %v689_v16 = vsel %vm680_vm1, %v687_v34, %v688_v9  ;;  %v743_v19 = vsel %vm680_vm1, 0.0, %v687_v34  ;;  %v753_v20 = vsel %vm680_vm1, %v688_v9, 0.0  ;;  %v632_v21 = vsel %vm600_vm5, %v584_v0, %v616_v10 }
  0x47   : > { %v873_v22 = vor.u32 %v872_v12, %v868_v3  ;;  %v3319_v24 = vpack.c.bf16 %v689_v16, %v743_v19  ;;  %v3321_v26 = vpack.c.bf16 %v753_v20, %v753_v20  ;;  %v690_v27 = vrot.slane %v631_v15, 7 }
  0x48   : > { %v691_v28 = vrot.slane %v632_v21, 7  ;;  %v1141_v52 = vrot.slane %v3251_v49, 1  ;;  %vm1139_vm6 = vcmask 1046528   ;;  %v1312_v62 = vsel %vm906_vm0, %v3229_v36, 0 }
  0x49   : > { %v3324_v30 = vsel %vm782_vm8, %v873_v22, %v877_v13  ;;  %v808_v32 = vshrl.u32 %v3319_v24, 16  ;;  %v810_v35 = vshll.u32 %v3319_v24, 16  ;;  %v815_v37 = vshll.u32 %v3321_v26, 16 }
  0x4a   : > { %2755 = vmatmul.mubr.msk.bf16.gmra.mxu1 %vm881_vm9, %v3324_v30  ;;  %v692_v38 = vsel %vm680_vm1, %v690_v27, %v691_v28  ;;  %v744_v39 = vsel %vm680_vm1, 0.0, %v690_v27  ;;  %v754_v23 = vsel %vm680_vm1, %v691_v28, 0.0  ;;  %v2646_v49 = vunpack.c.l.bf16 %v2658_v53 }
  0x4b   : > { %v812_v41 = vrot.slane %v810_v35, 1  ;;  %v817_v42 = vrot.slane %v815_v37, 1  ;;  %v3337_v43 = vpack.c.bf16 %v692_v38, %v744_v39  ;;  %v3339_v44 = vpack.c.bf16 %v754_v23, %v754_v23  ;;  %2760 = vmatprep.mubr.msk.bf16.mxu1 %vm881_vm9, %v3249_v48  ;;  %v3362_v48 = vld [vmem:[%s3921_s5 + $0x14] sm:$0xf] }
  0x4c   : > { %v1144_v2 = vrot.slane %v3239_v40, 1  ;;  %v1142_v3 = vsel %vm1139_vm6, %v1140_v50, %v1141_v52  ;;  %v1143_v5 = vrot.slane %v3237_v33, 1  ;;  %v2647_v36 = vunpack.c.h.bf16 %v2658_v53 }
  0x4d   : > { %v813_v45 = vor.u32 %v812_v41, %v808_v32  ;;  %v820_v7 = vshrl.u32 %v3337_v43, 16  ;;  %v822_v46 = vshll.u32 %v3337_v43, 16  ;;  %v827_v47 = vshll.u32 %v3339_v44, 16 }
  0x4e   : > { %v577_v8 = vmul.f32 %v2646_v49, %v3114_v4  ;;  %v2650_v34 = vunpack.c.l.bf16 %v2649_v63  ;;  %v1146_v40 = vrot.slane %v3319_v24, 1  ;;  %v1147_v9 = vrot.slane %v3321_v26, 1 }
  0x4f   : > { %v3353_v56 = vsel %vm782_vm8, %v813_v45, %v817_v42  ;;  %v824_v57 = vrot.slane %v822_v46, 1  ;;  %v829_v58 = vrot.slane %v827_v47, 1  ;;  %v578_v10 = vmul.f32 %v2647_v36, %v3114_v4 }
  0x50   : > { %2746 = vmatprep.mubr.msk.bf16.mxu0 %vm881_vm9, %v3353_v56  ;;  %v2651_v12 = vunpack.c.h.bf16 %v2649_v63  ;;  %v1444_v13 = vsel %vm906_vm0, %v3287_v31, 0  ;;  %v593_v15 = vadd.f32 %v3128_v14, %v577_v8  ;;  %v647_v16 = vmul.f32 %v2650_v34, %v3114_v4 }
  0x51   : > { %v825_v0 = vor.u32 %v824_v57, %v820_v7  ;;  %v3393_v19 = vsel %vm1139_vm6, %v1143_v5, %v1144_v2  ;;  %v1152_v20 = vrot.slane %v3178_v54, 1  ;;  %v594_v21 = vadd.f32 %v3128_v14, %v578_v10 }
  0x52   : > { %2761 = vmatmul.mubr.msk.bf16.vlgmr.msra.gmra.mxu1 %vm881_vm9, %v3237_v33  ;;  %v648_v22 = vmul.f32 %v2651_v12, %v3114_v4  ;;  %v1153_v26 = vrot.slane %v3180_v55, 1  ;;  %vm609_vm7 = vcmp.ge.f32.partialorder %v593_v15, 0.0  ;;  %v625_v31 = vmul.f32 0.01, %v593_v15 }
  0x53   : > { %v3371_v6 = vsel %vm782_vm8, %v825_v0, %v829_v58  ;;  %2795 = vmatpush3.bf16.msra.mxu1 %v1312_v62  ;;  %2764 = vmatprep.mubr.msk.bf16.mxu1 %vm881_vm9, %v3319_v24  ;;  %v649_v27 = vadd.f32 %v3128_v14, %v647_v16  ;;  %v3401_v28 = vsel %vm1139_vm6, %v1146_v40, %v1147_v9  ;;  %vm610_vm10 = vcmp.ge.f32.partialorder %v594_v21, 0.0 }
  0x54   : > { %2747 = vmatmul.mubr.msk.bf16.gmra.mxu0 %vm881_vm9, %v3371_v6  ;;  %2910 = vmatprep.subr.msk.bf16.mxu1 %vm906_vm0, %v3362_v48  ;;  %v626_v32 = vmul.f32 0.01, %v594_v21  ;;  %v650_v35 = vadd.f32 %v3128_v14, %v648_v22  ;;  %v641_v37 = vsel %vm609_vm7, %v593_v15, %v625_v31  ;;  %v657_v39 = vstv %s3389_s12  ;;  %v3414_v14 = vld [vmem:[%s3921_s5 + $0x18] sm:$0xf] }
  0x55   : > { %2778 = vmatprep.mubr.msk.bf16.mxu0 %vm881_vm9, %v1142_v3  ;;  %vm651_vm11 = vcmp.ge.f32.partialorder %v649_v27, 0.0  ;;  %v653_v38 = vmul.f32 0.01, %v649_v27  ;;  %v705_v55 = vrot.slane %v641_v37, 7  ;;  %v1149_v41 = vrot.slane %v3337_v43, 1 }
  0x56   : > { %v642_v4 = vsel %vm610_vm10, %v594_v21, %v626_v32  ;;  %vm652_vm12 = vcmp.ge.f32.partialorder %v650_v35, 0.0  ;;  %v654_v23 = vmul.f32 0.01, %v650_v35  ;;  %v1150_v42 = vrot.slane %v3339_v44, 1 }
  0x57   : > { %v706_v45 = vrot.slane %v642_v4, 7  ;;  %v655_v7 = vsel %vm651_vm11, %v649_v27, %v653_v38  ;;  %v749_v46 = vsel %vm680_vm1, 0.0, %v705_v55  ;;  %v3431_v0 = vsel %vm1139_vm6, %v1152_v20, %v1153_v26 }
  0x58   : > { %v656_v47 = vsel %vm652_vm12, %v650_v35, %v654_v23  ;;  %v658_v50 = vmul.f32 %v657_v39, %v655_v7  ;;  %v3428_v63 = vsel %vm1139_vm6, %v1149_v41, %v1150_v42  ;;  %v1155_v16 = vrot.slane %v3187_v59, 1 }
  0x59   : > { %v707_v44 = vsel %vm680_vm1, %v705_v55, %v706_v45  ;;  %v759_v52 = vsel %vm680_vm1, %v706_v45, 0.0  ;;  %v659_v53 = vmul.f32 %v657_v39, %v656_v47  ;;  %v1156_v27 = vrot.slane %v3196_v1, 1 }
  0x5a   : > { %2765 = vmatmul.mubr.msk.bf16.gmra.mxu1 %vm881_vm9, %v3337_v43  ;;  %v3425_v57 = vpack.c.bf16 %v707_v44, %v749_v46  ;;  %v778_v58 = vpack.c.bf16 %v759_v52, %v759_v52  ;;  %v708_v62 = vrot.slane %v658_v50, 7  ;;  %v1158_v32 = vrot.slane %v3273_v17, 1  ;;  %v2551_v50 = vld [vmem:[%s3921_s5 + $0x1c] sm:$0xf] }
  0x5b   : > { %2768 = vmatprep.mubr.msk.bf16.mxu1 %vm881_vm9, %v3178_v54  ;;  %v709_v49 = vrot.slane %v659_v53, 7  ;;  %v1159_v38 = vrot.slane %v3275_v18, 1  ;;  %v3466_v42 = vsel %vm1139_vm6, %v1155_v16, %v1156_v27  ;;  %v1161_v45 = vrot.slane %v3308_v60, 1 }
  0x5c   : > { %2779 = vmatmul.mubr.msk.bf16.vlgmr.msra.gmra.mxu0 %vm881_vm9, %v3393_v19  ;;  %v1427_v2 = vshrl.u32 %v3425_v57, 16  ;;  %v1429_v3 = vshll.u32 %v3425_v57, 16  ;;  %v1434_v5 = vshll.u32 %v778_v58, 16  ;;  %v1561_v36 = vrot.slane %v3425_v57, 1 }
  0x5d   : > { %2813 = vmatpush3.bf16.msra.mxu0 %v1444_v13  ;;  %2782 = vmatprep.mubr.msk.bf16.mxu0 %vm881_vm9, %v3401_v28  ;;  %v1562_v8 = vrot.slane %v778_v58, 1  ;;  %v710_v34 = vsel %vm680_vm1, %v708_v62, %v709_v49  ;;  %v750_v40 = vsel %vm680_vm1, 0.0, %v708_v62  ;;  %v760_v9 = vsel %vm680_vm1, %v709_v49, 0.0 }
  0x5e   : > { %2911 = vmatprep.subr.msk.bf16.mxu0 %vm906_vm0, %v3414_v14  ;;  %v1431_v10 = vrot.slane %v1429_v3, 1  ;;  %v1436_v12 = vrot.slane %v1434_v5, 1  ;;  %v3441_v13 = vpack.c.bf16 %v710_v34, %v750_v40  ;;  %v780_v15 = vpack.c.bf16 %v760_v9, %v760_v9 }
  0x5f   : > { %v3447_v20 = vsel %vm1139_vm6, %v1561_v36, %v1562_v8  ;;  %v3471_v1 = vsel %vm1139_vm6, %v1158_v32, %v1159_v38  ;;  %v1162_v7 = vrot.slane %v3310_v61, 1  ;;  %v1570_v46 = vsel %vm906_vm0, %v3362_v48, 0  ;;  %v2560_v61 = vld [vmem:[%s3921_s5 + $0x20] sm:$0xf] }
  0x60   : > { %v1432_v21 = vor.u32 %v1431_v10, %v1427_v2  ;;  %v1806_v22 = vshrl.u32 %v3441_v13, 16  ;;  %v1808_v26 = vshll.u32 %v3441_v13, 16  ;;  %v1813_v31 = vshll.u32 %v780_v15, 16 }
  0x61   : > { %v1940_v35 = vrot.slane %v3441_v13, 1  ;;  %v1941_v37 = vrot.slane %v780_v15, 1  ;;  %v1163_v47 = vsel %vm1139_vm6, %v1161_v45, %v1162_v7  ;;  %v1949_v48 = vsel %vm906_vm0, %v2560_v61, 0 }
  0x62   : > { %2769 = vmatmul.mubr.msk.bf16.gmra.mxu1 %vm881_vm9, %v3187_v59  ;;  %v3460_v39 = vsel %vm782_vm8, %v1432_v21, %v1436_v12  ;;  %v1810_v4 = vrot.slane %v1808_v26, 1  ;;  %v1815_v55 = vrot.slane %v1813_v31, 1 }
  0x63   : > { %2772 = vmatprep.mubr.msk.bf16.mxu1 %vm881_vm9, %v3273_v17  ;;  %v3463_v23 = vsel %vm1139_vm6, %v1940_v35, %v1941_v37 }
  0x64   : > { %2783 = vmatmul.mubr.msk.bf16.gmra.mxu0 %vm881_vm9, %v3428_v63  ;;  %v1811_v41 = vor.u32 %v1810_v4, %v1806_v22 }
  0x65   : > { %2786 = vmatprep.mubr.msk.bf16.mxu0 %vm881_vm9, %v3431_v0 }
  0x66   : > { %v3474_v18 = vsel %vm782_vm8, %v1811_v41, %v1815_v55  ;;  %vm2178_vm8 = vcmask 58368  }
  0x6a   : > { %2773 = vmatmul.mubr.msk.bf16.gmra.mxu1 %vm881_vm9, %v3308_v60 }
  0x6b   : > { %2796 = vmatprep.mubr.msk.bf16.mxu1 %vm881_vm9, %v3237_v33  ;;  %v1691_v33 = vsel %vm906_vm0, %v3414_v14, 0 }
  0x6c   : > { %2787 = vmatmul.mubr.msk.bf16.gmra.mxu0 %vm881_vm9, %v3466_v42 }
  0x6d   : > { %2790 = vmatprep.mubr.msk.bf16.mxu0 %vm881_vm9, %v3471_v1 }
  0x72   : > { %2797 = vmatmul.mubr.msk.bf16.vlgmr.msra.gmra.mxu1 %vm881_vm9, %v3319_v24 }
  0x73   : > { %2831 = vmatpush3.bf16.msra.mxu1 %v1570_v46  ;;  %2800 = vmatprep.mubr.msk.bf16.mxu1 %vm881_vm9, %v3337_v43 }
  0x74   : > { %2791 = vmatmul.mubr.msk.bf16.gmra.mxu0 %vm881_vm9, %v1163_v47  ;;  %2912 = vmatprep.subr.msk.bf16.mxu1 %vm906_vm0, %v2551_v50 }
  0x75   : > { %2814 = vmatprep.mubr.msk.bf16.mxu0 %vm881_vm9, %v3268_v11  ;;  %v1823_v11 = vsel %vm906_vm0, %v2551_v50, 0 }
  0x7a   : > { %2801 = vmatmul.mubr.msk.bf16.gmra.mxu1 %vm881_vm9, %v3178_v54 }
  0x7b   : > { %2804 = vmatprep.mubr.msk.bf16.mxu1 %vm881_vm9, %v3187_v59 }
  0x7c   : > { %2815 = vmatmul.mubr.msk.bf16.vlgmr.msra.gmra.mxu0 %vm881_vm9, %v3353_v56 }
  0x7d   : > { %2849 = vmatpush3.bf16.msra.mxu0 %v1691_v33  ;;  %2818 = vmatprep.mubr.msk.bf16.mxu0 %vm881_vm9, %v3371_v6 }
  0x7e   : > { %2913 = vmatprep.subr.msk.bf16.mxu0 %vm906_vm0, %v2560_v61  ;;  %vm2244_vm0 = vcmask 60416  }
  0x82   : > { %2805 = vmatmul.mubr.msk.bf16.gmra.mxu1 %vm881_vm9, %v3273_v17 }
  0x83   : > { %2808 = vmatprep.mubr.msk.bf16.mxu1 %vm881_vm9, %v3308_v60 }
  0x84   : > { %2819 = vmatmul.mubr.msk.bf16.gmra.mxu0 %vm881_vm9, %v3211_v25 }
  0x85   : > { %2822 = vmatprep.mubr.msk.bf16.mxu0 %vm881_vm9, %v3218_v29 }
  0x8a   : > { %2809 = vmatmul.mubr.msk.bf16.gmra.mxu1 %vm881_vm9, %v3425_v57 }
  0x8b   : > { %2832 = vmatprep.mubr.msk.bf16.mxu1 %vm881_vm9, %v3393_v19 }
  0x8c   : > { %2823 = vmatmul.mubr.msk.bf16.gmra.mxu0 %vm881_vm9, %v3301_v51 }
  0x8d   : > { %2826 = vmatprep.mubr.msk.bf16.mxu0 %vm881_vm9, %v3324_v30 }
  0x92   : > { %2833 = vmatmul.mubr.msk.bf16.vlgmr.msra.gmra.mxu1 %vm881_vm9, %v3401_v28 }
  0x93   : > { %2867 = vmatpush3.bf16.msra.mxu1 %v1823_v11  ;;  %2836 = vmatprep.mubr.msk.bf16.mxu1 %vm881_vm9, %v3428_v63 }
  0x94   : > { %2827 = vmatmul.mubr.msk.bf16.gmra.mxu0 %vm881_vm9, %v3460_v39 }
  0x95   : > { %2850 = vmatprep.mubr.msk.bf16.mxu0 %vm881_vm9, %v3319_v24 }
  0x9a   : > { %2837 = vmatmul.mubr.msk.bf16.gmra.mxu1 %vm881_vm9, %v3431_v0 }
  0x9b   : > { %2840 = vmatprep.mubr.msk.bf16.mxu1 %vm881_vm9, %v3466_v42 }
  0x9c   : > { %2851 = vmatmul.mubr.msk.bf16.vlgmr.msra.gmra.mxu0 %vm881_vm9, %v3337_v43 }
  0x9d   : > { %2885 = vmatpush3.bf16.msra.mxu0 %v1949_v48  ;;  %2854 = vmatprep.mubr.msk.bf16.mxu0 %vm881_vm9, %v3178_v54 }
  0xa2   : > { %2841 = vmatmul.mubr.msk.bf16.gmra.mxu1 %vm881_vm9, %v3471_v1 }
  0xa3   : > { %2844 = vmatprep.mubr.msk.bf16.mxu1 %vm881_vm9, %v1163_v47 }
  0xa4   : > { %2855 = vmatmul.mubr.msk.bf16.gmra.mxu0 %vm881_vm9, %v3187_v59 }
  0xa5   : > { %2858 = vmatprep.mubr.msk.bf16.mxu0 %vm881_vm9, %v3273_v17 }
  0xaa   : > { %2845 = vmatmul.mubr.msk.bf16.gmra.mxu1 %vm881_vm9, %v3447_v20 }
  0xab   : > { %2868 = vmatprep.mubr.msk.bf16.mxu1 %vm881_vm9, %v3353_v56 }
  0xac   : > { %2859 = vmatmul.mubr.msk.bf16.gmra.mxu0 %vm881_vm9, %v3308_v60 }
  0xad   : > { %2862 = vmatprep.mubr.msk.bf16.mxu0 %vm881_vm9, %v3425_v57 }
  0xb2   : > { %2869 = vmatmul.mubr.msk.bf16.vlgmr.msra.gmra.mxu1 %vm881_vm9, %v3371_v6 }
  0xb3   : > { %2872 = vmatprep.mubr.msk.bf16.mxu1 %vm881_vm9, %v3211_v25 }
  0xb4   : > { %2863 = vmatmul.mubr.msk.bf16.gmra.mxu0 %vm881_vm9, %v3441_v13 }
  0xb5   : > { %2886 = vmatprep.mubr.msk.bf16.mxu0 %vm881_vm9, %v3401_v28 }
  0xba   : > { %2873 = vmatmul.mubr.msk.bf16.gmra.mxu1 %vm881_vm9, %v3218_v29 }
  0xbb   : > { %2876 = vmatprep.mubr.msk.bf16.mxu1 %vm881_vm9, %v3301_v51 }
  0xbc   : > { %2887 = vmatmul.mubr.msk.bf16.vlgmr.msra.gmra.mxu0 %vm881_vm9, %v3428_v63 }
  0xbd   : > { %2890 = vmatprep.mubr.msk.bf16.mxu0 %vm881_vm9, %v3431_v0 }
  0xc2   : > { %2877 = vmatmul.mubr.msk.bf16.gmra.mxu1 %vm881_vm9, %v3324_v30 }
  0xc3   : > { %2880 = vmatprep.mubr.msk.bf16.mxu1 %vm881_vm9, %v3460_v39 }
  0xc4   : > { %2891 = vmatmul.mubr.msk.bf16.gmra.mxu0 %vm881_vm9, %v3466_v42 }
  0xc5   : > { %2894 = vmatprep.mubr.msk.bf16.mxu0 %vm881_vm9, %v3471_v1 }
  0xca   : > { %2881 = vmatmul.mubr.msk.bf16.gmra.mxu1 %vm881_vm9, %v3474_v18 }
  0xcc   : > { %2895 = vmatmul.mubr.msk.bf16.gmra.mxu0 %vm881_vm9, %v1163_v47 }
  0xcd   : > { %2898 = vmatprep.mubr.msk.bf16.mxu0 %vm881_vm9, %v3447_v20 }
  0xd4   : > { %2899 = vmatmul.mubr.msk.bf16.gmra.mxu0 %vm881_vm9, %v3463_v23 }
  0xee   : > { %v2752_v54 = vpop.f32.mrf.mxu1 }
  0xf0   : > { %v976_v59 = vpop.f32.mrf.mxu1 }
  0xf2   : > { %v2753_v25 = vpop.f32.mrf.mxu1 }
  0xf4   : > { %v979_v17 = vpop.f32.mrf.mxu1 }
  0xfc   : > { %v2744_v29 = vpop.f32.mrf.mxu0 }
  0xfe   : > { %v944_v51 = vpop.f32.mrf.mxu0 }
 0x100   : > { %v2745_v24 = vpop.f32.mrf.mxu0 }
 0x102   : > { %v947_v56 = vpop.f32.mrf.mxu0 }
 0x10a   : > { %v2756_v60 = vpop.f32.mrf.mxu1 }
 0x10c   : > { %v992_v30 = vpop.f32.mrf.mxu1 }
 0x10e   : > { %v2757_v43 = vpop.f32.mrf.mxu1 }
 0x110   : > { %v995_v6 = vpop.f32.mrf.mxu1 }
 0x112   : > { %v2762_v19 = vpop.f32.mrf.mxu1 }
 0x113   : > { %v1069_v28 = vadd.f32 %v2762_v19, %v2744_v29 }
 0x114   : > { %v2748_v14 = vpop.f32.mrf.mxu0  ;;  %v1060_v44 = vpop.f32.mrf.mxu1 }
 0x115   : > { %v1061_v52 = vadd.f32 %v1060_v44, %v944_v51 }
 0x116   : > { %v960_v53 = vpop.f32.mrf.mxu0  ;;  %v2763_v57 = vpop.f32.mrf.mxu1 }
 0x117   : > { %v1072_v58 = vadd.f32 %v2763_v57, %v2745_v24 }
 0x118   : > { %v2749_v62 = vpop.f32.mrf.mxu0  ;;  %v1063_v63 = vpop.f32.mrf.mxu1 }
 0x119   : > { %v1064_v0 = vadd.f32 %v1063_v63, %v947_v56 }
 0x11a   : > { %v963_v49 = vpop.f32.mrf.mxu0  ;;  %v2766_v2 = vpop.f32.mrf.mxu1 }
 0x11b   : > { %v1085_v3 = vadd.f32 %v2766_v2, %v2748_v14 }
 0x11c   : > { %v2780_v5 = vpop.f32.mrf.mxu0  ;;  %v1076_v36 = vpop.f32.mrf.mxu1 }
 0x11d   : > { %v3592_v8 = vadd.f32 %v2780_v5, %v1069_v28  ;;  %v1077_v34 = vadd.f32 %v1076_v36, %v960_v53 }
 0x11e   : > { %v1227_v40 = vpop.f32.mrf.mxu0  ;;  %v2767_v9 = vpop.f32.mrf.mxu1 }
 0x11f   : > { %v3594_v10 = vadd.f32 %v1227_v40, %v1061_v52  ;;  %v1088_v12 = vadd.f32 %v2767_v9, %v2749_v62 }
 0x120   : > { %v2781_v13 = vpop.f32.mrf.mxu0  ;;  %v1079_v15 = vpop.f32.mrf.mxu1 }
 0x121   : > { %v3596_v16 = vadd.f32 %v2781_v13, %v1072_v58  ;;  %v1080_v20 = vadd.f32 %v1079_v15, %v963_v49 }
 0x122   : > { %v1230_v21 = vpop.f32.mrf.mxu0  ;;  %v2770_v22 = vpop.f32.mrf.mxu1 }
 0x123   : > { %v3598_v26 = vadd.f32 %v1230_v21, %v1064_v0  ;;  %v1101_v31 = vadd.f32 %v2770_v22, %v2752_v54 }
 0x124   : > { %v2784_v27 = vpop.f32.mrf.mxu0  ;;  %v1092_v32 = vpop.f32.mrf.mxu1 }
 0x125   : > { %v3600_v35 = vadd.f32 %v2784_v27, %v1085_v3  ;;  %v1093_v37 = vadd.f32 %v1092_v32, %v976_v59 }
 0x126   : > { %v1243_v38 = vpop.f32.mrf.mxu0  ;;  %v2771_v39 = vpop.f32.mrf.mxu1 }
 0x127   : > { %v3602_v4 = vadd.f32 %v1243_v38, %v1077_v34  ;;  %v1104_v55 = vadd.f32 %v2771_v39, %v2753_v25 }
 0x128   : > { %v2785_v23 = vpop.f32.mrf.mxu0  ;;  %v1095_v41 = vpop.f32.mrf.mxu1 }
 0x129   : > { %v3604_v42 = vadd.f32 %v2785_v23, %v1088_v12  ;;  %v1096_v1 = vadd.f32 %v1095_v41, %v979_v17 }
 0x12a   : > { %v1246_v18 = vpop.f32.mrf.mxu0  ;;  %v2774_v45 = vpop.f32.mrf.mxu1 }
 0x12b   : > { %v3606_v7 = vadd.f32 %v1246_v18, %v1080_v20  ;;  %v1117_v46 = vadd.f32 %v2774_v45, %v2756_v60 }
 0x12c   : > { %v2788_v47 = vpop.f32.mrf.mxu0  ;;  %v1108_v50 = vpop.f32.mrf.mxu1 }
 0x12d   : > { %v3608_v33 = vadd.f32 %v2788_v47, %v1101_v31  ;;  %v1109_v61 = vadd.f32 %v1108_v50, %v992_v30 }
 0x12e   : > { %v1259_v11 = vpop.f32.mrf.mxu0  ;;  %v2775_v48 = vpop.f32.mrf.mxu1 }
 0x12f   : > { %v3610_v54 = vadd.f32 %v1259_v11, %v1093_v37  ;;  %v1120_v59 = vadd.f32 %v2775_v48, %v2757_v43 }
 0x130   : > { %v2789_v25 = vpop.f32.mrf.mxu0  ;;  %v1111_v29 = vpop.f32.mrf.mxu1 }
 0x131   : > { %v3612_v51 = vadd.f32 %v2789_v25, %v1104_v55  ;;  %v1112_v17 = vadd.f32 %v1111_v29, %v995_v6 }
 0x132   : > { %v1262_v24 = vpop.f32.mrf.mxu0  ;;  %v3614_v56 = vpop.f32.mrf.mxu1 }
 0x133   : > { %v3616_v19 = vadd.f32 %v1262_v24, %v1096_v1 }
 0x134   : > { %v2792_v60 = vpop.f32.mrf.mxu0  ;;  %v3618_v28 = vpop.f32.mrf.mxu1 }
 0x135   : > { %v3620_v14 = vadd.f32 %v2792_v60, %v1117_v46 }
 0x136   : > { %v1275_v30 = vpop.f32.mrf.mxu0  ;;  %v3622_v44 = vpop.f32.mrf.mxu1 }
 0x137   : > { %v3624_v52 = vadd.f32 %v1275_v30, %v1109_v61 }
 0x138   : > { %v2793_v43 = vpop.f32.mrf.mxu0  ;;  %v3626_v53 = vpop.f32.mrf.mxu1 }
 0x139   : > { %v3628_v57 = vadd.f32 %v2793_v43, %v1120_v59 }
 0x13a   : > { %v1278_v6 = vpop.f32.mrf.mxu0  ;;  %v2802_v58 = vpop.f32.mrf.mxu1 }
 0x13b   : > { %v3630_v62 = vadd.f32 %v1278_v6, %v1112_v17 }
 0x13c   : > { %v2816_v63 = vpop.f32.mrf.mxu0  ;;  %v1364_v0 = vpop.f32.mrf.mxu1 }
 0x13e   : > { %v1480_v49 = vpop.f32.mrf.mxu0  ;;  %v2803_v2 = vpop.f32.mrf.mxu1 }
 0x140   : > { %v2817_v3 = vpop.f32.mrf.mxu0  ;;  %v1367_v5 = vpop.f32.mrf.mxu1 }
 0x142   : > { %v1483_v36 = vpop.f32.mrf.mxu0  ;;  %v2806_v34 = vpop.f32.mrf.mxu1 }
 0x144   : > { %v2820_v40 = vpop.f32.mrf.mxu0  ;;  %v1380_v9 = vpop.f32.mrf.mxu1 }
 0x146   : > { %v3632_v12 = vpop.f32.mrf.mxu0  ;;  %v3634_v13 = vpop.f32.mrf.mxu1 }
 0x148   : > { %v2821_v15 = vpop.f32.mrf.mxu0  ;;  %v3636_v20 = vpop.f32.mrf.mxu1 }
 0x14a   : > { %v3638_v21 = vpop.f32.mrf.mxu0  ;;  %v3640_v22 = vpop.f32.mrf.mxu1 }
 0x14c   : > { %v2824_v31 = vpop.f32.mrf.mxu0  ;;  %v3642_v27 = vpop.f32.mrf.mxu1 }
 0x14e   : > { %v3644_v32 = vpop.f32.mrf.mxu0  ;;  %v3646_v37 = vpop.f32.mrf.mxu1 }
 0x150   : > { %v3648_v38 = vpop.f32.mrf.mxu0  ;;  %v3650_v39 = vpop.f32.mrf.mxu1 }
 0x152   : > { %v3652_v55 = vpop.f32.mrf.mxu0  ;;  %v3654_v23 = vpop.f32.mrf.mxu1 }
 0x154   : > { %v3656_v41 = vpop.f32.mrf.mxu0  ;;  %v3658_v1 = vpop.f32.mrf.mxu1 }
 0x156   : > { %v3660_v18 = vpop.f32.mrf.mxu0  ;;  %v3662_v45 = vpop.f32.mrf.mxu1 }
 0x158   : > { %v3664_v46 = vpop.f32.mrf.mxu0  ;;  %v3666_v47 = vpop.f32.mrf.mxu1 }
 0x15a   : > { %v3668_v50 = vpop.f32.mrf.mxu0  ;;  %v3670_v61 = vpop.f32.mrf.mxu1 }
 0x15b   : > { %3926 = vst [vmem:[#allocation2_spill] sm:$0xff] %v3670_v61 }
 0x15c   : > { %v3672_v11 = vpop.f32.mrf.mxu0  ;;  %v3674_v48 = vpop.f32.mrf.mxu1 }
 0x15d   : > { %3927 = vst [vmem:[#allocation3_spill] sm:$0xff] %v3674_v48 }
 0x15e   : > { %v3676_v59 = vpop.f32.mrf.mxu0  ;;  %v3678_v25 = vpop.f32.mrf.mxu1 }
 0x15f   : > { %3928 = vst [vmem:[#allocation4_spill] sm:$0xff] %v3676_v59  ;;  %3929 = vst [vmem:[#allocation5_spill] sm:$0xff] %v3678_v25 }
 0x160   : > { %v3680_v29 = vpop.f32.mrf.mxu0  ;;  %v3682_v17 = vpop.f32.mrf.mxu1 }
 0x161   : > { %3930 = vst [vmem:[#allocation6_spill] sm:$0xff] %v3680_v29  ;;  %3931 = vst [vmem:[#allocation7_spill] sm:$0xff] %v3682_v17 }
 0x162   : > { %v3684_v24 = vpop.f32.mrf.mxu0  ;;  %v3686_v60 = vpop.f32.mrf.mxu1 }
 0x163   : > { %3932 = vst [vmem:[#allocation8_spill] sm:$0xff] %v3684_v24  ;;  %3933 = vst [vmem:[#allocation9_spill] sm:$0xff] %v3686_v60 }
 0x164   : > { %v3688_v30 = vpop.f32.mrf.mxu0  ;;  %v3690_v43 = vpop.f32.mrf.mxu1 }
 0x165   : > { %3934 = vst [vmem:[#allocation10_spill] sm:$0xff] %v3688_v30  ;;  %3935 = vst [vmem:[#allocation11_spill] sm:$0xff] %v3690_v43  ;;  %v1413_v43 = vadd.f32 %v3614_v56, %v3592_v8 }
 0x166   : > { %v3692_v6 = vpop.f32.mrf.mxu0  ;;  %v3694_v61 = vpop.f32.mrf.mxu1 }
 0x167   : > { %3936 = vst [vmem:[#allocation12_spill] sm:$0xff] %v3692_v6  ;;  %3937 = vst [vmem:[#allocation13_spill] sm:$0xff] %v3694_v61 }
 0x168   : > { %v3696_v48 = vpop.f32.mrf.mxu0  ;;  %v3698_v59 = vpop.f32.mrf.mxu1 }
 0x169   : > { %3938 = vst [vmem:[#allocation14_spill] sm:$0xff] %v3696_v48  ;;  %3939 = vst [vmem:[#allocation15_spill] sm:$0xff] %v3698_v59  ;;  %v1411_v59 = vadd.f32 %v3618_v28, %v3594_v10  ;;  %v1416_v10 = vadd.f32 %v1367_v5, %v3606_v7 }
 0x16a   : > { %v3700_v25 = vpop.f32.mrf.mxu0  ;;  %v3702_v29 = vpop.f32.mrf.mxu1 }
 0x16b   : > { %3940 = vst [vmem:[#allocation16_spill] sm:$0xff] %v3700_v25  ;;  %3941 = vst [vmem:[#allocation17_spill] sm:$0xff] %v3702_v29  ;;  %v1414_v29 = vadd.f32 %v3622_v44, %v3596_v16  ;;  %v1543_v56 = vadd.f32 %v1480_v49, %v1411_v59  ;;  %v1421_v16 = vadd.f32 %v2806_v34, %v3608_v33 }
 0x16c   : > { %v3704_v17 = vpop.f32.mrf.mxu0  ;;  %v3706_v24 = vpop.f32.mrf.mxu1  ;;  %v1419_v44 = vadd.f32 %v1380_v9, %v3610_v54  ;;  %v1548_v7 = vadd.f32 %v3638_v21, %v1416_v10  ;;  %v1425_v33 = vadd.f32 %v3640_v22, %v3620_v14  ;;  %v1423_v54 = vadd.f32 %v3642_v27, %v3624_v52  ;;  %v3948_v21 = vld [vmem:[#allocation2_spill] sm:$0xff] }
 0x16d   : > { %3942 = vst [vmem:[#allocation18_spill] sm:$0xff] %v3704_v17  ;;  %3943 = vst [vmem:[#allocation19_spill] sm:$0xff] %v3706_v24  ;;  %v1545_v17 = vadd.f32 %v2816_v63, %v1413_v43  ;;  %v1412_v24 = vadd.f32 %v3626_v53, %v3598_v26  ;;  %v1553_v63 = vadd.f32 %v2824_v31, %v1421_v16 }
 0x16e   : > { %v3708_v60 = vpop.f32.mrf.mxu0  ;;  %v3710_v30 = vpop.f32.mrf.mxu1  ;;  %v1424_v14 = vadd.f32 %v3650_v39, %v3630_v62  ;;  %v1669_v52 = vadd.f32 %v3658_v1, %v1543_v56  ;;  %v1555_v9 = vadd.f32 %v3660_v18, %v1423_v54  ;;  %v3949_v62 = vld [vmem:[#allocation3_spill] sm:$0xff]  ;;  %v3951_v39 = vld [vmem:[#allocation6_spill] sm:$0xff]  ;;  %v3953_v18 = vld [vmem:[#allocation8_spill] sm:$0xff] }
 0x16f   : > { %3944 = vst [vmem:[#allocation20_spill] sm:$0xff] %v3708_v60  ;;  %3945 = vst [vmem:[#allocation21_spill] sm:$0xff] %v3710_v30  ;;  %v1417_v60 = vadd.f32 %v2802_v58, %v3600_v35  ;;  %v1415_v30 = vadd.f32 %v1364_v0, %v3602_v4  ;;  %v1544_v28 = vadd.f32 %v1483_v36, %v1412_v24  ;;  %v3957_v24 = vld [vmem:[#allocation12_spill] sm:$0xff] }
 0x170   : > { %v3714_v61 = vpop.f32.mrf.mxu0  ;;  %v3716_v48 = vpop.f32.mrf.mxu1  ;;  %v1422_v58 = vadd.f32 %v3634_v13, %v3612_v51  ;;  %v1426_v51 = vadd.f32 %v3646_v37, %v3628_v57  ;;  %v1557_v36 = vadd.f32 %v3656_v41, %v1425_v33  ;;  %v3950_v37 = vld [vmem:[#allocation4_spill] sm:$0xff]  ;;  %v3959_v56 = vld [vmem:[#allocation14_spill] sm:$0xff] }
 0x171   : > { %3946 = vst [vmem:[#allocation22_spill] sm:$0xff] %v3714_v61  ;;  %3947 = vst [vmem:[#allocation23_spill] sm:$0xff] %v3716_v48  ;;  %v1546_v61 = vadd.f32 %v2817_v3, %v1414_v29  ;;  %v1418_v48 = vadd.f32 %v2803_v2, %v3604_v42  ;;  %v1549_v6 = vadd.f32 %v2820_v40, %v1417_v60  ;;  %v3774_v29 = vld [vmem:[%s3922_s6] ss:$0 sm:$0xff] }
 0x172   : > { %v3726_v25 = vpop.f32.mrf.mxu0  ;;  %v2870_v8 = vpop.f32.mrf.mxu1  ;;  %v1547_v4 = vadd.f32 %v3632_v12, %v1415_v30  ;;  %v1420_v42 = vadd.f32 %v3636_v20, %v3616_v19  ;;  %v1551_v2 = vadd.f32 %v3644_v32, %v1419_v44  ;;  %v1554_v3 = vadd.f32 %v3648_v38, %v1422_v58  ;;  %v3958_v30 = vld [vmem:[#allocation11_spill] sm:$0xff]  ;;  %v3961_v44 = vld [vmem:[#allocation13_spill] sm:$0xff] }
 0x173   : > { %v1550_v53 = vadd.f32 %v2821_v15, %v1418_v48  ;;  %v1671_v19 = vadd.f32 %v3654_v23, %v1545_v17  ;;  %v1558_v12 = vadd.f32 %v3664_v46, %v1426_v51  ;;  %v1672_v57 = vadd.f32 %v3662_v45, %v1546_v61  ;;  %v3952_v23 = vld [vmem:[#allocation5_spill] sm:$0xff]  ;;  %v3954_v46 = vld [vmem:[#allocation10_spill] sm:$0xff] }
 0x174   : > { %v3732_v26 = vpop.f32.mrf.mxu0  ;;  %v1859_v35 = vpop.f32.mrf.mxu1  ;;  %v1552_v5 = vadd.f32 %v3652_v55, %v1420_v42  ;;  %v1556_v15 = vadd.f32 %v3668_v50, %v1424_v14  ;;  %v1670_v20 = vadd.f32 %v3666_v47, %v1544_v28  ;;  %v1675_v22 = vadd.f32 %v3948_v21, %v1549_v6  ;;  %v3955_v50 = vld [vmem:[#allocation7_spill] sm:$0xff]  ;;  %v3956_v47 = vld [vmem:[#allocation9_spill] sm:$0xff]  ;;  %v3960_v28 = vld [vmem:[#allocation16_spill] sm:$0xff] }
 0x175   : > { %v1792_v13 = vadd.f32 %v3672_v11, %v1671_v19  ;;  %v1673_v31 = vadd.f32 %v3949_v62, %v1547_v4  ;;  %v1790_v38 = vadd.f32 %v3950_v37, %v1669_v52  ;;  %v1793_v55 = vadd.f32 %v3951_v39, %v1672_v57  ;;  %v3964_v54 = vld [vmem:[#allocation17_spill] sm:$0xff] }
 0x176   : > { %v3744_v0 = vpop.f32.mrf.mxu0  ;;  %v2871_v49 = vpop.f32.mrf.mxu1  ;;  %v1676_v41 = vadd.f32 %v3952_v23, %v1550_v53  ;;  %v1791_v45 = vadd.f32 %v3953_v18, %v1670_v20  ;;  %v1796_v61 = vadd.f32 %v3954_v46, %v1675_v22  ;;  %v1674_v11 = vadd.f32 %v3955_v50, %v1548_v7  ;;  %v3962_v53 = vld [vmem:[#allocation15_spill] sm:$0xff] }
 0x177   : > { %v1924_v1 = vadd.f32 %v2870_v8, %v1792_v13  ;;  %v1679_v48 = vadd.f32 %v3956_v47, %v1553_v63  ;;  %v1794_v60 = vadd.f32 %v3957_v24, %v1673_v31  ;;  %v1677_v43 = vadd.f32 %v3958_v30, %v1551_v2  ;;  %v3963_v63 = vld [vmem:[#allocation18_spill] sm:$0xff] }
 0x178   : > { %v2865_v34 = vpop.f32.mrf.mxu0  ;;  %v1862_v40 = vpop.f32.mrf.mxu1  ;;  %v1922_v6 = vadd.f32 %v1859_v35, %v1790_v38  ;;  %v1797_v10 = vadd.f32 %v3959_v56, %v1676_v41  ;;  %v1795_v16 = vadd.f32 %v3960_v28, %v1674_v11  ;;  %v1680_v4 = vadd.f32 %v3961_v44, %v1554_v3  ;;  %v3965_v35 = vld [vmem:[#allocation20_spill] sm:$0xff]  ;;  %v3966_v3 = vld [vmem:[#allocation19_spill] sm:$0xff] }
 0x179   : > { %v1678_v58 = vadd.f32 %v3962_v53, %v1552_v5  ;;  %v1800_v33 = vadd.f32 %v3963_v63, %v1679_v48  ;;  %v1683_v51 = vadd.f32 %v3964_v54, %v1557_v36  ;;  %v1798_v2 = vadd.f32 %v3965_v35, %v1677_v43  ;;  %v3967_v5 = vld [vmem:[#allocation21_spill] sm:$0xff]  ;;  %v3968_v36 = vld [vmem:[#allocation22_spill] sm:$0xff]  ;;  %v3969_v62 = vld [vmem:[#allocation23_spill] sm:$0xff] }
 0x17a   : > { %v1778_v27 = vpop.f32.mrf.mxu0  ;;  %v2874_v32 = vpop.f32.mrf.mxu1  ;;  %v1681_v52 = vadd.f32 %v3966_v3, %v1555_v9  ;;  %v1684_v57 = vadd.f32 %v3967_v5, %v1558_v12  ;;  %v1925_v13 = vadd.f32 %v2871_v49, %v1793_v55  ;;  %v1801_v22 = vadd.f32 %v3968_v36, %v1680_v4 }
 0x17b   : > { %v1682_v31 = vadd.f32 %v3969_v62, %v1556_v15  ;;  %v3799_v39 = vadd.f32 %v3726_v25, %v1678_v58  ;;  %v3802_v23 = vadd.f32 %v3732_v26, %v1683_v51  ;;  %v1923_v9 = vadd.f32 %v1862_v40, %v1791_v45 }
 0x17c   : > { %v2888_v59 = vpop.f32.mrf.mxu0  ;;  %v1875_v17 = vpop.f32.mrf.mxu1  ;;  %v3805_v55 = vadd.f32 %v3744_v0, %v1681_v52  ;;  %v1928_v18 = vadd.f32 %v2874_v32, %v1796_v61  ;;  %v3809_v46 = vadd.f32 %v2865_v34, %v1684_v57 }
 0x17d   : > { %v2050_v8 = vadd.f32 %v2888_v59, %v1924_v1  ;;  %v3811_v25 = vadd.f32 %v1778_v27, %v1682_v31  ;;  %v1926_v0 = vadd.f32 %v1875_v17, %v1794_v60 }
 0x17e   : > { %v1985_v42 = vpop.f32.mrf.mxu0  ;;  %v2875_v7 = vpop.f32.mrf.mxu1 }
 0x17f   : > { %v2073_v19 = vadd.f32 %v3774_v29, %v2050_v8  ;;  %v2048_v14 = vadd.f32 %v1985_v42, %v1922_v6  ;;  %v1929_v47 = vadd.f32 %v2875_v7, %v1797_v10 }
 0x180   : > { %v2889_v20 = vpop.f32.mrf.mxu0  ;;  %v1878_v21 = vpop.f32.mrf.mxu1 }
 0x181   : > { %v2598_v37 = vpack.c.bf16 %v2073_v19, %v2073_v19  ;;  %v2071_v38 = vadd.f32 %v3774_v29, %v2048_v14  ;;  %v2051_v12 = vadd.f32 %v2889_v20, %v1925_v13  ;;  %v2126_v1 = vmul.f32 %v2073_v19, %v2073_v19 }
 0x182   : > { %v1988_v41 = vpop.f32.mrf.mxu0  ;;  %v2878_v49 = vpop.f32.mrf.mxu1  ;;  %v2090_v59 = vsel %vm881_vm9, %v2073_v19, 0.0  ;;  %v1927_v32 = vadd.f32 %v1878_v21, %v1795_v16 }
 0x183   : > { %2247 = vst.msk [vmem:[%s3790_s16 + $0x8] sm:$0xf] %vm2244_vm0, %v2598_v37  ;;  %v2596_v15 = vpack.c.bf16 %v2071_v38, %v2071_v38  ;;  %v2074_v26 = vadd.f32 %v3774_v29, %v2051_v12  ;;  %v2049_v50 = vadd.f32 %v1988_v41, %v1923_v9  ;;  %v2124_v11 = vmul.f32 %v2071_v38, %v2071_v38 }
 0x184   : > { %v2892_v40 = vpop.f32.mrf.mxu0  ;;  %v1891_v45 = vpop.f32.mrf.mxu1  ;;  %v2143_v30 = vsel %vm881_vm9, %v2126_v1, 0.0  ;;  %v2087_v43 = vsel %vm881_vm9, %v2071_v38, 0.0  ;;  %v1932_v10 = vadd.f32 %v2878_v49, %v1800_v33 }
 0x185   : > { %2245 = vst.msk [vmem:[%s3790_s16] sm:$0xf] %vm2244_vm0, %v2596_v15  ;;  %v2054_v48 = vadd.f32 %v2892_v40, %v1928_v18  ;;  %v2599_v24 = vpack.c.bf16 %v2074_v26, %v2074_v26  ;;  %v2072_v34 = vadd.f32 %v3774_v29, %v2049_v50  ;;  %v2140_v44 = vsel %vm881_vm9, %v2124_v11, 0.0 }
 0x186   : > { %v2001_v27 = vpop.f32.mrf.mxu0  ;;  %v2879_v61 = vpop.f32.mrf.mxu1  ;;  %v1930_v58 = vadd.f32 %v1891_v45, %v1798_v2  ;;  %v2127_v42 = vmul.f32 %v2074_v26, %v2074_v26  ;;  %v2092_v19 = vsel %vm881_vm9, %v2074_v26, 0.0 }
 0x187   : > { %v2077_v6 = vadd.f32 %v3774_v29, %v2054_v48  ;;  %v2052_v8 = vadd.f32 %v2001_v27, %v1926_v0  ;;  %2248 = vst.msk [vmem:[%s3790_s16 + $0xc] sm:$0xf] %vm2244_vm0, %v2599_v24  ;;  %v2088_v17 = vsel %vm881_vm9, %v2072_v34, 0.0  ;;  %v2125_v60 = vmul.f32 %v2072_v34, %v2072_v34 }
 0x188   : > { %v2597_v56 = vpack.c.bf16 %v2072_v34, %v2072_v34  ;;  %v2893_v28 = vpop.f32.mrf.mxu0  ;;  %v1894_v16 = vpop.f32.mrf.mxu1  ;;  %v2089_v4 = vadd.f32 %v2088_v17, %v2087_v43  ;;  %v1933_v57 = vadd.f32 %v2879_v61, %v1801_v22  ;;  %v2145_v31 = vsel %vm881_vm9, %v2127_v42, 0.0 }
 0x189   : > { %v2602_v53 = vpack.c.bf16 %v2077_v6, %v2077_v6  ;;  %v2141_v7 = vsel %vm881_vm9, %v2125_v60, 0.0  ;;  %v2075_v63 = vadd.f32 %v3774_v29, %v2052_v8  ;;  %v2055_v54 = vadd.f32 %v2893_v28, %v1929_v47 }
 0x18a   : > { %2246 = vst.msk [vmem:[%s3790_s16 + $0x4] sm:$0xf] %vm2244_vm0, %v2597_v56  ;;  %v2004_v51 = vpop.f32.mrf.mxu0  ;;  %v2091_v33 = vadd.f32 %v2090_v59, %v2089_v4  ;;  %v2142_v14 = vadd.f32 %v2141_v7, %v2140_v44  ;;  %v2882_v3 = vpop.f32.mrf.mxu1  ;;  %v2130_v37 = vmul.f32 %v2077_v6, %v2077_v6  ;;  %v2098_v11 = vsel %vm881_vm9, %v2077_v6, 0.0 }
 0x18b   : > { %2251 = vst.msk [vmem:[%s3790_s16 + $0x18] sm:$0xf] %vm2244_vm0, %v2602_v53  ;;  %v2053_v35 = vadd.f32 %v2004_v51, %v1927_v32  ;;  %v2128_v52 = vmul.f32 %v2075_v63, %v2075_v63  ;;  %v2600_v2 = vpack.c.bf16 %v2075_v63, %v2075_v63  ;;  %v2078_v5 = vadd.f32 %v3774_v29, %v2055_v54 }
 0x18c   : > { %v2896_v13 = vpop.f32.mrf.mxu0  ;;  %v2144_v20 = vadd.f32 %v2143_v30, %v2142_v14  ;;  %v2093_v21 = vadd.f32 %v2092_v19, %v2091_v33  ;;  %v2094_v38 = vsel %vm881_vm9, %v2075_v63, 0.0  ;;  %v1907_v15 = vpop.f32.mrf.mxu1  ;;  %v1931_v34 = vadd.f32 %v1894_v16, %v3799_v39 }
 0x18d   : > { %v2076_v36 = vadd.f32 %v3774_v29, %v2053_v35  ;;  %v2058_v62 = vadd.f32 %v2896_v13, %v1932_v10  ;;  %2249 = vst.msk [vmem:[%s3790_s16 + $0x10] sm:$0xf] %vm2244_vm0, %v2600_v2  ;;  %v2603_v9 = vpack.c.bf16 %v2078_v5, %v2078_v5  ;;  %v2147_v18 = vsel %vm881_vm9, %v2128_v52, 0.0 }
 0x18e   : > { %v2017_v12 = vpop.f32.mrf.mxu0  ;;  %v2095_v41 = vadd.f32 %v2094_v38, %v2093_v21  ;;  %v2146_v49 = vadd.f32 %v2145_v31, %v2144_v20  ;;  %v2131_v59 = vmul.f32 %v2078_v5, %v2078_v5  ;;  %v2151_v61 = vsel %vm881_vm9, %v2130_v37, 0.0  ;;  %v2883_v8 = vpop.f32.mrf.mxu1 }
 0x18f   : > { %v2096_v22 = vsel %vm881_vm9, %v2076_v36, 0.0  ;;  %v2129_v1 = vmul.f32 %v2076_v36, %v2076_v36  ;;  %2252 = vst.msk [vmem:[%s3790_s16 + $0x1c] sm:$0xf] %vm2244_vm0, %v2603_v9  ;;  %v2601_v26 = vpack.c.bf16 %v2076_v36, %v2076_v36  ;;  %v2081_v50 = vadd.f32 %v3774_v29, %v2058_v62 }
 0x190   : > { %v2056_v40 = vadd.f32 %v2017_v12, %v1930_v58  ;;  %v2897_v45 = vpop.f32.mrf.mxu0  ;;  %v2148_v0 = vadd.f32 %v2147_v18, %v2146_v49  ;;  %v2097_v47 = vadd.f32 %v2096_v22, %v2095_v41  ;;  %v2100_v17 = vsel %vm881_vm9, %v2078_v5, 0.0  ;;  %v1910_v33 = vpop.f32.mrf.mxu1 }
 0x191   : > { %v2149_v48 = vsel %vm881_vm9, %v2129_v1, 0.0  ;;  %2250 = vst.msk [vmem:[%s3790_s16 + $0x14] sm:$0xf] %vm2244_vm0, %v2601_v26  ;;  %v2606_v24 = vpack.c.bf16 %v2081_v50, %v2081_v50  ;;  %v2059_v6 = vadd.f32 %v2897_v45, %v1933_v57  ;;  %v1936_v10 = vadd.f32 %v2882_v3, %v3802_v23 }
 0x192   : > { %v2079_v32 = vadd.f32 %v3774_v29, %v2056_v40  ;;  %v2020_v27 = vpop.f32.mrf.mxu0  ;;  %v2099_v30 = vadd.f32 %v2098_v11, %v2097_v47  ;;  %v2150_v43 = vadd.f32 %v2149_v48, %v2148_v0  ;;  %v2153_v53 = vsel %vm881_vm9, %v2131_v59, 0.0 }
 0x193   : > { %2255 = vst.msk [vmem:[%s3790_s16 + $0x28] sm:$0xf] %vm2244_vm0, %v2606_v24  ;;  %v2082_v44 = vadd.f32 %v3774_v29, %v2059_v6  ;;  %v2057_v4 = vadd.f32 %v2020_v27, %v1931_v34  ;;  %v1934_v42 = vadd.f32 %v1907_v15, %v3805_v55  ;;  %v1937_v19 = vadd.f32 %v2883_v8, %v3809_v46 }
 0x194   : > { %v2132_v60 = vmul.f32 %v2079_v32, %v2079_v32  ;;  %v2604_v56 = vpack.c.bf16 %v2079_v32, %v2079_v32  ;;  %v2900_v28 = vpop.f32.mrf.mxu0  ;;  %v2152_v39 = vadd.f32 %v2151_v61, %v2150_v43  ;;  %v2101_v16 = vadd.f32 %v2100_v17, %v2099_v30 }
 0x195   : > { %v2102_v58 = vsel %vm881_vm9, %v2079_v32, 0.0  ;;  %v2062_v7 = vadd.f32 %v2900_v28, %v1936_v10  ;;  %v2607_v14 = vpack.c.bf16 %v2082_v44, %v2082_v44  ;;  %v2080_v35 = vadd.f32 %v3774_v29, %v2057_v4 }
 0x196   : > { %2253 = vst.msk [vmem:[%s3790_s16 + $0x20] sm:$0xf] %vm2244_vm0, %v2604_v56  ;;  %v2033_v63 = vpop.f32.mrf.mxu0  ;;  %v2103_v54 = vadd.f32 %v2102_v58, %v2101_v16  ;;  %v2154_v51 = vadd.f32 %v2153_v53, %v2152_v39  ;;  %v2155_v23 = vsel %vm881_vm9, %v2132_v60, 0.0  ;;  %v2134_v5 = vmul.f32 %v2081_v50, %v2081_v50 }
 0x197   : > { %v2085_v3 = vadd.f32 %v3774_v29, %v2062_v7  ;;  %v2060_v52 = vadd.f32 %v2033_v63, %v1934_v42  ;;  %2256 = vst.msk [vmem:[%s3790_s16 + $0x2c] sm:$0xf] %vm2244_vm0, %v2607_v14  ;;  %v2104_v13 = vsel %vm881_vm9, %v2080_v35, 0.0  ;;  %v2133_v20 = vmul.f32 %v2080_v35, %v2080_v35 }
 0x198   : > { %v2901_v2 = vpop.f32.mrf.mxu0  ;;  %v2156_v55 = vadd.f32 %v2155_v23, %v2154_v51  ;;  %v2605_v21 = vpack.c.bf16 %v2080_v35, %v2080_v35  ;;  %v1935_v46 = vadd.f32 %v1910_v33, %v3811_v25  ;;  %v2106_v62 = vsel %vm881_vm9, %v2081_v50, 0.0 }
 0x199   : > { %v2063_v57 = vadd.f32 %v2901_v2, %v1937_v19  ;;  %v2105_v31 = vadd.f32 %v2104_v13, %v2103_v54  ;;  %v2610_v37 = vpack.c.bf16 %v2085_v3, %v2085_v3  ;;  %v2083_v38 = vadd.f32 %v3774_v29, %v2060_v52 }
 0x19a   : > { %v2036_v36 = vpop.f32.mrf.mxu0  ;;  %v2135_v9 = vmul.f32 %v2082_v44, %v2082_v44  ;;  %v2157_v12 = vsel %vm881_vm9, %v2133_v20, 0.0  ;;  %2254 = vst.msk [vmem:[%s3790_s16 + $0x24] sm:$0xf] %vm2244_vm0, %v2605_v21  ;;  %v2159_v25 = vsel %vm881_vm9, %v2134_v5, 0.0  ;;  %v2108_v15 = vsel %vm881_vm9, %v2082_v44, 0.0 }
 0x19b   : > { %v2086_v41 = vadd.f32 %v3774_v29, %v2063_v57  ;;  %v2061_v49 = vadd.f32 %v2036_v36, %v1935_v46  ;;  %v2107_v22 = vadd.f32 %v2106_v62, %v2105_v31  ;;  %v2158_v1 = vadd.f32 %v2157_v12, %v2156_v55  ;;  %2259 = vst.msk [vmem:[%s3790_s16 + $0x38] sm:$0xf] %vm2244_vm0, %v2610_v37 }
 0x19c   : > { %v2136_v18 = vmul.f32 %v2083_v38, %v2083_v38  ;;  %v2608_v26 = vpack.c.bf16 %v2083_v38, %v2083_v38  ;;  %v2161_v0 = vsel %vm881_vm9, %v2135_v9, 0.0  ;;  %v2110_v47 = vsel %vm881_vm9, %v2083_v38, 0.0 }
 0x19d   : > { %v2160_v50 = vadd.f32 %v2159_v25, %v2158_v1  ;;  %v2109_v40 = vadd.f32 %v2108_v15, %v2107_v22  ;;  %v2611_v45 = vpack.c.bf16 %v2086_v41, %v2086_v41  ;;  %v2084_v11 = vadd.f32 %v3774_v29, %v2061_v49 }
 0x19e   : > { %2257 = vst.msk [vmem:[%s3790_s16 + $0x30] sm:$0xf] %vm2244_vm0, %v2608_v26  ;;  %v2138_v32 = vmul.f32 %v2085_v3, %v2085_v3  ;;  %v2163_v27 = vsel %vm881_vm9, %v2136_v18, 0.0  ;;  %v2114_v6 = vsel %vm881_vm9, %v2085_v3, 0.0  ;;  %v2139_v8 = vmul.f32 %v2086_v41, %v2086_v41 }
 0x19f   : > { %v2111_v48 = vadd.f32 %v2110_v47, %v2109_v40  ;;  %v2162_v59 = vadd.f32 %v2161_v0, %v2160_v50  ;;  %2260 = vst.msk [vmem:[%s3790_s16 + $0x3c] sm:$0xf] %vm2244_vm0, %v2611_v45  ;;  %v2112_v24 = vsel %vm881_vm9, %v2084_v11, 0.0  ;;  %v2137_v34 = vmul.f32 %v2084_v11, %v2084_v11 }
 0x1a0   : > { %v2609_v61 = vpack.c.bf16 %v2084_v11, %v2084_v11  ;;  %v2167_v56 = vsel %vm881_vm9, %v2138_v32, 0.0  ;;  %v2116_v10 = vsel %vm881_vm9, %v2086_v41, 0.0  ;;  %v2169_v16 = vsel %vm881_vm9, %v2139_v8, 0.0 }
 0x1a1   : > { %v2164_v29 = vadd.f32 %v2163_v27, %v2162_v59  ;;  %v2113_v30 = vadd.f32 %v2112_v24, %v2111_v48  ;;  %v2165_v43 = vsel %vm881_vm9, %v2137_v34, 0.0 }
 0x1a2   : > { %2258 = vst.msk [vmem:[%s3790_s16 + $0x34] sm:$0xf] %vm2244_vm0, %v2609_v61 }
 0x1a3   : > { %v2115_v17 = vadd.f32 %v2114_v6, %v2113_v30  ;;  %v2166_v60 = vadd.f32 %v2165_v43, %v2164_v29 }
 0x1a5   : > { %v2117_v28 = vadd.f32 %v2116_v10, %v2115_v17  ;;  %v2168_v39 = vadd.f32 %v2167_v56, %v2166_v60 }
 0x1a7   : > { %v2118_v44 = vrot.slane %v2117_v28, 4  ;;  %v2170_v4 = vadd.f32 %v2169_v16, %v2168_v39 }
 0x1a9   : > { %v2119_v53 = vadd.f32 %v2118_v44, %v2117_v28  ;;  %v2171_v58 = vrot.slane %v2170_v4, 4 }
 0x1ab   : > { %v2120_v42 = vrot.slane %v2119_v53, 2  ;;  %v2172_v7 = vadd.f32 %v2171_v58, %v2170_v4 }
 0x1ad   : > { %v2121_v63 = vadd.f32 %v2120_v42, %v2119_v53  ;;  %v2173_v54 = vrot.slane %v2172_v7, 2 }
 0x1af   : > { %v2122_v51 = vrot.slane %v2121_v63, 1  ;;  %v2174_v23 = vadd.f32 %v2173_v54, %v2172_v7 }
 0x1b1   : > { %v2175_v19 = vrot.slane %v2174_v23, 1  ;;  %v2123_v33 = vadd.f32 %v2122_v51, %v2121_v63 }
 0x1b3   : > { %v2176_v14 = vadd.f32 %v2175_v19, %v2174_v23 }
 0x1b5   : > { %v2177_v35 = vsel %vm680_vm1, %v2123_v33, %v2176_v14 }
 0x1b6   : > { %2179 = vst.msk [vmem:[%s494_s19] sm:$0x3] %vm2178_vm8, %v2177_v35 }
 0x1b7 PF: > { %s19_s9 = sadd.s32 1, %s2992_s9   ;;  %s3970_s27 = smov %s2984_s29 }
 0x1b8   : > { %p16_p13 = scmp.ge.s32.totalorder %s19_s9, 6   ;;  %s3971_s28 = smov %s2988_s30 }
 0x1b9   : > { %s3972_s29 = smov %s3975_s10  ;;  %s3973_s30 = smov %s3979_s11 }
 0x1ba   :  { %18 = sbr.rel (!%p16_p13) target bundleno = 3 (0x3), region = 104 }

// kernel: upsample_bn_forward.3
= control target key start
LH: loop header
LB: loop body
LE: loop exit
PB: predicated region body
PF: predicated region fallthrough
CT: control target
= control target key end

     0   :  { %s6428_s13 = smov 0   ;;  %s6430_s14 = smov 0   ;;  %s8231_s0 = inlined_call_operand.vmem [shape: f32[2,10,8], index: 0, kind: input, shape index: {}]   ;;  %s8232_s1 = inlined_call_operand.vmem [shape: f32[16,8], index: 1, kind: input, shape index: {}]   ;;  %s8233_s2 = inlined_call_operand.vmem [shape: f32[2,8,8,4], index: 2, kind: input, shape index: {}]   ;;  %s8234_s3 = inlined_call_operand.vmem [shape: bf16[2,16,16,4], index: 3, kind: input, shape index: {}, may-alias: {3,4,5}]   ;;  %s8235_s4 = inlined_call_operand.vmem [shape: bf16[2,16,16,4], index: 4, kind: input, shape index: {}, may-alias: {3,4,5}]   ;;  %s8236_s5 = inlined_call_operand.vmem [shape: bf16[2,16,16,4], index: 5, kind: input, shape index: {}, may-alias: {3,4,5}]   ;;  %s8237_s6 = inlined_call_operand.vmem [shape: bf16[3,3,4,8], index: 6, kind: input, shape index: {}]   ;;  %s8238_s7 = inlined_call_operand.vmem [shape: bf16[3,3,4,8], index: 7, kind: input, shape index: {}]   ;;  %s8239_s8 = inlined_call_operand.vmem [shape: f32[1,8], index: 8, kind: input, shape index: {}]   ;;  %s8240_s9 = inlined_call_operand.vmem [shape: bf16[2,16,16,8], index: 9, kind: output, shape index: {0}]   ;;  %s8241_s10 = inlined_call_operand.vmem [shape: f32[2,2,2,8], index: 10, kind: output, shape index: {1}]  }
   0x1   :  { %8270 = sst [smem:[#allocation26_spill]] %s8231_s0  ;;  %s6432_s15 = smov 0  }
   0x2   :  { %8271 = sst [smem:[#allocation27_spill]] %s8232_s1  ;;  %s6434_s16 = smov 0  }
   0x3   :  { %8272 = sst [smem:[#allocation28_spill]] %s8233_s2  ;;  %s6436_s17 = smov 0  }
   0x4 LB: > { %s30_s18 = sadd.s32 1, %s6342_s15  ;;  %s33_s19 = sadd.s32 1, %s6346_s16  ;;  %s6350_s17 = sphi %s6436_s17, %s21_s17   ;;  %s6346_s16 = sphi %s6434_s16, %s8362_s16   ;;  %s6342_s15 = sphi %s6432_s15, %s8361_s15   ;;  %s6338_s14 = sphi %s6430_s14, %s8360_s14   ;;  %s6334_s13 = sphi %s6428_s13, %s8359_s13  }
   0x5   : > { %p31_p0 = scmp.ge.s32.totalorder %s30_s18, 2  ;;  %p5411_p1 = scmp.ge.s32.totalorder %s6350_s17, 1 }
   0x6   : > { %p423_p2 = scmp.lt.s32.totalorder %s6350_s17, 5 }
   0x7   : > { %s8364_s18 = smov (%p31_p0, %s30_s18), 0  ;;  %s8366_s19 = smov (!%p31_p0, %s33_s19), %s6346_s16 }
   0x8   : > { %p424_p3 = pnand %p5411_p1, %p423_p2  ;;  %p35_p4 = scmp.ge.s32.totalorder %s8366_s19, 2 }
   0xa   : > { %s8368_s19 = smov (%p35_p4, %s8366_s19), 0  ;;  %427 = sbr.rel (%p424_p3) target bundleno = 1510 (0x5e6), region = 56 }
   0xb   : > { %8273 = sst [smem:[#allocation2_spill]] %s8368_s19 }
   0xf   : > { %p520_p5 = scmp.lt.s32.totalorder %s6338_s14, 1  ;;  %v605_v0 = vlaneseq  ;;  %v6352_v1 = vmov 1983009808   ;;  %v6353_v5 = vmov 1934713408   ;;  %s8274_s2 = sld [smem:[#allocation28_spill]] }
  0x10   : > { %v603_v2 = vunpack.c.l.s4 %v6352_v1  ;;  %v667_v6 = vunpack.c.l.s4 %v6353_v5  ;;  %p515_p6 = scmp.lt.s32.totalorder %s6334_s13, 1  ;;  %s8275_s0 = sld [smem:[#allocation26_spill]]  ;;  %vm766_vm0 = vcmask 64512   ;;  %vm764_vm1 = vcmask 31744  }
  0x11   : > { %s8370_s14 = smov (!%p520_p5, %s6338_s14), 1  ;;  %v606_v3 = vshrl.u32 %v605_v0, 7  ;;  %s6354_s29 = smov 4   ;;  %vm768_vm2 = vcmask 97280   ;;  %vm770_vm3 = vcmask 130048   ;;  %vm772_vm4 = vcmask 162816  }
  0x12   : > { %v604_v4 = vunpack.c.0.s8 %v603_v2  ;;  %s5651_s20 = sshll.u32 %s8370_s14, 6  ;;  %v668_v8 = vunpack.c.0.s8 %v667_v6  ;;  %s6355_s30 = smov 12   ;;  %vm774_vm5 = vcmask 195584   ;;  %vm776_vm6 = vcmask 228352  }
  0x13   : > { %s6485_s24 = scalar_select %p515_p6, %s6334_s13, 1  ;;  %vm1134_vm7 = vcmask 261120   ;;  %vm1136_vm8 = vcmask 293888   ;;  %vm2425_vm9 = vcmask 1041408   ;;  %vm2128_vm10 = vcmask 1040384  }
  0x14   : > { %v6466_v7 = vsub.s32 %v604_v4, %v606_v3  ;;  %v6470_v19 = vsub.s32 %v668_v8, %v606_v3  ;;  %s6356_s11 = smov 8   ;;  %s6357_s12 = smov 16   ;;  %vm2650_vm11 = vsmask.f32 7424  ;;  %vm3127_vm12 = vcmask 1046528  }
  0x15   : > { %s524_s23 = scalar_lea.vmem %s8274_s2, %s5651_s20  ;;  %s5650_s25 = sshll.u32 %s6485_s24, 4  ;;  %vm5172_vm13 = vcmask 60416   ;;  %vm5106_vm14 = vcmask 58368  }
  0x16   : > { %v6300_v9 = vld [vmem:[%s524_s23] ss:$16 sps:$4 sm:$0xff]   ;;  %v6302_v10 = vld [vmem:[%s524_s23 + $0x4] ss:$16 sps:$4 sm:$0xff]   ;;  %v6303_v11 = vld [vmem:[%s524_s23 + $0x8] ss:$16 sps:$4 sm:$0xff]   ;;  %s6493_s28 = scalar_lea.vmem %s8275_s0, %s5650_s25 }
  0x17   : > { %v6305_v12 = vld [vmem:[%s524_s23 + $0xc] ss:$16 sps:$4 sm:$0xff]   ;;  %v608_v13 = vrot.slane %v6300_v9, %v6466_v7  ;;  %v6306_v14 = vld [vmem:[%s524_s23 + $0x20] ss:$16 sps:$4 sm:$0xff]   ;;  %v6308_v15 = vld [vmem:[%s524_s23 + $0x24] ss:$16 sps:$4 sm:$0xff]   ;;  %v624_v17 = vrot.slane %v6303_v11, %v6466_v7  ;;  %v615_v20 = vrot.slane %v6302_v10, %v6466_v7 }
  0x18   : > { %v6309_v16 = vld [vmem:[%s524_s23 + $0x28] ss:$16 sps:$4 sm:$0xff]   ;;  %v6311_v18 = vld [vmem:[%s524_s23 + $0x2c] ss:$16 sps:$4 sm:$0xff]   ;;  %v631_v21 = vrot.slane %v6305_v12, %v6466_v7  ;;  %v640_v22 = vrot.slane %v6306_v14, %v6466_v7  ;;  %v647_v24 = vrot.slane %v6308_v15, %v6466_v7  ;;  %v590_v47 = vld [vmem:[%s6493_s28] sm:$0xff]  ;;  %s8244_s20 = smov 20  }
  0x19   : > { %v656_v23 = vrot.slane %v6309_v16, %v6466_v7  ;;  %v664_v25 = vcombine.low %v608_v13, %v624_v17  ;;  %v665_v26 = vcombine.high %v608_v13, %v624_v17  ;;  %v663_v27 = vrot.slane %v6311_v18, %v6466_v7  ;;  %5889 = vmatprep.mubr.msk.f32.mxu0 %vm766_vm0, %v590_v47  ;;  %s6359_s21 = smov 24   ;;  %s8242_s22 = smov 28   ;;  %v591_v1 = vld [vmem:[%s6493_s28 + $0x8] sm:$0x3] }
  0x1a   : > { %v680_v28 = vcombine.low %v615_v20, %v631_v21  ;;  %v681_v34 = vcombine.high %v615_v20, %v631_v21  ;;  %s8256_s23 = smov 120   ;;  %s8258_s25 = smov 124  }
  0x1b   : > { %v696_v29 = vcombine.low %v640_v22, %v656_v23  ;;  %v697_v30 = vcombine.high %v640_v22, %v656_v23  ;;  %v672_v31 = vrot.slane %v664_v25, %v6470_v19  ;;  %v679_v32 = vrot.slane %v665_v26, %v6470_v19  ;;  %s8254_s26 = smov 116   ;;  %s8252_s27 = smov 112  }
  0x1c   : > { %v712_v33 = vcombine.low %v647_v24, %v663_v27  ;;  %v688_v37 = vrot.slane %v680_v28, %v6470_v19  ;;  %v713_v38 = vcombine.high %v647_v24, %v663_v27  ;;  %v695_v43 = vrot.slane %v681_v34, %v6470_v19  ;;  %s8250_s28 = smov 108   ;;  %s8276_s1 = sld [smem:[#allocation27_spill]] }
  0x1d   : > { %v704_v35 = vrot.slane %v696_v29, %v6470_v19  ;;  %v711_v36 = vrot.slane %v697_v30, %v6470_v19  ;;  %p2229_p10 = scmp.eq.s32.totalorder %s6334_s13, 0  ;;  %s8281_s2 = smov 116  }
  0x1e   : > { %v720_v39 = vrot.slane %v712_v33, %v6470_v19  ;;  %v727_v46 = vrot.slane %v713_v38, %v6470_v19  ;;  %s8282_s19 = smov 112   ;;  %p2231_p12 = scmp.eq.s32.totalorder %s6334_s13, 1 }
  0x1f   : > { %v729_v40 = vcombine.high %v672_v31, %v704_v35  ;;  %v728_v41 = vcombine.low %v672_v31, %v704_v35  ;;  %v731_v42 = vcombine.high %v679_v32, %v711_v36  ;;  %v730_v44 = vcombine.low %v679_v32, %v711_v36 }
  0x20   : > { %v732_v45 = vcombine.low %v688_v37, %v720_v39  ;;  %v733_v48 = vcombine.high %v688_v37, %v720_v39  ;;  %v734_v49 = vcombine.low %v695_v43, %v727_v46  ;;  %v735_v50 = vcombine.high %v695_v43, %v727_v46 }
  0x21   : > { %737 = vrot.lane.b32.xlu0 %v729_v40, %s6354_s29  ;;  %745 = vrot.lane.b32.xlu1 %v731_v42, %s6355_s30 }
  0x25   : > { %741 = vrot.lane.b32.xlu0 %v730_v44, %s6356_s11  ;;  %749 = vrot.lane.b32.xlu1 %v732_v45, %s6357_s12 }
  0x29   : > { %753 = vrot.lane.b32.xlu0 %v733_v48, %s8244_s20  ;;  %757 = vrot.lane.b32.xlu1 %v734_v49, %s6359_s21  ;;  %s8246_s20 = smov 100  }
  0x2d   : > { %761 = vrot.lane.b32.xlu0 %v735_v50, %s8242_s22  ;;  %s8248_s22 = smov 104  }
  0x93   : > { %v738_v51 = vpop.permute.xlu0 %737  ;;  %v746_v52 = vpop.permute.xlu1 %745 }
  0x94   : > { %v765_v53 = vsel %vm764_vm1, %v728_v41, %v738_v51 }
  0x97   : > { %v742_v54 = vpop.permute.xlu0 %741  ;;  %v750_v55 = vpop.permute.xlu1 %749 }
  0x98   : > { %v767_v56 = vsel %vm766_vm0, %v765_v53, %v742_v54 }
  0x99   : > { %v769_v57 = vsel %vm768_vm2, %v767_v56, %v746_v52 }
  0x9a   : > { %v771_v58 = vsel %vm770_vm3, %v769_v57, %v750_v55 }
  0x9b   : > { %v754_v59 = vpop.permute.xlu0 %753  ;;  %v758_v61 = vpop.permute.xlu1 %757 }
  0x9c   : > { %v773_v60 = vsel %vm772_vm4, %v771_v58, %v754_v59 }
  0x9d   : > { %v775_v62 = vsel %vm774_vm5, %v773_v60, %v758_v61 }
  0x9f   : > { %v762_v63 = vpop.permute.xlu0 %761 }
  0xa0   : > { %v777_v0 = vsel %vm776_vm6, %v775_v62, %v762_v63 }
  0xa1   : > { %5887 = vmatprep.subr.mxu0 %v777_v0 }
  0xa2   : > { %5888 = vmatpush3.msra.mxu0 %v777_v0 }
  0xa3   : > { %5890 = vmatmul.mubr.msk.f32.vlgmr.msra.gmra.mxu0 %vm766_vm0, %v591_v1 }
 0x163   : > { %v6514_v2 = vpop.f32.mrf.mxu0 }
 0x164   : > { %869 = vrot.lane.b32.xlu1 %v6514_v2, %s8256_s23  ;;  %863 = vrot.lane.b32.xlu0 %v6514_v2, %s8258_s25 }
 0x165   : > { %v850_v3 = vpop.f32.mrf.mxu0 }
 0x168   : > { %875 = vrot.lane.b32.xlu0 %v6514_v2, %s8254_s26  ;;  %861 = vrot.lane.b32.xlu1 %v850_v3, %s8258_s25 }
 0x16c   : > { %867 = vrot.lane.b32.xlu0 %v850_v3, %s8256_s23  ;;  %873 = vrot.lane.b32.xlu1 %v850_v3, %s8254_s26  ;;  %s8283_s23 = smov 108  }
 0x170   : > { %879 = vrot.lane.b32.xlu0 %v850_v3, %s8252_s27  ;;  %885 = vrot.lane.b32.xlu1 %v850_v3, %s8250_s28 }
 0x174   : > { %891 = vrot.lane.b32.xlu0 %v850_v3, %s8248_s22  ;;  %897 = vrot.lane.b32.xlu1 %v850_v3, %s8246_s20 }
 0x178   : > { %887 = vrot.lane.b32.xlu0 %v6514_v2, %s8250_s28  ;;  %881 = vrot.lane.b32.xlu1 %v6514_v2, %s8252_s27  ;;  %s8277_s28 = smov 20   ;;  %s6370_s27 = smov 36  }
 0x17c   : > { %899 = vrot.lane.b32.xlu0 %v6514_v2, %s8246_s20  ;;  %893 = vrot.lane.b32.xlu1 %v6514_v2, %s8248_s22  ;;  %s8278_s20 = smov 28   ;;  %s6369_s22 = smov 32  }
 0x1d6   : > { %v870_v4 = vpop.permute.xlu1 %869  ;;  %v864_v5 = vpop.permute.xlu0 %863 }
 0x1d7   : > { %v1041_v45 = vcombine.low %v6514_v2, %v870_v4 }
 0x1d9   : > { %v1048_v59 = vrot.slane %v1041_v45, %v6466_v7 }
 0x1da   : > { %v876_v6 = vpop.permute.xlu0 %875  ;;  %v862_v8 = vpop.permute.xlu1 %861 }
 0x1db   : > { %v1049_v39 = vcombine.low %v864_v5, %v876_v6 }
 0x1dd   : > { %v1056_v54 = vrot.slane %v1049_v39, %v6466_v7 }
 0x1de   : > { %v868_v9 = vpop.permute.xlu0 %867  ;;  %v874_v10 = vpop.permute.xlu1 %873 }
 0x1df   : > { %v905_v11 = vcombine.low %v850_v3, %v868_v9  ;;  %v921_v12 = vcombine.low %v862_v8, %v874_v10  ;;  %v906_v15 = vcombine.high %v850_v3, %v868_v9  ;;  %v922_v17 = vcombine.high %v862_v8, %v874_v10  ;;  %v903_v3 = vld [vmem:[%s8276_s1] sm:$0xff] }
 0x1e0   : > { %v1073_v1 = vcombine.low %v1048_v59, %v1056_v54  ;;  %5894 = vmatprep.mubr.msk.f32.mxu1 %vm766_vm0, %v903_v3  ;;  %v6368_v8 = vmov 0.0  }
 0x1e1   : > { %v913_v16 = vrot.slane %v905_v11, %v6466_v7  ;;  %v929_v18 = vrot.slane %v921_v12, %v6466_v7  ;;  %v920_v26 = vrot.slane %v906_v15, %v6466_v7  ;;  %v936_v27 = vrot.slane %v922_v17, %v6466_v7 }
 0x1e2   : > { %v880_v13 = vpop.permute.xlu0 %879  ;;  %v886_v14 = vpop.permute.xlu1 %885  ;;  %v1138_v9 = vcombine.low %v6368_v8, %v6368_v8  ;;  %v1080_v10 = vrot.slane %v1073_v1, %v6470_v19 }
 0x1e3   : > { %v969_v28 = vcombine.low %v913_v16, %v929_v18  ;;  %v970_v29 = vcombine.high %v913_v16, %v929_v18  ;;  %v985_v40 = vcombine.low %v920_v26, %v936_v27  ;;  %v986_v55 = vcombine.high %v920_v26, %v936_v27 }
 0x1e4   : > { %v1145_v11 = vrot.slane %v1138_v9, %v6466_v7 }
 0x1e5   : > { %v984_v41 = vrot.slane %v970_v29, %v6470_v19  ;;  %v6548_v43 = vrot.slane %v969_v28, %v6470_v19  ;;  %v993_v58 = vrot.slane %v985_v40, %v6470_v19  ;;  %v1000_v2 = vrot.slane %v986_v55, %v6470_v19 }
 0x1e6   : > { %v892_v20 = vpop.permute.xlu0 %891  ;;  %v898_v21 = vpop.permute.xlu1 %897 }
 0x1e7   : > { %v937_v22 = vcombine.low %v880_v13, %v892_v20  ;;  %v938_v23 = vcombine.high %v880_v13, %v892_v20  ;;  %v953_v24 = vcombine.low %v886_v14, %v898_v21  ;;  %v954_v25 = vcombine.high %v886_v14, %v898_v21 }
 0x1e8   : > { %v1146_v14 = vcombine.low %v1145_v11, %v1145_v11 }
 0x1e9   : > { %v945_v30 = vrot.slane %v937_v22, %v6466_v7  ;;  %v952_v31 = vrot.slane %v938_v23, %v6466_v7  ;;  %v961_v32 = vrot.slane %v953_v24, %v6466_v7  ;;  %v968_v33 = vrot.slane %v954_v25, %v6466_v7 }
 0x1ea   : > { %v888_v34 = vpop.permute.xlu0 %887  ;;  %v882_v35 = vpop.permute.xlu1 %881  ;;  %v1153_v15 = vrot.slane %v1146_v14, %v6470_v19 }
 0x1eb   : > { %v1001_v36 = vcombine.low %v945_v30, %v961_v32  ;;  %v1002_v37 = vcombine.high %v945_v30, %v961_v32  ;;  %v1017_v38 = vcombine.low %v952_v31, %v968_v33  ;;  %v1018_v46 = vcombine.high %v952_v31, %v968_v33 }
 0x1ec   : > { %v1155_v17 = vcombine.high %v1153_v15, %v1153_v15  ;;  %v1154_v18 = vcombine.low %v1153_v15, %v1153_v15 }
 0x1ed   : > { %v1016_v42 = vrot.slane %v1002_v37, %v6470_v19  ;;  %v6551_v44 = vrot.slane %v1001_v36, %v6470_v19  ;;  %v1025_v49 = vrot.slane %v1017_v38, %v6470_v19  ;;  %v1032_v0 = vrot.slane %v1018_v46, %v6470_v19  ;;  %v904_v38 = vld [vmem:[%s8276_s1 + $0x8] sm:$0xff]  ;;  %s8280_s1 = smov 120  }
 0x1ee   : > { %v900_v47 = vpop.permute.xlu0 %899  ;;  %v894_v48 = vpop.permute.xlu1 %893 }
 0x1ef   : > { %v1065_v50 = vcombine.low %v888_v34, %v900_v47  ;;  %v1057_v51 = vcombine.low %v882_v35, %v894_v48  ;;  %v1035_v52 = vcombine.low %v984_v41, %v1016_v42  ;;  %v1034_v53 = vcombine.high %v6548_v43, %v6551_v44 }
 0x1f0   : > { %v1033_v60 = vcombine.low %v6548_v43, %v6551_v44  ;;  %v1037_v62 = vcombine.low %v993_v58, %v1025_v49  ;;  %v1036_v63 = vcombine.high %v984_v41, %v1016_v42  ;;  %v1039_v4 = vcombine.low %v1000_v2, %v1032_v0 }
 0x1f1   : > { %v1072_v56 = vrot.slane %v1065_v50, %v6466_v7  ;;  %v1064_v57 = vrot.slane %v1057_v51, %v6466_v7  ;;  %1096 = vrot.lane.b32.xlu0 %v1035_v52, %s6356_s11  ;;  %1092 = vrot.lane.b32.xlu1 %v1034_v53, %s6354_s29  ;;  %v1038_v5 = vcombine.high %v993_v58, %v1025_v49 }
 0x1f2   : > { %v1040_v12 = vcombine.high %v1000_v2, %v1032_v0 }
 0x1f3   : > { %v1081_v61 = vcombine.low %v1064_v57, %v1072_v56 }
 0x1f5   : > { %1104 = vrot.lane.b32.xlu0 %v1037_v62, %s6357_s12  ;;  %1100 = vrot.lane.b32.xlu1 %v1036_v63, %s6355_s30  ;;  %v1088_v6 = vrot.slane %v1081_v61, %v6470_v19  ;;  %v2400_v61 = vld [vmem:[%s8238_s7] sm:$0x3] }
 0x1f6   : > { %6221 = vmatprep.subr.msk.bf16.mxu0 %vm2425_vm9, %v2400_v61  ;;  %v2427_v3 = vsel %vm2425_vm9, %v2400_v61, 0 }
 0x1f7   : > { %v1089_v13 = vcombine.low %v1080_v10, %v1088_v6  ;;  %v1090_v16 = vcombine.high %v1080_v10, %v1088_v6  ;;  %5898 = vmatpush3.bf16.msra.mxu0 %v2427_v3 }
 0x1f9   : > { %1112 = vrot.lane.b32.xlu0 %v1039_v4, %s6359_s21  ;;  %1108 = vrot.lane.b32.xlu1 %v1038_v5, %s8277_s28 }
 0x1fd   : > { %1116 = vrot.lane.b32.xlu1 %v1040_v12, %s8278_s20  ;;  %1120 = vrot.lane.b32.xlu0 %v1089_v13, %s6369_s22 }
 0x201   : > { %1124 = vrot.lane.b32.xlu1 %v1090_v16, %s6370_s27  ;;  %1157 = vrot.lane.b32.xlu0 %v1155_v17, %s6354_s29 }
 0x205   : > { %1161 = vrot.lane.b32.xlu1 %v6368_v8, %s6356_s11  ;;  %1164 = vrot.lane.b32.xlu0 %v6368_v8, %s6355_s30  ;;  %s6619_s11 = sshll.u32 %s6334_s13, 3 }
 0x206   : > { %p528_p9 = scmp.lt.s32.totalorder %s6619_s11, 15  ;;  %s5655_s25 = sadd.s32 8, %s6619_s11 }
 0x207   : > { %p7616_p11 = scmp.lt.s32.totalorder %s5655_s25, 15 }
 0x208   : > { %s2232_s13 = scalar_select %p2231_p12, 0.0, 1.0 }
 0x209   : > { %1167 = vrot.lane.b32.xlu1 %v6368_v8, %s6357_s12  ;;  %1170 = vrot.lane.b32.xlu0 %v6368_v8, %s8277_s28  ;;  %s5421_s12 = sadd.s32 4294967295, %s6619_s11  ;;  %s8374_s25 = smov (!%p7616_p11, %s5655_s25), 15 }
 0x20a   : > { %p538_p7 = scmp.gt.s32.totalorder %s5421_s12, 0  ;;  %p5422_p8 = scmp.lt.s32.totalorder %s5421_s12, 15 }
 0x20b   : > { %s529_s28 = scalar_select %p528_p9, %s6619_s11, 15 }
 0x20c   : > { %s8376_s25 = smov (!%p7616_p11, %s8374_s25), 15 }
 0x20d   : > { %1173 = vrot.lane.b32.xlu1 %v6368_v8, %s6359_s21  ;;  %1176 = vrot.lane.b32.xlu0 %v6368_v8, %s8278_s20  ;;  %s539_s21 = scalar_select %p538_p7, %s5421_s12, 0 }
 0x20e   : > { %s5417_s20 = sshll.u32 %s529_s28, 1  ;;  %s5434_s11 = sshll.u32 %s8376_s25, 1 }
 0x20f   : > { %s8372_s21 = smov (!%p5422_p8, %s539_s21), 15 }
 0x210   : > { %s5427_s29 = sshll.u32 %s8372_s21, 1  ;;  %s6372_s21 = smov 92  }
 0x211   : > { %1180 = vrot.lane.b32.xlu1 %v1154_v18, %s6369_s22  ;;  %1183 = vrot.lane.b32.xlu0 %v1155_v17, %s6370_s27  ;;  %s6624_s27 = sshll.u32 %s8370_s14, 5 }
 0x212   : > { %s6629_s22 = sadd.s32 %s6624_s27, %s5417_s20  ;;  %s546_s26 = sadd.s32 %s5427_s29, %s6624_s27 }
 0x213   : > { %s5419_s30 = sshll.u32 %s6629_s22, 2  ;;  %s5429_s0 = sshll.u32 %s546_s26, 2 }
 0x214   : > { %s6638_s12 = scalar_lea.vmem %s8234_s3, %s5419_s30  ;;  %s548_s28 = scalar_lea.vmem %s8235_s4, %s5429_s0 }
 0x215   : > { %v5677_v57 = vld [vmem:[%s6638_s12] sm:$0xff]   ;;  %s2230_s20 = scalar_select %p2229_p10, 0.0, 1.0  ;;  %v5712_v15 = vld [vmem:[%s6638_s12 + $0x8] sm:$0xff]  }
 0x216   : > { %v5673_v58 = vld [vmem:[%s548_s28] sm:$0xff]   ;;  %v5678_v59 = vunpack.c.l.bf16 %v5677_v57  ;;  %s8279_s0 = smov 124   ;;  %s8284_s29 = smov 104  }
 0x217   : > { %v5674_v62 = vunpack.c.l.bf16 %v5673_v58  ;;  %v5675_v63 = vunpack.c.h.bf16 %v5673_v58  ;;  %v2237_v0 = vstv %s2230_s20  ;;  %s8285_s28 = smov 100   ;;  %s6371_s20 = smov 96  }
 0x218   : > { %v2302_v1 = vrot.slane %v5678_v59, 7  ;;  %s5441_s22 = sshll.u32 %s8370_s14, 1 }
 0x219   : > { %v2238_v4 = vmul.f32 %v5674_v62, %v2237_v0  ;;  %v6651_v5 = vmul.f32 %v5675_v63, %v2237_v0 }
 0x21a   : > { %v2360_v9 = vsel %vm2128_vm10, 0.0, %v2302_v1 }
 0x21b   : > { %v2299_v11 = vrot.slane %v2238_v4, 7  ;;  %v2300_v12 = vrot.slane %v6651_v5, 7 }
 0x21d   : > { %v2301_v17 = vsel %vm2128_vm10, %v2299_v11, %v2300_v12 }
 0x263   : > { %v1097_v20 = vpop.permute.xlu0 %1096  ;;  %v1093_v21 = vpop.permute.xlu1 %1092 }
 0x264   : > { %v1127_v22 = vsel %vm764_vm1, %v1033_v60, %v1093_v21  ;;  %v5679_v60 = vunpack.c.h.bf16 %v5677_v57  ;;  %v5683_v21 = vunpack.c.h.bf16 %v5712_v15  ;;  %v5717_v57 = vld [vmem:[%s6638_s12 + $0x30] sm:$0xff]  }
 0x265   : > { %v1128_v24 = vsel %vm766_vm0, %v1127_v22, %v1097_v20  ;;  %v5682_v20 = vunpack.c.l.bf16 %v5712_v15  ;;  %v5713_v22 = vld [vmem:[%s6638_s12 + $0x10] sm:$0xff]   ;;  %v5702_v58 = vunpack.c.l.bf16 %v5717_v57  ;;  %v5703_v59 = vunpack.c.h.bf16 %v5717_v57 }
 0x266   : > { %v6648_v2 = vrot.slane %v5679_v60, 7 }
 0x267   : > { %v1105_v23 = vpop.permute.xlu0 %1104  ;;  %v1101_v25 = vpop.permute.xlu1 %1100  ;;  %v2320_v62 = vrot.slane %v5702_v58, 7  ;;  %v6751_v63 = vrot.slane %v5703_v59, 7 }
 0x268   : > { %v1129_v26 = vsel %vm768_vm2, %v1128_v24, %v1101_v25  ;;  %v2304_v6 = vsel %vm2128_vm10, %v2302_v1, %v6648_v2  ;;  %v5686_v25 = vunpack.c.l.bf16 %v5713_v22 }
 0x269   : > { %v1130_v28 = vsel %vm770_vm3, %v1129_v26, %v1105_v23  ;;  %v6659_v14 = vpack.c.bf16 %v2304_v6, %v2360_v9  ;;  %v5687_v26 = vunpack.c.h.bf16 %v5713_v22  ;;  %v2322_v6 = vsel %vm2128_vm10, %v2320_v62, %v6751_v63 }
 0x26a   : > { %v2366_v9 = vsel %vm2128_vm10, 0.0, %v2320_v62 }
 0x26b   : > { %v1113_v27 = vpop.permute.xlu0 %1112  ;;  %v1109_v29 = vpop.permute.xlu1 %1108 }
 0x26c   : > { %v1131_v30 = vsel %vm772_vm4, %v1130_v28, %v1109_v29  ;;  %v6673_v28 = vrot.slane %v5683_v21, 7  ;;  %v2308_v29 = vrot.slane %v5686_v25, 7 }
 0x26d   : > { %v1132_v31 = vsel %vm774_vm5, %v1131_v30, %v1113_v27  ;;  %v2305_v27 = vrot.slane %v5682_v20, 7  ;;  %v6679_v30 = vrot.slane %v5687_v26, 7 }
 0x26f   : > { %v1117_v32 = vpop.permute.xlu1 %1116  ;;  %v1121_v33 = vpop.permute.xlu0 %1120 }
 0x270   : > { %v1133_v34 = vsel %vm776_vm6, %v1132_v31, %v1117_v32  ;;  %v2307_v31 = vsel %vm2128_vm10, %v2305_v27, %v6673_v28  ;;  %v2361_v32 = vsel %vm2128_vm10, 0.0, %v2305_v27  ;;  %v2369_v27 = vsel %vm2128_vm10, %v2300_v12, 0.0 }
 0x271   : > { %v1135_v36 = vsel %vm1134_vm7, %v1133_v34, %v1121_v33  ;;  %v6688_v33 = vpack.c.bf16 %v2307_v31, %v2361_v32  ;;  %v2310_v34 = vsel %vm2128_vm10, %v2308_v29, %v6679_v30 }
 0x273   : > { %v1125_v35 = vpop.permute.xlu1 %1124  ;;  %v1158_v39 = vpop.permute.xlu0 %1157 }
 0x274   : > { %v1137_v37 = vsel %vm1136_vm8, %v1135_v36, %v1125_v35  ;;  %v1186_v40 = vsel %vm764_vm1, %v1154_v18, %v1158_v39  ;;  %v2359_v18 = vsel %vm2128_vm10, 0.0, %v2299_v11  ;;  %v2362_v35 = vsel %vm2128_vm10, 0.0, %v2308_v29  ;;  %v5714_v36 = vld [vmem:[%s6638_s12 + $0x18] sm:$0xff]  }
 0x275   : > { %5892 = vmatprep.subr.mxu1 %v1137_v37  ;;  %v6671_v24 = vpack.c.bf16 %v2301_v17, %v2359_v18  ;;  %v5691_v39 = vunpack.c.h.bf16 %v5714_v36  ;;  %v6767_v11 = vpack.c.bf16 %v2322_v6, %v2366_v9  ;;  %v5501_v17 = vld [vmem:[%s8237_s6 + $0x4] sm:$0x3]  ;;  %v2370_v29 = vsel %vm2128_vm10, %v6648_v2, 0.0 }
 0x276   : > { %5893 = vmatpush3.msra.mxu1 %v1137_v37  ;;  %v6698_v37 = vpack.c.bf16 %v2310_v34, %v2362_v35  ;;  %v6794_v34 = vsel %vm2425_vm9, %v5501_v17, 0  ;;  %v6800_v5 = vpack.c.bf16 %v2370_v29, %v2370_v29 }
 0x277   : > { %5895 = vmatmul.mubr.msk.f32.vlgmr.msra.gmra.mxu1 %vm766_vm0, %v904_v38  ;;  %v1162_v41 = vpop.permute.xlu1 %1161  ;;  %v1165_v43 = vpop.permute.xlu0 %1164  ;;  %5899 = vmatprep.mubr.msk.bf16.mxu0 %vm764_vm1, %v6671_v24  ;;  %v5690_v38 = vunpack.c.l.bf16 %v5714_v36  ;;  %v2739_v35 = vshrl.u32 %v6671_v24, 16  ;;  %v2741_v36 = vshll.u32 %v6671_v24, 16 }
 0x278   : > { %v1187_v42 = vsel %vm766_vm0, %v1186_v40, %v1162_v41  ;;  %5900 = vmatmul.mubr.msk.bf16.vlgmr.msra.gmra.mxu0 %vm764_vm1, %v6659_v14  ;;  %v5715_v40 = vld [vmem:[%s6638_s12 + $0x20] sm:$0xff]  }
 0x279   : > { %v1188_v44 = vsel %vm768_vm2, %v1187_v42, %v1165_v43  ;;  %5903 = vmatprep.mubr.msk.bf16.mxu0 %vm764_vm1, %v6688_v33  ;;  %v5694_v41 = vunpack.c.l.bf16 %v5715_v40  ;;  %v5695_v42 = vunpack.c.h.bf16 %v5715_v40  ;;  %v2311_v43 = vrot.slane %v5690_v38, 7 }
 0x27b   : > { %v1168_v45 = vpop.permute.xlu1 %1167  ;;  %v1171_v47 = vpop.permute.xlu0 %1170 }
 0x27c   : > { %v1189_v46 = vsel %vm770_vm3, %v1188_v44, %v1168_v45  ;;  %v6703_v44 = vrot.slane %v5691_v39, 7  ;;  %v2314_v45 = vrot.slane %v5694_v41, 7  ;;  %v6798_v39 = vpack.c.bf16 %v2369_v27, %v2369_v27 }
 0x27d   : > { %v1190_v48 = vsel %vm772_vm4, %v1189_v46, %v1171_v47  ;;  %v6707_v46 = vrot.slane %v5695_v42, 7 }
 0x27e   : > { %v2313_v47 = vsel %vm2128_vm10, %v2311_v43, %v6703_v44 }
 0x27f   : > { %v1174_v49 = vpop.permute.xlu1 %1173  ;;  %v1177_v51 = vpop.permute.xlu0 %1176 }
 0x280   : > { %v1191_v50 = vsel %vm774_vm5, %v1190_v48, %v1174_v49  ;;  %5904 = vmatmul.mubr.msk.bf16.gmra.mxu0 %vm764_vm1, %v6698_v37  ;;  %v2363_v48 = vsel %vm2128_vm10, 0.0, %v2311_v43 }
 0x281   : > { %v1192_v52 = vsel %vm776_vm6, %v1191_v50, %v1177_v51  ;;  %v6716_v49 = vpack.c.bf16 %v2313_v47, %v2363_v48  ;;  %v2316_v50 = vsel %vm2128_vm10, %v2314_v45, %v6707_v46  ;;  %v2364_v51 = vsel %vm2128_vm10, 0.0, %v2314_v45 }
 0x283   : > { %v1181_v53 = vpop.permute.xlu1 %1180  ;;  %v1184_v55 = vpop.permute.xlu0 %1183  ;;  %5907 = vmatprep.mubr.msk.bf16.mxu0 %vm764_vm1, %v6716_v49 }
 0x284   : > { %v1193_v54 = vsel %vm1134_vm7, %v1192_v52, %v1181_v53  ;;  %v6725_v52 = vpack.c.bf16 %v2316_v50, %v2364_v51  ;;  %v2399_v53 = vld [vmem:[%s8237_s6] sm:$0x3]  ;;  %v2743_v51 = vrot.slane %v2741_v36, 1 }
 0x285   : > { %v1194_v56 = vsel %vm1136_vm8, %v1193_v54, %v1184_v55  ;;  %6222 = vmatprep.subr.msk.bf16.mxu1 %vm2425_vm9, %v2399_v53  ;;  %v5716_v54 = vld [vmem:[%s6638_s12 + $0x28] sm:$0xff]   ;;  %v2551_v3 = vsel %vm2425_vm9, %v2399_v53, 0 }
 0x286   : > { %v5698_v55 = vunpack.c.l.bf16 %v5716_v54  ;;  %5916 = vmatpush3.bf16.msra.mxu1 %v2551_v3 }
 0x288   : > { %5908 = vmatmul.mubr.msk.bf16.gmra.mxu0 %vm764_vm1, %v6725_v52  ;;  %v2317_v60 = vrot.slane %v5698_v55, 7  ;;  %v2371_v55 = vsel %vm2128_vm10, %v6673_v28, 0.0 }
 0x28a   : > { %v2365_v1 = vsel %vm2128_vm10, 0.0, %v2317_v60 }
 0x337   : > { %v5896_v10 = vpop.f32.mrf.mxu1 }
 0x338   : > { %v6657_v13 = vadd.f32 %v5896_v10, %v1194_v56  ;;  %v5483_v10 = vld [vmem:[%s8237_s6 + $0x2] sm:$0x3] }
 0x339   : > { %v1267_v16 = vpop.f32.mrf.mxu1  ;;  %6223 = vmatprep.subr.msk.bf16.mxu0 %vm2425_vm9, %v5483_v10  ;;  %v2854_v15 = vsel %vm2425_vm9, %v5483_v10, 0 }
 0x33a   : > { %v6667_v23 = vadd.f32 %v1267_v16, %v1194_v56  ;;  %1280 = vrot.lane.b32.xlu0 %v6657_v13, %s8279_s0  ;;  %v5699_v56 = vunpack.c.h.bf16 %v5716_v54  ;;  %5934 = vmatpush3.bf16.msra.mxu0 %v2854_v15  ;;  %v5492_v16 = vld [vmem:[%s8238_s7 + $0x2] sm:$0x3] }
 0x33b   : > { %6224 = vmatprep.subr.msk.bf16.mxu1 %vm2425_vm9, %v5492_v16  ;;  %6225 = vmatprep.subr.msk.bf16.mxu0 %vm2425_vm9, %v5501_v17  ;;  %v6791_v32 = vsel %vm2425_vm9, %v5492_v16, 0 }
 0x33c   : > { %1278 = vrot.lane.b32.xlu1 %v6667_v23, %s8279_s0  ;;  %v6749_v61 = vrot.slane %v5699_v56, 7 }
 0x33e   : > { %1286 = vrot.lane.b32.xlu0 %v6657_v13, %s8280_s1  ;;  %v2319_v0 = vsel %vm2128_vm10, %v2317_v60, %v6749_v61 }
 0x33f   : > { %v6758_v4 = vpack.c.bf16 %v2319_v0, %v2365_v1 }
 0x340   : > { %1284 = vrot.lane.b32.xlu1 %v6667_v23, %s8280_s1 }
 0x341   : > { %5911 = vmatprep.mubr.msk.bf16.mxu0 %vm764_vm1, %v6758_v4 }
 0x342   : > { %1292 = vrot.lane.b32.xlu0 %v6657_v13, %s8281_s2  ;;  %5912 = vmatmul.mubr.msk.bf16.gmra.mxu0 %vm764_vm1, %v6767_v11 }
 0x344   : > { %1290 = vrot.lane.b32.xlu1 %v6667_v23, %s8281_s2 }
 0x346   : > { %1298 = vrot.lane.b32.xlu0 %v6657_v13, %s8282_s19 }
 0x348   : > { %1296 = vrot.lane.b32.xlu1 %v6667_v23, %s8282_s19 }
 0x34a   : > { %1304 = vrot.lane.b32.xlu0 %v6657_v13, %s8283_s23 }
 0x34c   : > { %1302 = vrot.lane.b32.xlu1 %v6667_v23, %s8283_s23 }
 0x34e   : > { %1310 = vrot.lane.b32.xlu0 %v6657_v13, %s8284_s29 }
 0x350   : > { %1308 = vrot.lane.b32.xlu1 %v6667_v23, %s8284_s29  ;;  %s8093_s29 = scalar_lea.vmem %s8240_s9, %s5419_s30  ;;  %s586_s30 = sadd.s32 %s5441_s22, %s6485_s24 }
 0x352   : > { %1316 = vrot.lane.b32.xlu0 %v6657_v13, %s8285_s28 }
 0x354   : > { %1314 = vrot.lane.b32.xlu1 %v6667_v23, %s8285_s28  ;;  %s5442_s28 = sshll.u32 %s586_s30, 1 }
 0x356   : > { %1322 = vrot.lane.b32.xlu0 %v6657_v13, %s6371_s20 }
 0x358   : > { %1320 = vrot.lane.b32.xlu1 %v6667_v23, %s6371_s20  ;;  %s563_s20 = sadd.s32 %s5434_s11, %s6624_s27 }
 0x35a   : > { %1328 = vrot.lane.b32.xlu0 %v6657_v13, %s6372_s21 }
 0x35c   : > { %1326 = vrot.lane.b32.xlu1 %v6667_v23, %s6372_s21  ;;  %s5436_s21 = sshll.u32 %s563_s20, 2 }
 0x35d   : > { %s565_s1 = scalar_lea.vmem %s8236_s5, %s5436_s21  ;;  %s588_s21 = scalar_lea.vmem %s8241_s10, %s5442_s28 }
 0x3ac   : > { %v1281_v18 = vpop.permute.xlu0 %1280 }
 0x3ae   : > { %v1279_v20 = vpop.permute.xlu1 %1278 }
 0x3b0   : > { %v1287_v21 = vpop.permute.xlu0 %1286 }
 0x3b1   : > { %v1534_v22 = vcombine.low %v6657_v13, %v1287_v21  ;;  %v1535_v25 = vcombine.high %v6657_v13, %v1287_v21 }
 0x3b2   : > { %v1285_v26 = vpop.permute.xlu1 %1284 }
 0x3b3   : > { %v1542_v12 = vrot.slane %v1534_v22, %v6466_v7  ;;  %v1549_v2 = vrot.slane %v1535_v25, %v6466_v7  ;;  %v1332_v40 = vcombine.low %v6667_v23, %v1285_v26  ;;  %v1333_v41 = vcombine.high %v6667_v23, %v1285_v26 }
 0x3b4   : > { %v1293_v31 = vpop.permute.xlu0 %1292 }
 0x3b5   : > { %v1550_v13 = vcombine.low %v1281_v18, %v1293_v31  ;;  %v1551_v38 = vcombine.high %v1281_v18, %v1293_v31  ;;  %v1340_v59 = vrot.slane %v1332_v40, %v6466_v7  ;;  %v1347_v60 = vrot.slane %v1333_v41, %v6466_v7 }
 0x3b6   : > { %v1291_v42 = vpop.permute.xlu1 %1290 }
 0x3b7   : > { %v1558_v43 = vrot.slane %v1550_v13, %v6466_v7  ;;  %v1565_v45 = vrot.slane %v1551_v38, %v6466_v7  ;;  %v1348_v47 = vcombine.low %v1279_v20, %v1291_v42  ;;  %v1349_v48 = vcombine.high %v1279_v20, %v1291_v42 }
 0x3b8   : > { %v6808_v50 = vpop.permute.xlu0 %1298 }
 0x3b9   : > { %v1598_v56 = vcombine.low %v1542_v12, %v1558_v43  ;;  %v1599_v57 = vcombine.high %v1542_v12, %v1558_v43  ;;  %v1614_v23 = vcombine.low %v1549_v2, %v1565_v45  ;;  %v1615_v58 = vcombine.high %v1549_v2, %v1565_v45 }
 0x3ba   : > { %v1356_v62 = vrot.slane %v1348_v47, %v6466_v7  ;;  %v1363_v0 = vrot.slane %v1349_v48, %v6466_v7  ;;  %v6818_v1 = vpop.permute.xlu1 %1296 }
 0x3bb   : > { %v1606_v3 = vrot.slane %v1598_v56, %v6470_v19  ;;  %v1613_v6 = vrot.slane %v1599_v57, %v6470_v19  ;;  %v1622_v28 = vrot.slane %v1614_v23, %v6470_v19  ;;  %v1629_v9 = vrot.slane %v1615_v58, %v6470_v19 }
 0x3bc   : > { %v1396_v10 = vcombine.low %v1340_v59, %v1356_v62  ;;  %v1397_v15 = vcombine.high %v1340_v59, %v1356_v62  ;;  %v1412_v16 = vcombine.low %v1347_v60, %v1363_v0  ;;  %v1413_v17 = vcombine.high %v1347_v60, %v1363_v0  ;;  %v1305_v18 = vpop.permute.xlu0 %1304 }
 0x3bd   : > { %v5455_v20 = vcombine.low %v1606_v3, %v1613_v6  ;;  %v5457_v21 = vcombine.high %v1606_v3, %v1613_v6  ;;  %v5459_v22 = vcombine.low %v1622_v28, %v1629_v9  ;;  %v5461_v25 = vcombine.high %v1622_v28, %v1629_v9 }
 0x3be   : > { %v1404_v26 = vrot.slane %v1396_v10, %v6470_v19  ;;  %v1411_v27 = vrot.slane %v1397_v15, %v6470_v19  ;;  %v1420_v29 = vrot.slane %v1412_v16, %v6470_v19  ;;  %v1427_v31 = vrot.slane %v1413_v17, %v6470_v19  ;;  %v1303_v36 = vpop.permute.xlu1 %1302 }
 0x3bf   : > { %v6829_v13 = vrot.slane %v5455_v20, %v6466_v7  ;;  %v6832_v38 = vrot.slane %v5457_v21, %v6466_v7  ;;  %v6835_v12 = vrot.slane %v5459_v22, %v6466_v7  ;;  %v6838_v2 = vrot.slane %v5461_v25, %v6466_v7 }
 0x3c0   : > { %v5447_v40 = vcombine.low %v1404_v26, %v1411_v27  ;;  %v5449_v41 = vcombine.high %v1404_v26, %v1411_v27  ;;  %v5451_v42 = vcombine.low %v1420_v29, %v1427_v31  ;;  %v5453_v43 = vcombine.high %v1420_v29, %v1427_v31  ;;  %v1311_v45 = vpop.permute.xlu0 %1310 }
 0x3c1   : > { %v1937_v47 = vcombine.high %v6829_v13, %v6832_v38  ;;  %v1969_v48 = vcombine.high %v6835_v12, %v6838_v2  ;;  %v2746_v56 = vshll.u32 %v6798_v39, 16  ;;  %v6845_v57 = vpack.c.bf16 %v2371_v55, %v2371_v55 }
 0x3c2   : > { %v6848_v23 = vrot.slane %v5447_v40, %v6466_v7  ;;  %v6851_v58 = vrot.slane %v5449_v41, %v6466_v7  ;;  %v6854_v59 = vrot.slane %v5451_v42, %v6466_v7  ;;  %v6857_v60 = vrot.slane %v5453_v43, %v6466_v7  ;;  %v1309_v62 = vpop.permute.xlu1 %1308 }
 0x3c3   : > { %v1951_v0 = vrot.slane %v1937_v47, %v6470_v19  ;;  %v1983_v3 = vrot.slane %v1969_v48, %v6470_v19  ;;  %v6863_v55 = vor.u32 %v2743_v51, %v2739_v35  ;;  %v1566_v10 = vcombine.low %v6808_v50, %v1311_v45 }
 0x3c4   : > { %v1801_v28 = vcombine.high %v6848_v23, %v6851_v58  ;;  %v1833_v9 = vcombine.high %v6854_v59, %v6857_v60  ;;  %v1567_v15 = vcombine.high %v6808_v50, %v1311_v45  ;;  %v1317_v16 = vpop.permute.xlu0 %1316  ;;  %v1936_v17 = vcombine.low %v6829_v13, %v6832_v38 }
 0x3c5   : > { %v1968_v35 = vcombine.low %v6835_v12, %v6838_v2  ;;  %v2002_v51 = vcombine.low %v1951_v0, %v1983_v3  ;;  %v6876_v20 = vrot.slane %v2746_v56, 1  ;;  %v2003_v21 = vcombine.high %v1951_v0, %v1983_v3 }
 0x3c6   : > { %v6879_v22 = vrot.slane %v1801_v28, %v6470_v19  ;;  %v6882_v25 = vrot.slane %v1833_v9, %v6470_v19  ;;  %v1364_v26 = vcombine.low %v6818_v1, %v1309_v62  ;;  %v1315_v50 = vpop.permute.xlu1 %1314  ;;  %v1800_v27 = vcombine.low %v6848_v23, %v6851_v58 }
 0x3c7   : > { %v1832_v29 = vcombine.low %v6854_v59, %v6857_v60  ;;  %v1582_v31 = vcombine.low %v1305_v18, %v1317_v16  ;;  %v1583_v40 = vcombine.high %v1305_v18, %v1317_v16  ;;  %v6889_v41 = vrot.slane %v2002_v51, 7 }
 0x3c8   : > { %v1574_v42 = vrot.slane %v1566_v10, %v6466_v7  ;;  %v1581_v43 = vrot.slane %v1567_v15, %v6466_v7  ;;  %v1365_v45 = vcombine.high %v6818_v1, %v1309_v62  ;;  %v1380_v56 = vcombine.low %v1303_v36, %v1315_v50  ;;  %v6896_v3 = vpop.permute.xlu0 %1322 }
 0x3c9   : > { %v1590_v47 = vrot.slane %v1582_v31, %v6466_v7  ;;  %v1597_v48 = vrot.slane %v1583_v40, %v6466_v7  ;;  %v1381_v0 = vcombine.high %v1303_v36, %v1315_v50  ;;  %v6898_v28 = vrot.slane %v2003_v21, 7 }
 0x3ca   : > { %v1866_v18 = vcombine.low %v6879_v22, %v6882_v25  ;;  %v1867_v9 = vcombine.high %v6879_v22, %v6882_v25  ;;  %v1372_v10 = vrot.slane %v1364_v26, %v6466_v7  ;;  %v1379_v51 = vrot.slane %v1365_v45, %v6466_v7  ;;  %v1321_v54 = vpop.permute.xlu1 %1320 }
 0x3cb   : > { %v1630_v15 = vcombine.low %v1574_v42, %v1590_v47  ;;  %v1631_v1 = vcombine.high %v1574_v42, %v1590_v47  ;;  %v1646_v62 = vcombine.low %v1581_v43, %v1597_v48  ;;  %v1647_v16 = vcombine.high %v1581_v43, %v1597_v48 }
 0x3cc   : > { %v1388_v36 = vrot.slane %v1380_v56, %v6466_v7  ;;  %v1395_v50 = vrot.slane %v1381_v0, %v6466_v7  ;;  %v1670_v21 = vcombine.high %v6896_v3, %v6368_v8 }
 0x3cd   : > { %v1638_v31 = vrot.slane %v1630_v15, %v6470_v19  ;;  %v1645_v40 = vrot.slane %v1631_v1, %v6470_v19  ;;  %v1654_v22 = vrot.slane %v1646_v62, %v6470_v19  ;;  %v1661_v25 = vrot.slane %v1647_v16, %v6470_v19 }
 0x3ce   : > { %v1428_v26 = vcombine.low %v1372_v10, %v1388_v36  ;;  %v1429_v42 = vcombine.high %v1372_v10, %v1388_v36  ;;  %v1444_v43 = vcombine.low %v1379_v51, %v1395_v50  ;;  %v1445_v47 = vcombine.high %v1379_v51, %v1395_v50 }
 0x3cf   : > { %v5456_v45 = vcombine.low %v1638_v31, %v1645_v40  ;;  %v5458_v48 = vcombine.high %v1638_v31, %v1645_v40  ;;  %v5460_v56 = vcombine.low %v1654_v22, %v1661_v25  ;;  %v5462_v53 = vcombine.high %v1654_v22, %v1661_v25 }
 0x3d0   : > { %v1436_v0 = vrot.slane %v1428_v26, %v6470_v19  ;;  %v1443_v6 = vrot.slane %v1429_v42, %v6470_v19  ;;  %v1452_v15 = vrot.slane %v1444_v43, %v6470_v19  ;;  %v1459_v1 = vrot.slane %v1445_v47, %v6470_v19 }
 0x3d1   : > { %v1887_v62 = vrot.slane %v5456_v45, %v6466_v7  ;;  %v1903_v16 = vrot.slane %v5458_v48, %v6466_v7  ;;  %v1919_v10 = vrot.slane %v5460_v56, %v6466_v7  ;;  %v1935_v51 = vrot.slane %v5462_v53, %v6466_v7 }
 0x3d2   : > { %v5448_v36 = vcombine.low %v1436_v0, %v1443_v6  ;;  %v5450_v50 = vcombine.high %v1436_v0, %v1443_v6  ;;  %v5452_v31 = vcombine.low %v1452_v15, %v1459_v1  ;;  %v5454_v40 = vcombine.high %v1452_v15, %v1459_v1 }
 0x3d3   : > { %v1952_v22 = vcombine.low %v1887_v62, %v1903_v16  ;;  %v1953_v25 = vcombine.high %v1887_v62, %v1903_v16  ;;  %v1984_v26 = vcombine.low %v1919_v10, %v1935_v51  ;;  %v1985_v42 = vcombine.high %v1919_v10, %v1935_v51 }
 0x3d4   : > { %v1751_v43 = vrot.slane %v5448_v36, %v6466_v7  ;;  %v1767_v47 = vrot.slane %v5450_v50, %v6466_v7  ;;  %v1783_v45 = vrot.slane %v5452_v31, %v6466_v7  ;;  %v1799_v48 = vrot.slane %v5454_v40, %v6466_v7 }
 0x3d5   : > { %v1960_v56 = vrot.slane %v1952_v22, %v6470_v19  ;;  %v6928_v53 = vrot.slane %v1953_v25, %v6470_v19  ;;  %v1992_v6 = vrot.slane %v1984_v26, %v6470_v19  ;;  %v6932_v0 = vrot.slane %v1985_v42, %v6470_v19  ;;  %v1329_v26 = vpop.permute.xlu0 %1328 }
 0x3d6   : > { %v1816_v15 = vcombine.low %v1751_v43, %v1767_v47  ;;  %v1817_v1 = vcombine.high %v1751_v43, %v1767_v47  ;;  %v1848_v62 = vcombine.low %v1783_v45, %v1799_v48  ;;  %v1849_v16 = vcombine.high %v1783_v45, %v1799_v48 }
 0x3d7   : > { %v2004_v10 = vcombine.low %v1960_v56, %v1992_v6  ;;  %v2005_v51 = vcombine.high %v1960_v56, %v1992_v6  ;;  %v2006_v36 = vcombine.low %v6928_v53, %v6932_v0  ;;  %v1468_v50 = vcombine.high %v1321_v54, %v6368_v8 }
 0x3d8   : > { %v6938_v31 = vrot.slane %v1816_v15, %v6470_v19  ;;  %v6941_v40 = vrot.slane %v1817_v1, %v6470_v19  ;;  %v6944_v22 = vrot.slane %v1848_v62, %v6470_v19  ;;  %v6947_v25 = vrot.slane %v1849_v16, %v6470_v19 }
 0x3d9   : > { %v6949_v42 = vrot.slane %v1866_v18, 7  ;;  %v6951_v43 = vrot.slane %v1867_v9, 7  ;;  %v1677_v47 = vrot.slane %v6896_v3, %v6466_v7  ;;  %v1684_v45 = vrot.slane %v1670_v21, %v6466_v7  ;;  %v1327_v21 = vpop.permute.xlu1 %1326 }
 0x3da   : > { %v6958_v56 = vrot.slane %v2004_v10, 7  ;;  %v6960_v6 = vrot.slane %v2005_v51, 7  ;;  %v6962_v15 = vrot.slane %v2006_v36, 7  ;;  %v1869_v9 = vcombine.high %v6938_v31, %v6944_v22 }
 0x3db   : > { %v1685_v1 = vcombine.high %v1329_v26, %v6368_v8  ;;  %v1692_v3 = vrot.slane %v1329_v26, %v6466_v7  ;;  %v1475_v10 = vrot.slane %v1321_v54, %v6466_v7  ;;  %v1482_v51 = vrot.slane %v1468_v50, %v6466_v7 }
 0x3dc   : > { %v1808_v26 = vrot.slane %v1800_v27, %v6470_v19  ;;  %v1840_v62 = vrot.slane %v1832_v29, %v6470_v19  ;;  %v1944_v54 = vrot.slane %v1936_v17, %v6470_v19  ;;  %v1976_v50 = vrot.slane %v1968_v35, %v6470_v19 }
 0x3dd   : > { %v1699_v36 = vrot.slane %v1685_v1, %v6466_v7  ;;  %v1700_v48 = vcombine.low %v1677_v47, %v1692_v3  ;;  %v1701_v18 = vcombine.high %v1677_v47, %v1692_v3  ;;  %v1483_v47 = vcombine.high %v1327_v21, %v6368_v8 }
 0x3de   : > { %v1864_v59 = vcombine.low %v1808_v26, %v1840_v62  ;;  %v1865_v60 = vcombine.high %v1808_v26, %v1840_v62  ;;  %v2000_v29 = vcombine.low %v1944_v54, %v1976_v50  ;;  %v2001_v3 = vcombine.high %v1944_v54, %v1976_v50 }
 0x3df   : > { %v1708_v23 = vrot.slane %v1700_v48, %v6470_v19  ;;  %v1715_v58 = vrot.slane %v1701_v18, %v6470_v19  ;;  %v1716_v27 = vcombine.low %v1684_v45, %v1699_v36  ;;  %v1717_v1 = vcombine.high %v1684_v45, %v1699_v36 }
 0x3e0   : > { %v2129_v12 = vrot.slane %v1864_v59, 7  ;;  %v2130_v2 = vrot.slane %v2000_v29, 7  ;;  %v1490_v8 = vrot.slane %v1327_v21, %v6466_v7  ;;  %v1497_v35 = vrot.slane %v1483_v47, %v6466_v7 }
 0x3e1   : > { %v1724_v13 = vrot.slane %v1716_v27, %v6470_v19  ;;  %v1731_v38 = vrot.slane %v1717_v1, %v6470_v19  ;;  %v2058_v17 = vcombine.low %v1708_v23, %v1715_v58  ;;  %v5465_v16 = vcombine.high %v1708_v23, %v1715_v58 }
 0x3e2   : > { %v2131_v36 = vsel %vm2128_vm10, %v2129_v12, %v2130_v2  ;;  %v2189_v26 = vsel %vm2128_vm10, 0.0, %v2129_v12  ;;  %v1498_v54 = vcombine.low %v1475_v10, %v1490_v8  ;;  %v1499_v50 = vcombine.high %v1475_v10, %v1490_v8 }
 0x3e3   : > { %v2065_v48 = vrot.slane %v2058_v17, %v6466_v7  ;;  %v2073_v45 = vrot.slane %v5465_v16, %v6466_v7  ;;  %v2074_v18 = vcombine.low %v1724_v13, %v1731_v38  ;;  %v5466_v62 = vcombine.high %v1724_v13, %v1731_v38 }
 0x3e4   : > { %v7006_v21 = vpack.c.bf16 %v2131_v36, %v2189_v26  ;;  %v1506_v47 = vrot.slane %v1498_v54, %v6470_v19  ;;  %v1513_v1 = vrot.slane %v1499_v50, %v6470_v19  ;;  %v1514_v16 = vcombine.low %v1482_v51, %v1497_v35 }
 0x3e5   : > { %v2081_v23 = vrot.slane %v2074_v18, %v6466_v7  ;;  %v2089_v58 = vrot.slane %v5466_v62, %v6466_v7  ;;  %v2090_v27 = vcombine.low %v2065_v48, %v2073_v45  ;;  %v1515_v59 = vcombine.high %v1482_v51, %v1497_v35 }
 0x3e6   : > { %5917 = vmatprep.mubr.msk.bf16.mxu1 %vm764_vm1, %v7006_v21  ;;  %v2132_v10 = vrot.slane %v1865_v60, 7  ;;  %v2133_v38 = vrot.slane %v2001_v3, 7  ;;  %v1522_v17 = vrot.slane %v1514_v16, %v6470_v19  ;;  %v2008_v8 = vcombine.low %v1506_v47, %v1513_v1 }
 0x3e7   : > { %v7011_v29 = vrot.slane %v2090_v27, %v6470_v19  ;;  %v2098_v13 = vcombine.low %v2081_v23, %v2089_v58  ;;  %v1529_v12 = vrot.slane %v1515_v59, %v6470_v19  ;;  %v5463_v48 = vcombine.high %v1506_v47, %v1513_v1  ;;  %v7043_v59 = vld [vmem:[%s8238_s7 + $0x4] sm:$0x3] }
 0x3e8   : > { %v2134_v51 = vsel %vm2128_vm10, %v2132_v10, %v2133_v38  ;;  %v2190_v35 = vsel %vm2128_vm10, 0.0, %v2132_v10  ;;  %v2137_v18 = vsel %vm2128_vm10, %v6949_v42, %v6889_v41  ;;  %v2015_v60 = vrot.slane %v2008_v8, %v6466_v7 }
 0x3e9   : > { %v7018_v45 = vrot.slane %v2098_v13, %v6470_v19  ;;  %v2023_v3 = vrot.slane %v5463_v48, %v6466_v7  ;;  %v2024_v62 = vcombine.low %v1522_v17, %v1529_v12  ;;  %v5464_v36 = vcombine.high %v1522_v17, %v1529_v12 }
 0x3ea   : > { %v8286_v26 = vcombine.low %v6938_v31, %v6944_v22  ;;  %v7032_v23 = vpack.c.bf16 %v2134_v51, %v2190_v35  ;;  %v2191_v58 = vsel %vm2128_vm10, 0.0, %v6949_v42  ;;  %v2144_v13 = vrot.slane %v1869_v9, 7 }
 0x3eb   : > { %v2031_v27 = vrot.slane %v2024_v62, %v6466_v7  ;;  %v2039_v47 = vrot.slane %v5464_v36, %v6466_v7  ;;  %v2040_v1 = vcombine.low %v2015_v60, %v2023_v3  ;;  %v7038_v16 = vpack.c.bf16 %v2137_v18, %v2191_v58 }
 0x3ec   : > { %v2141_v54 = vrot.slane %v8286_v26, 7  ;;  %v8287_v10 = vcombine.low %v6941_v40, %v6947_v25  ;;  %v8288_v17 = vcombine.high %v6941_v40, %v6947_v25  ;;  %5918 = vmatmul.mubr.msk.bf16.vlgmr.msra.gmra.mxu1 %vm764_vm1, %v7032_v23  ;;  %v2199_v12 = vsel %vm2128_vm10, %v2130_v2, 0.0 }
 0x3ed   : > { %v2048_v8 = vcombine.low %v2031_v27, %v2039_v47  ;;  %5952 = vmatpush3.bf16.msra.mxu1 %v6791_v32  ;;  %5921 = vmatprep.mubr.msk.bf16.mxu1 %vm764_vm1, %v7038_v16  ;;  %v7062_v31 = vpack.c.bf16 %v2199_v12, %v2199_v12  ;;  %v2651_v22 = vshrl.u32 %v7006_v21, 16  ;;  %v2653_v9 = vshll.u32 %v7006_v21, 16 }
 0x3ee   : > { %v2147_v42 = vrot.slane %v8287_v10, 7  ;;  %v7054_v7 = vrot.slane %v8288_v17, 7  ;;  %v7067_v40 = vrot.slane %v2040_v1, %v6470_v19  ;;  %v2200_v25 = vsel %vm2128_vm10, %v2133_v38, 0.0  ;;  %6226 = vmatprep.subr.msk.bf16.mxu1 %vm2425_vm9, %v7043_v59 }
 0x3ef   : > { %v2664_v48 = vshll.u32 %v7032_v23, 16  ;;  %v2140_v32 = vsel %vm2128_vm10, %v6951_v43, %v6898_v28  ;;  %v7077_v2 = vrot.slane %v2048_v8, %v6470_v19  ;;  %v2655_v51 = vrot.slane %v2653_v9, 1 }
 0x3f0   : > { %v2658_v35 = vshll.u32 %v7062_v31, 16  ;;  %v7080_v18 = vpack.c.bf16 %v2200_v25, %v2200_v25  ;;  %v2662_v60 = vshrl.u32 %v7032_v23, 16  ;;  %v2192_v3 = vsel %vm2128_vm10, 0.0, %v6951_v43 }
 0x3f1   : > { %v2666_v38 = vrot.slane %v2664_v48, 1  ;;  %v2201_v62 = vsel %vm2128_vm10, %v6889_v41, 0.0  ;;  %v2656_v26 = vor.u32 %v2655_v51, %v2651_v22  ;;  %v2673_v58 = vshrl.u32 %v7038_v16, 16 }
 0x3f2   : > { %v2660_v19 = vrot.slane %v2658_v35, 1  ;;  %v2669_v47 = vshll.u32 %v7080_v18, 16  ;;  %v7091_v1 = vpack.c.bf16 %v2140_v32, %v2192_v3  ;;  %v7093_v10 = vpack.c.bf16 %v2201_v62, %v2201_v62 }
 0x3f3   : > { %v2667_v27 = vor.u32 %v2666_v38, %v2662_v60  ;;  %v2675_v43 = vshll.u32 %v7038_v16, 16  ;;  %v2143_v41 = vsel %vm2128_vm10, %v2141_v54, %v6958_v56  ;;  %v2193_v12 = vsel %vm2128_vm10, 0.0, %v2141_v54 }
 0x3f4   : > { %v2661_v17 = vsel %vm2650_vm11, %v2656_v26, %v2660_v19  ;;  %v2671_v8 = vrot.slane %v2669_v47, 1  ;;  %5922 = vmatmul.mubr.msk.bf16.gmra.mxu1 %vm764_vm1, %v7091_v1  ;;  %v2680_v22 = vshll.u32 %v7093_v10, 16  ;;  %v7104_v9 = vpack.c.bf16 %v2143_v41, %v2193_v12 }
 0x3f5   : > { %5935 = vmatprep.mubr.msk.bf16.mxu0 %vm764_vm1, %v2661_v17  ;;  %v2202_v25 = vsel %vm2128_vm10, %v6898_v28, 0.0  ;;  %v2677_v48 = vrot.slane %v2675_v43, 1  ;;  %v2684_v51 = vshrl.u32 %v7091_v1, 16  ;;  %v2686_v54 = vshll.u32 %v7091_v1, 16  ;;  %v7123_v28 = vld [vmem:[%s8237_s6 + $0x6] sm:$0x3] }
 0x3f6   : > { %v7108_v32 = vpack.c.bf16 %v2202_v25, %v2202_v25  ;;  %v7113_v35 = vsel %vm2650_vm11, %v2667_v27, %v2671_v8  ;;  %v2682_v60 = vrot.slane %v2680_v22, 1  ;;  %5925 = vmatprep.mubr.msk.bf16.mxu1 %vm764_vm1, %v7104_v9  ;;  %v2146_v38 = vsel %vm2128_vm10, %v2144_v13, %v6960_v6 }
 0x3f7   : > { %v2194_v3 = vsel %vm2128_vm10, 0.0, %v2144_v13  ;;  %5936 = vmatmul.mubr.msk.bf16.vlgmr.msra.gmra.mxu0 %vm764_vm1, %v7113_v35  ;;  %v2678_v62 = vor.u32 %v2677_v48, %v2673_v58  ;;  %v2688_v26 = vrot.slane %v2686_v54, 1  ;;  %v8289_v47 = vcombine.high %v6928_v53, %v6932_v0 }
 0x3f8   : > { %v2691_v19 = vshll.u32 %v7108_v32, 16  ;;  %v7128_v27 = vpack.c.bf16 %v2146_v38, %v2194_v3  ;;  %v2149_v13 = vsel %vm2128_vm10, %v2147_v42, %v6962_v15  ;;  %v2195_v43 = vsel %vm2128_vm10, 0.0, %v2147_v42  ;;  %5970 = vmatpush3.bf16.msra.mxu0 %v6794_v34 }
 0x3f9   : > { %v2151_v17 = vrot.slane %v8289_v47, 7  ;;  %v2203_v41 = vsel %vm2128_vm10, %v6958_v56, 0.0  ;;  %v7140_v58 = vsel %vm2650_vm11, %v2678_v62, %v2682_v60  ;;  %v2689_v12 = vor.u32 %v2688_v26, %v2684_v51  ;;  %6227 = vmatprep.subr.msk.bf16.mxu0 %vm2425_vm9, %v7123_v28 }
 0x3fa   : > { %v2693_v8 = vrot.slane %v2691_v19, 1  ;;  %v2695_v22 = vshrl.u32 %v7104_v9, 16  ;;  %5939 = vmatprep.mubr.msk.bf16.mxu0 %vm764_vm1, %v7140_v58  ;;  %v7147_v53 = vpack.c.bf16 %v2149_v13, %v2195_v43  ;;  %v7149_v0 = vpack.c.bf16 %v2203_v41, %v2203_v41 }
 0x3fb   : > { %v2697_v56 = vshll.u32 %v7104_v9, 16  ;;  %v2204_v34 = vsel %vm2128_vm10, %v6960_v6, 0.0  ;;  %v2706_v25 = vshrl.u32 %v7128_v27, 16  ;;  %v2708_v48 = vshll.u32 %v7128_v27, 16 }
 0x3fc   : > { %v7154_v42 = vpack.c.bf16 %v2204_v34, %v2204_v34  ;;  %v2152_v51 = vsel %vm2128_vm10, %v7054_v7, %v2151_v17  ;;  %5926 = vmatmul.mubr.msk.bf16.gmra.mxu1 %vm764_vm1, %v7128_v27  ;;  %v2702_v60 = vshll.u32 %v7149_v0, 16  ;;  %v2196_v38 = vsel %vm2128_vm10, 0.0, %v7054_v7 }
 0x3fd   : > { %v2699_v54 = vrot.slane %v2697_v56, 1  ;;  %v2205_v6 = vsel %vm2128_vm10, %v6962_v15, 0.0  ;;  %v7168_v3 = vsel %vm2650_vm11, %v2689_v12, %v2693_v8  ;;  %5929 = vmatprep.mubr.msk.bf16.mxu1 %vm764_vm1, %v7147_v53  ;;  %v2710_v62 = vrot.slane %v2708_v48, 1 }
 0x3fe   : > { %v2713_v26 = vshll.u32 %v7154_v42, 16  ;;  %v7173_v19 = vpack.c.bf16 %v2205_v6, %v2205_v6  ;;  %v2704_v13 = vrot.slane %v2702_v60, 1  ;;  %v7175_v43 = vpack.c.bf16 %v2152_v51, %v2196_v38 }
 0x3ff   : > { %v2700_v47 = vor.u32 %v2699_v54, %v2695_v22  ;;  %v2719_v7 = vshll.u32 %v7147_v53, 16  ;;  %5940 = vmatmul.mubr.msk.bf16.gmra.mxu0 %vm764_vm1, %v7168_v3  ;;  %v8290_v15 = vshll.u32 %v6659_v14, 16  ;;  %v2757_v12 = vshll.u32 %v6800_v5, 16 }
 0x400   : > { %v2761_v8 = vshrl.u32 %v6688_v33, 16  ;;  %v2768_v56 = vshll.u32 %v6845_v57, 16  ;;  %v2711_v22 = vor.u32 %v2710_v62, %v2706_v25  ;;  %v2372_v51 = vsel %vm2128_vm10, %v6679_v30, 0.0 }
 0x401   : > { %v2754_v41 = vrot.slane %v8290_v15, 1  ;;  %v7186_v34 = vsel %vm2650_vm11, %v2700_v47, %v2704_v13  ;;  %v2721_v48 = vrot.slane %v2719_v7, 1  ;;  %v2717_v54 = vshrl.u32 %v7147_v53, 16 }
 0x402   : > { %5943 = vmatprep.mubr.msk.bf16.mxu0 %vm764_vm1, %v7186_v34  ;;  %v2724_v60 = vshll.u32 %v7173_v19, 16  ;;  %v2206_v38 = vsel %vm2128_vm10, %v2151_v17, 0.0  ;;  %v8291_v6 = vshll.u32 %v6688_v33, 16  ;;  %v2715_v36 = vrot.slane %v2713_v26, 1 }
 0x403   : > { %v2730_v47 = vshll.u32 %v7175_v43, 16  ;;  %v2749_v25 = vsel %vm2650_vm11, %v6863_v55, %v6876_v20  ;;  %v2373_v30 = vsel %vm2128_vm10, %v6703_v44, 0.0  ;;  %v2722_v62 = vor.u32 %v2721_v48, %v2717_v54 }
 0x404   : > { %v2765_v15 = vrot.slane %v8291_v6, 1  ;;  %v8292_v13 = vshrl.u32 %v6659_v14, 16  ;;  %v7205_v50 = vpack.c.bf16 %v2372_v51, %v2372_v51  ;;  %v2774_v17 = vshll.u32 %v6698_v37, 16  ;;  %5930 = vmatmul.mubr.msk.bf16.gmra.mxu1 %vm764_vm1, %v7175_v43 }
 0x405   : > { %v7209_v6 = vsel %vm2650_vm11, %v2711_v22, %v2715_v36  ;;  %v7213_v26 = vpack.c.bf16 %v2206_v38, %v2206_v38  ;;  %v2759_v55 = vrot.slane %v2757_v12, 1  ;;  %v2785_v20 = vshll.u32 %v6716_v49, 16  ;;  %5953 = vmatprep.mubr.msk.bf16.mxu1 %vm764_vm1, %v2749_v25 }
 0x406   : > { %v2755_v7 = vor.u32 %v2754_v41, %v8292_v13  ;;  %8293 = vst [vmem:[#allocation3_spill] sm:$0xff] %v7209_v6  ;;  %v2726_v44 = vrot.slane %v2724_v60, 1  ;;  %v2766_v48 = vor.u32 %v2765_v15, %v2761_v8  ;;  %v2770_v41 = vrot.slane %v2768_v56, 1 }
 0x407   : > { %v7217_v51 = vpack.c.bf16 %v2373_v30, %v2373_v30  ;;  %v2732_v54 = vrot.slane %v2730_v47, 1  ;;  %v2772_v13 = vshrl.u32 %v6698_v37, 16  ;;  %v2783_v36 = vshrl.u32 %v6716_v49, 16  ;;  %5944 = vmatmul.mubr.msk.bf16.gmra.mxu0 %vm764_vm1, %v7209_v6 }
 0x408   : > { %v7224_v22 = vsel %vm2650_vm11, %v2722_v62, %v2726_v44  ;;  %v2776_v12 = vrot.slane %v2774_v17, 1  ;;  %v2779_v60 = vshll.u32 %v7205_v50, 16  ;;  %v2374_v8 = vsel %vm2128_vm10, %v6707_v46, 0.0 }
 0x409   : > { %8294 = vst [vmem:[#allocation4_spill] sm:$0xff] %v7224_v22  ;;  %5947 = vmatprep.mubr.msk.bf16.mxu0 %vm764_vm1, %v7224_v22  ;;  %v2728_v56 = vshrl.u32 %v7175_v43, 16  ;;  %v2735_v38 = vshll.u32 %v7213_v26, 16  ;;  %v2787_v15 = vrot.slane %v2785_v20, 1  ;;  %v2375_v47 = vsel %vm2128_vm10, %v6749_v61, 0.0 }
 0x40a   : > { %v7236_v25 = vsel %vm2650_vm11, %v2755_v7, %v2759_v55  ;;  %v3361_v30 = vsel %vm2425_vm9, %v7043_v59, 0  ;;  %v7241_v62 = vsel %vm2650_vm11, %v2766_v48, %v2770_v41  ;;  %v2790_v46 = vshll.u32 %v7217_v51, 16  ;;  %v7254_v59 = vld [vmem:[%s8238_s7 + $0x6] sm:$0x3] }
 0x40b   : > { %8295 = vst [vmem:[#allocation5_spill] sm:$0xff] %v7236_v25  ;;  %v2733_v17 = vor.u32 %v2732_v54, %v2728_v56  ;;  %v7244_v44 = vpack.c.bf16 %v2374_v8, %v2374_v8  ;;  %v2796_v22 = vshll.u32 %v6725_v52, 16  ;;  %v2807_v20 = vshll.u32 %v6758_v4, 16 }
 0x40c   : > { %v3128_v61 = vrot.slane %v7006_v21, 1  ;;  %v7249_v7 = vpack.c.bf16 %v2375_v47, %v2375_v47  ;;  %v2737_v55 = vrot.slane %v2735_v38, 1  ;;  %5954 = vmatmul.mubr.msk.bf16.vlgmr.msra.gmra.mxu1 %vm764_vm1, %v7236_v25  ;;  %v2777_v48 = vor.u32 %v2776_v12, %v2772_v13 }
 0x40d   : > { %v2781_v41 = vrot.slane %v2779_v60, 1  ;;  %v2788_v54 = vor.u32 %v2787_v15, %v2783_v36  ;;  %v3129_v8 = vrot.slane %v7062_v31, 1  ;;  %5988 = vmatpush3.bf16.msra.mxu1 %v3361_v30  ;;  %5957 = vmatprep.mubr.msk.bf16.mxu1 %vm764_vm1, %v7241_v62  ;;  %v2792_v21 = vrot.slane %v2790_v46, 1 }
 0x40e   : > { %v2794_v56 = vshrl.u32 %v6725_v52, 16  ;;  %v2805_v47 = vshrl.u32 %v6758_v4, 16  ;;  %v7264_v6 = vsel %vm2650_vm11, %v2733_v17, %v2737_v55  ;;  %v2798_v38 = vrot.slane %v2796_v22, 1  ;;  %6228 = vmatprep.subr.msk.bf16.mxu1 %vm2425_vm9, %v7254_v59 }
 0x40f   : > { %v2801_v25 = vshll.u32 %v7244_v44, 16  ;;  %v2809_v13 = vrot.slane %v2807_v20, 1  ;;  %v8296_v31 = vcombine.high %v7011_v29, %v7018_v45  ;;  %5948 = vmatmul.mubr.msk.bf16.gmra.mxu0 %vm764_vm1, %v7264_v6  ;;  %v3130_v12 = vsel %vm3127_vm12, %v3128_v61, %v3129_v8 }
 0x410   : > { %v2812_v60 = vshll.u32 %v7249_v7, 16  ;;  %5971 = vmatprep.mubr.msk.bf16.mxu0 %vm764_vm1, %v3130_v12  ;;  %v7278_v22 = vsel %vm2650_vm11, %v2777_v48, %v2781_v41  ;;  %v7281_v15 = vsel %vm2650_vm11, %v2788_v54, %v2792_v21  ;;  %v2376_v30 = vsel %vm2128_vm10, %v6751_v63, 0.0 }
 0x411   : > { %v2157_v36 = vrot.slane %v8296_v31, 7  ;;  %v3131_v46 = vrot.slane %v7032_v23, 1  ;;  %v2799_v17 = vor.u32 %v2798_v38, %v2794_v56  ;;  %v2803_v20 = vrot.slane %v2801_v25, 1 }
 0x412   : > { %v2810_v55 = vor.u32 %v2809_v13, %v2805_v47  ;;  %v3134_v61 = vrot.slane %v7038_v16, 1  ;;  %v2814_v8 = vrot.slane %v2812_v60, 1  ;;  %v8297_v31 = vcombine.high %v7067_v40, %v7077_v2  ;;  %v7310_v13 = vld [vmem:[%s8237_s6 + $0x8] sm:$0x3] }
 0x413   : > { %v2208_v48 = vsel %vm2128_vm10, %v2157_v36, 0.0  ;;  %v3132_v41 = vrot.slane %v7080_v18, 1  ;;  %v7294_v63 = vpack.c.bf16 %v2376_v30, %v2376_v30  ;;  %v2818_v54 = vshll.u32 %v6767_v11, 16 }
 0x414   : > { %v2156_v12 = vrot.slane %v8297_v31, 7  ;;  %5958 = vmatmul.mubr.msk.bf16.gmra.mxu1 %vm764_vm1, %v7278_v22  ;;  %v3482_v25 = vsel %vm2425_vm9, %v7123_v28, 0  ;;  %v3135_v21 = vrot.slane %v7093_v10, 1  ;;  %v2228_v18 = vpack.c.bf16 %v2208_v48, %v2208_v48 }
 0x415   : > { %5961 = vmatprep.mubr.msk.bf16.mxu1 %vm764_vm1, %v7281_v15  ;;  %v7305_v38 = vsel %vm3127_vm12, %v3131_v46, %v3132_v41  ;;  %v7320_v28 = vsel %vm2650_vm11, %v2799_v17, %v2803_v20  ;;  %v2816_v48 = vshrl.u32 %v6767_v11, 16  ;;  %v2823_v41 = vshll.u32 %v7294_v63, 16 }
 0x416   : > { %v2158_v56 = vsel %vm2128_vm10, %v2156_v12, %v2157_v36  ;;  %v2198_v47 = vsel %vm2128_vm10, 0.0, %v2156_v12  ;;  %v7317_v10 = vsel %vm3127_vm12, %v3134_v61, %v3135_v21  ;;  %v4483_v30 = vshll.u32 %v2228_v18, 16 }
 0x417   : > { %v7312_v60 = vpack.c.bf16 %v2158_v56, %v2198_v47  ;;  %5972 = vmatmul.mubr.msk.bf16.vlgmr.msra.gmra.mxu0 %vm764_vm1, %v7305_v38  ;;  %v4743_v31 = vrot.slane %v2228_v18, 1  ;;  %v7327_v12 = vsel %vm2650_vm11, %v2810_v55, %v2814_v8  ;;  %v2820_v61 = vrot.slane %v2818_v54, 1 }
 0x418   : > { %5975 = vmatprep.mubr.msk.bf16.mxu0 %vm764_vm1, %v7317_v10  ;;  %6006 = vmatpush3.bf16.msra.mxu0 %v3482_v25  ;;  %v3137_v17 = vrot.slane %v7091_v1, 1  ;;  %v3140_v56 = vrot.slane %v7104_v9, 1  ;;  %v3138_v55 = vrot.slane %v7108_v32, 1  ;;  %v4485_v54 = vrot.slane %v4483_v30, 1 }
 0x419   : > { %8298 = vst [vmem:[#allocation6_spill] sm:$0xff] %v7312_v60  ;;  %v4478_v36 = vshll.u32 %v7312_v60, 16  ;;  %v4742_v46 = vrot.slane %v7312_v60, 1  ;;  %6229 = vmatprep.subr.msk.bf16.mxu0 %vm2425_vm9, %v7310_v13  ;;  %v4476_v20 = vshrl.u32 %v7312_v60, 16  ;;  %v3141_v47 = vrot.slane %v7149_v0, 1 }
 0x41a   : > { %v2821_v18 = vor.u32 %v2820_v61, %v2816_v48  ;;  %v2825_v60 = vrot.slane %v2823_v41, 1  ;;  %v3143_v48 = vrot.slane %v7128_v27, 1  ;;  %v3144_v61 = vrot.slane %v7154_v42, 1 }
 0x41b   : > { %v4480_v25 = vrot.slane %v4478_v36, 1  ;;  %v7336_v21 = vsel %vm3127_vm12, %v4742_v46, %v4743_v31  ;;  %v7346_v36 = vsel %vm3127_vm12, %v3137_v17, %v3138_v55  ;;  %v3168_v46 = vrot.slane %v6671_v24, 1 }
 0x41c   : > { %5962 = vmatmul.mubr.msk.bf16.gmra.mxu1 %vm764_vm1, %v7320_v28  ;;  %v3169_v31 = vrot.slane %v6798_v39, 1  ;;  %v7356_v0 = vsel %vm3127_vm12, %v3140_v56, %v3141_v47  ;;  %v7361_v30 = vsel %vm2650_vm11, %v2821_v18, %v2825_v60  ;;  %v3146_v39 = vrot.slane %v7147_v53, 1 }
 0x41d   : > { %v4481_v8 = vor.u32 %v4480_v25, %v4476_v20  ;;  %5965 = vmatprep.mubr.msk.bf16.mxu1 %vm764_vm1, %v7327_v12  ;;  %v3147_v41 = vrot.slane %v7173_v19, 1  ;;  %v3171_v17 = vrot.slane %v6659_v14, 1  ;;  %v3172_v60 = vrot.slane %v6800_v5, 1 }
 0x41e   : > { %v3170_v24 = vsel %vm3127_vm12, %v3168_v46, %v3169_v31  ;;  %v7374_v20 = vsel %vm3127_vm12, %v3143_v48, %v3144_v61  ;;  %v3174_v25 = vrot.slane %v6688_v33, 1  ;;  %v3175_v56 = vrot.slane %v6845_v57, 1  ;;  %v5546_v57 = vld [vmem:[%s8238_s7 + $0x8] sm:$0x3]  ;;  %v5555_v61 = vld [vmem:[%s8237_s6 + $0xa] sm:$0x3] }
 0x41f   : > { %v7351_v32 = vsel %vm2650_vm11, %v4481_v8, %v4485_v54  ;;  %5976 = vmatmul.mubr.msk.bf16.gmra.mxu0 %vm764_vm1, %v7346_v36  ;;  %v7381_v42 = vsel %vm3127_vm12, %v3146_v39, %v3147_v41  ;;  %v7386_v19 = vsel %vm3127_vm12, %v3171_v17, %v3172_v60  ;;  %v3149_v5 = vrot.slane %v7175_v43, 1 }
 0x420   : > { %5979 = vmatprep.mubr.msk.bf16.mxu0 %vm764_vm1, %v7356_v0  ;;  %v3603_v55 = vsel %vm2425_vm9, %v7254_v59, 0  ;;  %v7392_v8 = vsel %vm3127_vm12, %v3174_v25, %v3175_v56  ;;  %v3150_v54 = vrot.slane %v7213_v26, 1  ;;  %v3177_v47 = vrot.slane %v6698_v37, 1 }
 0x421   : > { %v3178_v59 = vrot.slane %v7205_v50, 1  ;;  %v3180_v46 = vrot.slane %v6716_v49, 1  ;;  %v3181_v31 = vrot.slane %v7217_v51, 1  ;;  %v3183_v51 = vrot.slane %v6725_v52, 1 }
 0x422   : > { %v7405_v18 = vsel %vm3127_vm12, %v3149_v5, %v3150_v54  ;;  %v3184_v48 = vrot.slane %v7244_v44, 1  ;;  %v3187_v39 = vrot.slane %v7249_v7, 1  ;;  %v3189_v7 = vrot.slane %v6767_v11, 1  ;;  %v5718_v5 = vld [vmem:[%s6638_s12 + $0x38] sm:$0xff]  }
 0x423   : > { %v7415_v26 = vsel %vm3127_vm12, %v3177_v47, %v3178_v59  ;;  %v7418_v50 = vsel %vm3127_vm12, %v3180_v46, %v3181_v31  ;;  %v3190_v41 = vrot.slane %v7294_v63, 1  ;;  %v2056_v60 = vcombine.low %v7067_v40, %v7077_v2  ;;  %v5573_v47 = vld [vmem:[%s8237_s6 + $0xc] sm:$0x3] }
 0x424   : > { %5966 = vmatmul.mubr.msk.bf16.gmra.mxu1 %vm764_vm1, %v7361_v30  ;;  %v7438_v44 = vsel %vm3127_vm12, %v3183_v51, %v3184_v48  ;;  %v2106_v25 = vcombine.low %v7011_v29, %v7018_v45  ;;  %v3867_v29 = vsel %vm2425_vm9, %v5546_v57, 0  ;;  %v5564_v45 = vld [vmem:[%s8238_s7 + $0xa] sm:$0x3]  ;;  %v3998_v54 = vsel %vm2425_vm9, %v5555_v61, 0  ;;  %v8302_v51 = vld [vmem:[#allocation3_spill] sm:$0xff] }
 0x425   : > { %5989 = vmatprep.mubr.msk.bf16.mxu1 %vm764_vm1, %v3170_v24  ;;  %v3746_v24 = vsel %vm2425_vm9, %v7310_v13, 0  ;;  %8299 = vst [vmem:[#allocation7_spill] sm:$0xff] %v7438_v44  ;;  %v7455_v17 = vsel %vm3127_vm12, %v3189_v7, %v3190_v41  ;;  %v2153_v63 = vrot.slane %v2056_v60, 7  ;;  %v8304_v41 = vld [vmem:[#allocation4_spill] sm:$0xff] }
 0x426   : > { %8301 = vst [vmem:[#allocation9_spill] sm:$0xff] %v7455_v17  ;;  %v2154_v56 = vrot.slane %v2106_v25, 7 }
 0x427   : > { %5980 = vmatmul.mubr.msk.bf16.gmra.mxu0 %vm764_vm1, %v7374_v20  ;;  %v2197_v2 = vsel %vm2128_vm10, 0.0, %v2153_v63 }
 0x428   : > { %5983 = vmatprep.mubr.msk.bf16.mxu0 %vm764_vm1, %v7381_v42  ;;  %v2155_v40 = vsel %vm2128_vm10, %v2153_v63, %v2154_v56 }
 0x42c   : > { %5990 = vmatmul.mubr.msk.bf16.vlgmr.msra.gmra.mxu1 %vm764_vm1, %v7386_v19 }
 0x42d   : > { %6024 = vmatpush3.bf16.msra.mxu1 %v3603_v55  ;;  %5993 = vmatprep.mubr.msk.bf16.mxu1 %vm764_vm1, %v7392_v8  ;;  %v5706_v55 = vunpack.c.l.bf16 %v5718_v5 }
 0x42e   : > { %6230 = vmatprep.subr.msk.bf16.mxu1 %vm2425_vm9, %v5546_v57  ;;  %v5707_v57 = vunpack.c.h.bf16 %v5718_v5 }
 0x42f   : > { %5984 = vmatmul.mubr.msk.bf16.gmra.mxu0 %vm764_vm1, %v7405_v18 }
 0x430   : > { %6007 = vmatprep.mubr.msk.bf16.mxu0 %vm764_vm1, %v7032_v23  ;;  %v3186_v23 = vrot.slane %v6758_v4, 1  ;;  %v2324_v59 = vrot.slane %v5707_v57, 7  ;;  %v4240_v57 = vsel %vm2425_vm9, %v5573_v47, 0 }
 0x432   : > { %v7442_v13 = vsel %vm3127_vm12, %v3186_v23, %v3187_v39 }
 0x433   : > { %8300 = vst [vmem:[#allocation8_spill] sm:$0xff] %v7442_v13 }
 0x434   : > { %5994 = vmatmul.mubr.msk.bf16.gmra.mxu1 %vm764_vm1, %v7415_v26 }
 0x435   : > { %5997 = vmatprep.mubr.msk.bf16.mxu1 %vm764_vm1, %v7418_v50 }
 0x437   : > { %6008 = vmatmul.mubr.msk.bf16.vlgmr.msra.gmra.mxu0 %vm764_vm1, %v7038_v16 }
 0x438   : > { %6011 = vmatprep.mubr.msk.bf16.mxu0 %vm764_vm1, %v7091_v1  ;;  %6042 = vmatpush3.bf16.msra.mxu0 %v3746_v24  ;;  %v2207_v24 = vsel %vm2128_vm10, %v2154_v56, 0.0  ;;  %v4119_v56 = vsel %vm2425_vm9, %v5564_v45, 0 }
 0x439   : > { %6231 = vmatprep.subr.msk.bf16.mxu0 %vm2425_vm9, %v5555_v61  ;;  %v2226_v39 = vpack.c.bf16 %v2207_v24, %v2207_v24  ;;  %v8303_v61 = vld [vmem:[#allocation5_spill] sm:$0xff] }
 0x43b   : > { %v3725_v25 = vshll.u32 %v2226_v39, 16 }
 0x43c   : > { %5998 = vmatmul.mubr.msk.bf16.gmra.mxu1 %vm764_vm1, %v7438_v44 }
 0x43d   : > { %6001 = vmatprep.mubr.msk.bf16.mxu1 %vm764_vm1, %v7442_v13 }
 0x43f   : > { %6012 = vmatmul.mubr.msk.bf16.gmra.mxu0 %vm764_vm1, %v7104_v9 }
 0x440   : > { %6015 = vmatprep.mubr.msk.bf16.mxu0 %vm764_vm1, %v7128_v27 }
 0x444   : > { %6002 = vmatmul.mubr.msk.bf16.gmra.mxu1 %vm764_vm1, %v7455_v17 }
 0x445   : > { %6025 = vmatprep.mubr.msk.bf16.mxu1 %vm764_vm1, %v6659_v14  ;;  %v7477_v14 = vpack.c.bf16 %v2155_v40, %v2197_v2  ;;  %v5582_v40 = vld [vmem:[%s8238_s7 + $0xc] sm:$0x3]  ;;  %v3727_v2 = vrot.slane %v3725_v25, 1 }
 0x447   : > { %6016 = vmatmul.mubr.msk.bf16.gmra.mxu0 %vm764_vm1, %v7147_v53  ;;  %v3720_v23 = vshll.u32 %v7477_v14, 16  ;;  %v3718_v60 = vshrl.u32 %v7477_v14, 16  ;;  %v3984_v25 = vrot.slane %v7477_v14, 1 }
 0x448   : > { %6019 = vmatprep.mubr.msk.bf16.mxu0 %vm764_vm1, %v7175_v43 }
 0x449   : > { %v3722_v7 = vrot.slane %v3720_v23, 1 }
 0x44b   : > { %v3723_v63 = vor.u32 %v3722_v7, %v3718_v60 }
 0x44c   : > { %6026 = vmatmul.mubr.msk.bf16.vlgmr.msra.gmra.mxu1 %vm764_vm1, %v6688_v33 }
 0x44d   : > { %6060 = vmatpush3.bf16.msra.mxu1 %v3867_v29  ;;  %6029 = vmatprep.mubr.msk.bf16.mxu1 %vm764_vm1, %v6698_v37  ;;  %v7532_v29 = vsel %vm2650_vm11, %v3723_v63, %v3727_v2  ;;  %v4361_v63 = vsel %vm2425_vm9, %v5582_v40, 0  ;;  %v5600_v2 = vld [vmem:[%s8238_s7 + $0xe] sm:$0x3] }
 0x44e   : > { %6232 = vmatprep.subr.msk.bf16.mxu1 %vm2425_vm9, %v5564_v45  ;;  %v2377_v45 = vsel %vm2128_vm10, %v2324_v59, 0.0 }
 0x44f   : > { %6020 = vmatmul.mubr.msk.bf16.gmra.mxu0 %vm764_vm1, %v7477_v14  ;;  %v7544_v5 = vpack.c.bf16 %v2377_v45, %v2377_v45 }
 0x450   : > { %6043 = vmatprep.mubr.msk.bf16.mxu0 %vm764_vm1, %v7113_v35  ;;  %v2323_v35 = vrot.slane %v5706_v55, 7 }
 0x452   : > { %v2325_v46 = vsel %vm2128_vm10, %v2323_v35, %v2324_v59  ;;  %v2367_v31 = vsel %vm2128_vm10, 0.0, %v2323_v35 }
 0x453   : > { %v7510_v48 = vpack.c.bf16 %v2325_v46, %v2367_v31  ;;  %v3736_v46 = vshll.u32 %v7544_v5, 16 }
 0x454   : > { %6030 = vmatmul.mubr.msk.bf16.gmra.mxu1 %vm764_vm1, %v6716_v49 }
 0x455   : > { %6033 = vmatprep.mubr.msk.bf16.mxu1 %vm764_vm1, %v6725_v52  ;;  %v3731_v55 = vshll.u32 %v7510_v48, 16  ;;  %v3729_v35 = vshrl.u32 %v7510_v48, 16  ;;  %v3738_v24 = vrot.slane %v3736_v46, 1 }
 0x457   : > { %6044 = vmatmul.mubr.msk.bf16.vlgmr.msra.gmra.mxu0 %vm764_vm1, %v7140_v58  ;;  %v3733_v59 = vrot.slane %v3731_v55, 1 }
 0x458   : > { %6047 = vmatprep.mubr.msk.bf16.mxu0 %vm764_vm1, %v7168_v3  ;;  %6078 = vmatpush3.bf16.msra.mxu0 %v3998_v54  ;;  %v5591_v54 = vld [vmem:[%s8237_s6 + $0xe] sm:$0x3] }
 0x459   : > { %6233 = vmatprep.subr.msk.bf16.mxu0 %vm2425_vm9, %v5573_v47  ;;  %v3734_v31 = vor.u32 %v3733_v59, %v3729_v35  ;;  %v4504_v55 = vsel %vm2425_vm9, %v5591_v54, 0  ;;  %v3990_v35 = vrot.slane %v7544_v5, 1 }
 0x45c   : > { %6034 = vmatmul.mubr.msk.bf16.gmra.mxu1 %vm764_vm1, %v6758_v4 }
 0x45d   : > { %6037 = vmatprep.mubr.msk.bf16.mxu1 %vm764_vm1, %v6767_v11 }
 0x45f   : > { %6048 = vmatmul.mubr.msk.bf16.gmra.mxu0 %vm764_vm1, %v7186_v34 }
 0x460   : > { %6051 = vmatprep.mubr.msk.bf16.mxu0 %vm764_vm1, %v8302_v51 }
 0x464   : > { %6038 = vmatmul.mubr.msk.bf16.gmra.mxu1 %vm764_vm1, %v7510_v48 }
 0x465   : > { %6061 = vmatprep.mubr.msk.bf16.mxu1 %vm764_vm1, %v8303_v61  ;;  %v7573_v61 = vsel %vm2650_vm11, %v3734_v31, %v3738_v24  ;;  %v5709_v31 = vld [vmem:[%s565_s1] sm:$0xff]   ;;  %v8307_v24 = vld [vmem:[#allocation6_spill] sm:$0xff] }
 0x467   : > { %6052 = vmatmul.mubr.msk.bf16.gmra.mxu0 %vm764_vm1, %v8304_v41 }
 0x468   : > { %6055 = vmatprep.mubr.msk.bf16.mxu0 %vm764_vm1, %v7264_v6 }
 0x46c   : > { %6062 = vmatmul.mubr.msk.bf16.vlgmr.msra.gmra.mxu1 %vm764_vm1, %v7241_v62 }
 0x46d   : > { %6096 = vmatpush3.bf16.msra.mxu1 %v4119_v56  ;;  %6065 = vmatprep.mubr.msk.bf16.mxu1 %vm764_vm1, %v7278_v22 }
 0x46e   : > { %6234 = vmatprep.subr.msk.bf16.mxu1 %vm2425_vm9, %v5582_v40 }
 0x46f   : > { %6056 = vmatmul.mubr.msk.bf16.gmra.mxu0 %vm764_vm1, %v7532_v29 }
 0x470   : > { %6079 = vmatprep.mubr.msk.bf16.mxu0 %vm764_vm1, %v7305_v38  ;;  %v7553_v38 = vpop.f32.mrf.mxu0 }
 0x472   : > { %v7560_v47 = vpop.f32.mrf.mxu0 }
 0x474   : > { %6066 = vmatmul.mubr.msk.bf16.gmra.mxu1 %vm764_vm1, %v7281_v15  ;;  %v7568_v23 = vpop.f32.mrf.mxu0 }
 0x475   : > { %6069 = vmatprep.mubr.msk.bf16.mxu1 %vm764_vm1, %v7320_v28 }
 0x476   : > { %v7575_v7 = vpop.f32.mrf.mxu0 }
 0x477   : > { %6080 = vmatmul.mubr.msk.bf16.vlgmr.msra.gmra.mxu0 %vm764_vm1, %v7317_v10 }
 0x478   : > { %6083 = vmatprep.mubr.msk.bf16.mxu0 %vm764_vm1, %v7346_v36  ;;  %6114 = vmatpush3.bf16.msra.mxu0 %v4240_v57  ;;  %v7583_v60 = vpop.f32.mrf.mxu0 }
 0x479   : > { %6235 = vmatprep.subr.msk.bf16.mxu0 %vm2425_vm9, %v5591_v54 }
 0x47a   : > { %v7589_v56 = vpop.f32.mrf.mxu0 }
 0x47c   : > { %6070 = vmatmul.mubr.msk.bf16.gmra.mxu1 %vm764_vm1, %v7327_v12  ;;  %v7604_v40 = vpop.f32.mrf.mxu0 }
 0x47d   : > { %6073 = vmatprep.mubr.msk.bf16.mxu1 %vm764_vm1, %v7361_v30 }
 0x47f   : > { %6084 = vmatmul.mubr.msk.bf16.gmra.mxu0 %vm764_vm1, %v7356_v0 }
 0x480   : > { %6087 = vmatprep.mubr.msk.bf16.mxu0 %vm764_vm1, %v7374_v20 }
 0x484   : > { %6074 = vmatmul.mubr.msk.bf16.gmra.mxu1 %vm764_vm1, %v7573_v61 }
 0x485   : > { %6097 = vmatprep.mubr.msk.bf16.mxu1 %vm764_vm1, %v7386_v19  ;;  %v3985_v19 = vrot.slane %v2226_v39, 1  ;;  %v7608_v39 = vpop.f32.mrf.mxu0 }
 0x487   : > { %6088 = vmatmul.mubr.msk.bf16.gmra.mxu0 %vm764_vm1, %v7381_v42  ;;  %v7599_v45 = vsel %vm3127_vm12, %v3984_v25, %v3985_v19  ;;  %v7625_v57 = vpop.f32.mrf.mxu0 }
 0x488   : > { %6091 = vmatprep.mubr.msk.bf16.mxu0 %vm764_vm1, %v7405_v18 }
 0x489   : > { %v7632_v54 = vpop.f32.mrf.mxu0 }
 0x48c   : > { %6098 = vmatmul.mubr.msk.bf16.vlgmr.msra.gmra.mxu1 %vm764_vm1, %v7392_v8 }
 0x48d   : > { %6132 = vmatpush3.bf16.msra.mxu1 %v4361_v63  ;;  %6101 = vmatprep.mubr.msk.bf16.mxu1 %vm764_vm1, %v7415_v26 }
 0x48e   : > { %6236 = vmatprep.subr.msk.bf16.mxu1 %vm2425_vm9, %v5600_v2 }
 0x48f   : > { %6092 = vmatmul.mubr.msk.bf16.gmra.mxu0 %vm764_vm1, %v7599_v45 }
 0x490   : > { %6115 = vmatprep.mubr.msk.bf16.mxu0 %vm764_vm1, %v7038_v16  ;;  %v5609_v16 = vld [vmem:[%s8237_s6 + $0x10] sm:$0x3] }
 0x494   : > { %6102 = vmatmul.mubr.msk.bf16.gmra.mxu1 %vm764_vm1, %v7418_v50 }
 0x495   : > { %6105 = vmatprep.mubr.msk.bf16.mxu1 %vm764_vm1, %v7438_v44 }
 0x497   : > { %6116 = vmatmul.mubr.msk.bf16.vlgmr.msra.gmra.mxu0 %vm764_vm1, %v7091_v1  ;;  %v3989_v1 = vrot.slane %v7510_v48, 1 }
 0x498   : > { %6119 = vmatprep.mubr.msk.bf16.mxu0 %vm764_vm1, %v7104_v9  ;;  %6150 = vmatpush3.bf16.msra.mxu0 %v4504_v55  ;;  %v7644_v9 = vpop.f32.mrf.mxu0  ;;  %v2276_v55 = vstv %s2232_s13 }
 0x499   : > { %6237 = vmatprep.subr.msk.bf16.mxu0 %vm2425_vm9, %v5609_v16  ;;  %v7649_v59 = vsel %vm3127_vm12, %v3989_v1, %v3990_v35 }
 0x49a   : > { %8306 = vst [vmem:[#allocation3_spill] sm:$0xff] %v7649_v59  ;;  %v7651_v46 = vpop.f32.mrf.mxu0 }
 0x49c   : > { %6106 = vmatmul.mubr.msk.bf16.gmra.mxu1 %vm764_vm1, %v7442_v13 }
 0x49d   : > { %6109 = vmatprep.mubr.msk.bf16.mxu1 %vm764_vm1, %v7455_v17 }
 0x49f   : > { %6120 = vmatmul.mubr.msk.bf16.gmra.mxu0 %vm764_vm1, %v7128_v27  ;;  %v7660_v27 = vpop.f32.mrf.mxu0 }
 0x4a0   : > { %6123 = vmatprep.mubr.msk.bf16.mxu0 %vm764_vm1, %v7147_v53  ;;  %v4625_v53 = vsel %vm2425_vm9, %v5600_v2, 0  ;;  %v5711_v2 = vunpack.c.h.bf16 %v5709_v31 }
 0x4a1   : > { %v7666_v5 = vpop.f32.mrf.mxu0 }
 0x4a3   : > { %v7684_v25 = vpop.f32.mrf.mxu0 }
 0x4a4   : > { %6110 = vmatmul.mubr.msk.bf16.gmra.mxu1 %vm764_vm1, %v7649_v59 }
 0x4a5   : > { %6133 = vmatprep.mubr.msk.bf16.mxu1 %vm764_vm1, %v6688_v33  ;;  %v7674_v33 = vld [vmem:[%s8238_s7 + $0x10] sm:$0x3] }
 0x4a7   : > { %6124 = vmatmul.mubr.msk.bf16.gmra.mxu0 %vm764_vm1, %v7175_v43 }
 0x4a8   : > { %6127 = vmatprep.mubr.msk.bf16.mxu0 %vm764_vm1, %v7477_v14 }
 0x4ac   : > { %v5919_v43 = vpop.f32.mrf.mxu1  ;;  %6134 = vmatmul.mubr.msk.bf16.vlgmr.msra.gmra.mxu1 %vm764_vm1, %v6698_v37  ;;  %v5710_v37 = vunpack.c.l.bf16 %v5709_v31 }
 0x4ad   : > { %6168 = vmatpush3.bf16.msra.mxu1 %v4625_v53  ;;  %6137 = vmatprep.mubr.msk.bf16.mxu1 %vm764_vm1, %v6716_v49  ;;  %v7688_v49 = vpop.f32.mrf.mxu0  ;;  %v7694_v53 = vmul.f32 %v5711_v2, %v2276_v55 }
 0x4ae   : > { %v2587_v14 = vpop.f32.mrf.mxu1  ;;  %6238 = vmatprep.subr.msk.bf16.mxu1 %vm2425_vm9, %v7674_v33  ;;  %v2277_v35 = vmul.f32 %v5710_v37, %v2276_v55 }
 0x4af   : > { %6128 = vmatmul.mubr.msk.bf16.gmra.mxu0 %vm764_vm1, %v8307_v24  ;;  %v4756_v24 = vsel %vm2425_vm9, %v5609_v16, 0  ;;  %v2588_v17 = vadd.f32 %v2587_v14, %v7560_v47  ;;  %v2327_v2 = vrot.slane %v7694_v53, 7 }
 0x4b0   : > { %6151 = vmatprep.mubr.msk.bf16.mxu0 %vm764_vm1, %v7140_v58  ;;  %v5920_v63 = vpop.f32.mrf.mxu1  ;;  %v2596_v58 = vadd.f32 %v5919_v43, %v7553_v38  ;;  %v2326_v37 = vrot.slane %v2277_v35, 7 }
 0x4b1   : > { %v2599_v16 = vadd.f32 %v5920_v63, %v7568_v23 }
 0x4b2   : > { %v2590_v19 = vpop.f32.mrf.mxu1  ;;  %v2328_v14 = vsel %vm2128_vm10, %v2326_v37, %v2327_v2 }
 0x4b3   : > { %v2591_v44 = vadd.f32 %v2590_v19, %v7575_v7 }
 0x4b4   : > { %v5923_v1 = vpop.f32.mrf.mxu1  ;;  %6138 = vmatmul.mubr.msk.bf16.gmra.mxu1 %vm764_vm1, %v6725_v52 }
 0x4b5   : > { %6141 = vmatprep.mubr.msk.bf16.mxu1 %vm764_vm1, %v6758_v4  ;;  %v2612_v23 = vadd.f32 %v5923_v1, %v7583_v60 }
 0x4b6   : > { %v2603_v59 = vpop.f32.mrf.mxu1 }
 0x4b7   : > { %v5937_v31 = vpop.f32.mrf.mxu0  ;;  %6152 = vmatmul.mubr.msk.bf16.vlgmr.msra.gmra.mxu0 %vm764_vm1, %v7168_v3 }
 0x4b8   : > { %v2955_v13 = vadd.f32 %v5937_v31, %v2596_v58  ;;  %6155 = vmatprep.mubr.msk.bf16.mxu0 %vm764_vm1, %v7186_v34  ;;  %v5924_v52 = vpop.f32.mrf.mxu1  ;;  %6186 = vmatpush3.bf16.msra.mxu0 %v4756_v24 }
 0x4b9   : > { %v2890_v4 = vpop.f32.mrf.mxu0  ;;  %v2615_v31 = vadd.f32 %v5924_v52, %v7604_v40 }
 0x4ba   : > { %v2953_v38 = vadd.f32 %v2890_v4, %v2588_v17  ;;  %v2606_v43 = vpop.f32.mrf.mxu1  ;;  %v2368_v17 = vsel %vm2128_vm10, 0.0, %v2326_v37 }
 0x4bb   : > { %v5938_v55 = vpop.f32.mrf.mxu0  ;;  %v7722_v24 = vpack.c.bf16 %v2328_v14, %v2368_v17  ;;  %v2607_v1 = vadd.f32 %v2606_v43, %v7608_v39 }
 0x4bc   : > { %v7706_v3 = vadd.f32 %v5938_v55, %v2599_v16  ;;  %v5927_v47 = vpop.f32.mrf.mxu1  ;;  %6142 = vmatmul.mubr.msk.bf16.gmra.mxu1 %vm764_vm1, %v6767_v11  ;;  %v2604_v11 = vadd.f32 %v2603_v59, %v7589_v56 }
 0x4bd   : > { %v2893_v34 = vpop.f32.mrf.mxu0  ;;  %6145 = vmatprep.mubr.msk.bf16.mxu1 %vm764_vm1, %v7510_v48 }
 0x4be   : > { %v2954_v63 = vadd.f32 %v2893_v34, %v2591_v44  ;;  %v2619_v7 = vpop.f32.mrf.mxu1 }
 0x4bf   : > { %v5941_v19 = vpop.f32.mrf.mxu0  ;;  %6156 = vmatmul.mubr.msk.bf16.gmra.mxu0 %vm764_vm1, %v8302_v51  ;;  %v2620_v39 = vadd.f32 %v2619_v7, %v7632_v54 }
 0x4c0   : > { %v2959_v35 = vadd.f32 %v5941_v19, %v2612_v23  ;;  %6159 = vmatprep.mubr.msk.bf16.mxu0 %vm764_vm1, %v8304_v41  ;;  %v5928_v48 = vpop.f32.mrf.mxu1  ;;  %v2628_v41 = vadd.f32 %v5927_v47, %v7625_v57  ;;  %v4877_v47 = vsel %vm2425_vm9, %v7674_v33, 0 }
 0x4c1   : > { %v2906_v58 = vpop.f32.mrf.mxu0 }
 0x4c2   : > { %v7725_v4 = vadd.f32 %v2906_v58, %v2604_v11  ;;  %v2622_v44 = vpop.f32.mrf.mxu1 }
 0x4c3   : > { %v5942_v60 = vpop.f32.mrf.mxu0  ;;  %v2623_v54 = vadd.f32 %v2622_v44, %v7651_v46 }
 0x4c4   : > { %v7728_v37 = vadd.f32 %v5942_v60, %v2615_v31  ;;  %v5931_v51 = vpop.f32.mrf.mxu1  ;;  %6146 = vmatmul.mubr.msk.bf16.gmra.mxu1 %vm764_vm1, %v7722_v24 }
 0x4c5   : > { %v2909_v56 = vpop.f32.mrf.mxu0  ;;  %6169 = vmatprep.mubr.msk.bf16.mxu1 %vm764_vm1, %v7241_v62  ;;  %v2631_v62 = vadd.f32 %v5928_v48, %v7644_v9  ;;  %v2644_v9 = vadd.f32 %v5931_v51, %v7660_v27 }
 0x4c6   : > { %v7735_v59 = vadd.f32 %v2909_v56, %v2607_v1  ;;  %v2635_v40 = vpop.f32.mrf.mxu1 }
 0x4c7   : > { %v5945_v52 = vpop.f32.mrf.mxu0  ;;  %6160 = vmatmul.mubr.msk.bf16.gmra.mxu0 %vm764_vm1, %v7264_v6  ;;  %v2636_v11 = vadd.f32 %v2635_v40, %v7666_v5 }
 0x4c8   : > { %v7740_v16 = vadd.f32 %v5945_v52, %v2628_v41  ;;  %6163 = vmatprep.mubr.msk.bf16.mxu0 %vm764_vm1, %v7532_v29  ;;  %v5932_v43 = vpop.f32.mrf.mxu1  ;;  %v4487_v41 = vshrl.u32 %v7722_v24, 16 }
 0x4c9   : > { %v2922_v55 = vpop.f32.mrf.mxu0  ;;  %v2647_v27 = vadd.f32 %v5932_v43, %v7684_v25 }
 0x4ca   : > { %v7745_v34 = vadd.f32 %v2922_v55, %v2620_v39  ;;  %v2638_v57 = vpop.f32.mrf.mxu1 }
 0x4cb   : > { %v5946_v14 = vpop.f32.mrf.mxu0  ;;  %v2639_v6 = vadd.f32 %v2638_v57, %v7688_v49 }
 0x4cc   : > { %v7751_v17 = vadd.f32 %v5946_v14, %v2631_v62  ;;  %v5955_v23 = vpop.f32.mrf.mxu1  ;;  %6170 = vmatmul.mubr.msk.bf16.vlgmr.msra.gmra.mxu1 %vm764_vm1, %v7278_v22 }
 0x4cd   : > { %v2925_v29 = vpop.f32.mrf.mxu0  ;;  %v3097_v7 = vadd.f32 %v5955_v23, %v2955_v13  ;;  %6204 = vmatpush3.bf16.msra.mxu1 %v4877_v47  ;;  %6173 = vmatprep.mubr.msk.bf16.mxu1 %vm764_vm1, %v7281_v15 }
 0x4ce   : > { %v7758_v33 = vadd.f32 %v2925_v29, %v2623_v54  ;;  %v3032_v19 = vpop.f32.mrf.mxu1 }
 0x4cf   : > { %v5949_v49 = vpop.f32.mrf.mxu0  ;;  %6164 = vmatmul.mubr.msk.bf16.gmra.mxu0 %vm764_vm1, %v7351_v32  ;;  %v3095_v46 = vadd.f32 %v3032_v19, %v2953_v38  ;;  %v2378_v32 = vsel %vm2128_vm10, %v2327_v2, 0.0 }
 0x4d0   : > { %v7763_v48 = vadd.f32 %v5949_v49, %v2644_v9  ;;  %6187 = vmatprep.mubr.msk.bf16.mxu0 %vm764_vm1, %v7317_v10  ;;  %v5956_v22 = vpop.f32.mrf.mxu1  ;;  %v7780_v25 = vpack.c.bf16 %v2378_v32, %v2378_v32 }
 0x4d1   : > { %v2938_v13 = vpop.f32.mrf.mxu0  ;;  %v3098_v15 = vadd.f32 %v5956_v22, %v7706_v3  ;;  %v4489_v3 = vshll.u32 %v7722_v24, 16 }
 0x4d2   : > { %v7769_v58 = vadd.f32 %v2938_v13, %v2636_v11  ;;  %v3035_v31 = vpop.f32.mrf.mxu1  ;;  %v4494_v52 = vshll.u32 %v7780_v25, 16 }
 0x4d3   : > { %v5950_v38 = vpop.f32.mrf.mxu0  ;;  %v3096_v5 = vadd.f32 %v3035_v31, %v2954_v63  ;;  %v4491_v40 = vrot.slane %v4489_v3, 1 }
 0x4d4   : > { %v7774_v44 = vadd.f32 %v5950_v38, %v2647_v27  ;;  %v5959_v60 = vpop.f32.mrf.mxu1  ;;  %6174 = vmatmul.mubr.msk.bf16.gmra.mxu1 %vm764_vm1, %v7320_v28  ;;  %v4496_v47 = vrot.slane %v4494_v52, 1  ;;  %v8309_v52 = vld [vmem:[#allocation8_spill] sm:$0xff] }
 0x4d5   : > { %v2941_v10 = vpop.f32.mrf.mxu0  ;;  %v3101_v1 = vadd.f32 %v5959_v60, %v2959_v35  ;;  %6177 = vmatprep.mubr.msk.bf16.mxu1 %vm764_vm1, %v7327_v12 }
 0x4d6   : > { %v2966_v53 = vadd.f32 %v2941_v10, %v2639_v6  ;;  %v3048_v51 = vpop.f32.mrf.mxu1 }
 0x4d7   : > { %v5973_v2 = vpop.f32.mrf.mxu0  ;;  %6188 = vmatmul.mubr.msk.bf16.vlgmr.msra.gmra.mxu0 %vm764_vm1, %v7346_v36  ;;  %v3099_v63 = vadd.f32 %v3048_v51, %v7725_v4 }
 0x4d8   : > { %v3320_v56 = vadd.f32 %v5973_v2, %v3097_v7  ;;  %6191 = vmatprep.mubr.msk.bf16.mxu0 %vm764_vm1, %v7356_v0  ;;  %v5960_v28 = vpop.f32.mrf.mxu1 }
 0x4d9   : > { %v3255_v35 = vpop.f32.mrf.mxu0  ;;  %v3102_v12 = vadd.f32 %v5960_v28, %v7728_v37  ;;  %v4492_v37 = vor.u32 %v4491_v40, %v4487_v41  ;;  %v8308_v41 = vld [vmem:[#allocation7_spill] sm:$0xff] }
 0x4da   : > { %v3318_v39 = vadd.f32 %v3255_v35, %v3095_v46  ;;  %v3051_v43 = vpop.f32.mrf.mxu1 }
 0x4db   : > { %v5974_v55 = vpop.f32.mrf.mxu0  ;;  %v3100_v36 = vadd.f32 %v3051_v43, %v7735_v59 }
 0x4dc   : > { %v3321_v62 = vadd.f32 %v5974_v55, %v3098_v15  ;;  %v5963_v4 = vpop.f32.mrf.mxu1  ;;  %6178 = vmatmul.mubr.msk.bf16.gmra.mxu1 %vm764_vm1, %v7361_v30 }
 0x4dd   : > { %v3258_v0 = vpop.f32.mrf.mxu0  ;;  %v3105_v57 = vadd.f32 %v5963_v4, %v7740_v16  ;;  %6181 = vmatprep.mubr.msk.bf16.mxu1 %vm764_vm1, %v7573_v61  ;;  %v4497_v61 = vsel %vm2650_vm11, %v4492_v37, %v4496_v47 }
 0x4de   : > { %v3319_v14 = vadd.f32 %v3258_v0, %v3096_v5  ;;  %v3064_v6 = vpop.f32.mrf.mxu1 }
 0x4df   : > { %v5977_v54 = vpop.f32.mrf.mxu0  ;;  %6192 = vmatmul.mubr.msk.bf16.gmra.mxu0 %vm764_vm1, %v7374_v20  ;;  %v3103_v59 = vadd.f32 %v3064_v6, %v7745_v34 }
 0x4e0   : > { %v3324_v23 = vadd.f32 %v5977_v54, %v3101_v1  ;;  %6195 = vmatprep.mubr.msk.bf16.mxu0 %vm764_vm1, %v7381_v42  ;;  %v5964_v30 = vpop.f32.mrf.mxu1 }
 0x4e1   : > { %v3271_v29 = vpop.f32.mrf.mxu0  ;;  %v3106_v16 = vadd.f32 %v5964_v30, %v7751_v17 }
 0x4e2   : > { %v3322_v7 = vadd.f32 %v3271_v29, %v3099_v63  ;;  %v3067_v9 = vpop.f32.mrf.mxu1  ;;  %v8311_v29 = vld [vmem:[#allocation3_spill] sm:$0xff] }
 0x4e3   : > { %v5978_v19 = vpop.f32.mrf.mxu0  ;;  %v3104_v49 = vadd.f32 %v3067_v9, %v7758_v33 }
 0x4e4   : > { %v3325_v46 = vadd.f32 %v5978_v19, %v3102_v12  ;;  %v5967_v11 = vpop.f32.mrf.mxu1  ;;  %6182 = vmatmul.mubr.msk.bf16.gmra.mxu1 %vm764_vm1, %v4497_v61  ;;  %v4748_v61 = vrot.slane %v7780_v25, 1 }
 0x4e5   : > { %v3274_v20 = vpop.f32.mrf.mxu0  ;;  %v3109_v34 = vadd.f32 %v5967_v11, %v7763_v48  ;;  %6205 = vmatprep.mubr.msk.bf16.mxu1 %vm764_vm1, %v7392_v8 }
 0x4e6   : > { %v3323_v42 = vadd.f32 %v3274_v20, %v3100_v36  ;;  %v3080_v22 = vpop.f32.mrf.mxu1 }
 0x4e7   : > { %v5981_v17 = vpop.f32.mrf.mxu0  ;;  %6196 = vmatmul.mubr.msk.bf16.gmra.mxu0 %vm764_vm1, %v7405_v18  ;;  %v3107_v13 = vadd.f32 %v3080_v22, %v7769_v58 }
 0x4e8   : > { %v3328_v15 = vadd.f32 %v5981_v17, %v3105_v57  ;;  %6199 = vmatprep.mubr.msk.bf16.mxu0 %vm764_vm1, %v7599_v45  ;;  %v5968_v33 = vpop.f32.mrf.mxu1 }
 0x4e9   : > { %v3287_v27 = vpop.f32.mrf.mxu0  ;;  %v3110_v31 = vadd.f32 %v5968_v33, %v7774_v44 }
 0x4ea   : > { %v3326_v48 = vadd.f32 %v3287_v27, %v3103_v59  ;;  %v3083_v32 = vpop.f32.mrf.mxu1  ;;  %v8310_v59 = vld [vmem:[#allocation9_spill] sm:$0xff] }
 0x4eb   : > { %v5982_v38 = vpop.f32.mrf.mxu0  ;;  %v3108_v8 = vadd.f32 %v3083_v32, %v2966_v53 }
 0x4ec   : > { %v3329_v5 = vadd.f32 %v5982_v38, %v3106_v16  ;;  %v5991_v60 = vpop.f32.mrf.mxu1  ;;  %6206 = vmatmul.mubr.msk.bf16.vlgmr.msra.gmra.mxu1 %vm764_vm1, %v7415_v26  ;;  %v4747_v16 = vrot.slane %v7722_v24, 1 }
 0x4ed   : > { %v3290_v18 = vpop.f32.mrf.mxu0  ;;  %v3462_v10 = vadd.f32 %v5991_v60, %v3320_v56  ;;  %6209 = vmatprep.mubr.msk.bf16.mxu1 %vm764_vm1, %v7418_v50 }
 0x4ee   : > { %v3327_v58 = vadd.f32 %v3290_v18, %v3104_v49  ;;  %v3397_v45 = vpop.f32.mrf.mxu1 }
 0x4ef   : > { %v5985_v1 = vpop.f32.mrf.mxu0  ;;  %6200 = vmatmul.mubr.msk.bf16.gmra.mxu0 %vm764_vm1, %v7336_v21  ;;  %v3460_v44 = vadd.f32 %v3397_v45, %v3318_v39 }
 0x4f0   : > { %v3332_v3 = vadd.f32 %v5985_v1, %v3109_v34  ;;  %v5992_v51 = vpop.f32.mrf.mxu1 }
 0x4f1   : > { %v3303_v53 = vpop.f32.mrf.mxu0  ;;  %v3463_v2 = vadd.f32 %v5992_v51, %v3321_v62 }
 0x4f2   : > { %v3330_v63 = vadd.f32 %v3303_v53, %v3107_v13  ;;  %v3400_v28 = vpop.f32.mrf.mxu1 }
 0x4f3   : > { %v5986_v35 = vpop.f32.mrf.mxu0  ;;  %v3461_v26 = vadd.f32 %v3400_v28, %v3319_v14 }
 0x4f4   : > { %v3333_v12 = vadd.f32 %v5986_v35, %v3110_v31  ;;  %v5995_v56 = vpop.f32.mrf.mxu1  ;;  %6210 = vmatmul.mubr.msk.bf16.gmra.mxu1 %vm764_vm1, %v8308_v41 }
 0x4f5   : > { %v3306_v50 = vpop.f32.mrf.mxu0  ;;  %v3466_v40 = vadd.f32 %v5995_v56, %v3324_v23  ;;  %6213 = vmatprep.mubr.msk.bf16.mxu1 %vm764_vm1, %v8309_v52 }
 0x4f6   : > { %v3331_v21 = vadd.f32 %v3306_v50, %v3108_v8  ;;  %v3413_v39 = vpop.f32.mrf.mxu1 }
 0x4f7   : > { %v6009_v43 = vpop.f32.mrf.mxu0  ;;  %v3464_v55 = vadd.f32 %v3413_v39, %v3322_v7 }
 0x4f8   : > { %v3583_v36 = vadd.f32 %v6009_v43, %v3462_v10  ;;  %v5996_v62 = vpop.f32.mrf.mxu1 }
 0x4f9   : > { %v3518_v4 = vpop.f32.mrf.mxu0  ;;  %v3467_v0 = vadd.f32 %v5996_v62, %v3325_v46 }
 0x4fa   : > { %v3581_v57 = vadd.f32 %v3518_v4, %v3460_v44  ;;  %v3416_v37 = vpop.f32.mrf.mxu1 }
 0x4fb   : > { %v6010_v47 = vpop.f32.mrf.mxu0  ;;  %v3465_v14 = vadd.f32 %v3416_v37, %v3323_v42  ;;  %v4749_v42 = vsel %vm3127_vm12, %v4747_v16, %v4748_v61 }
 0x4fc   : > { %v3584_v6 = vadd.f32 %v6010_v47, %v3463_v2  ;;  %v5999_v54 = vpop.f32.mrf.mxu1  ;;  %6214 = vmatmul.mubr.msk.bf16.gmra.mxu1 %vm764_vm1, %v8310_v59 }
 0x4fd   : > { %v3521_v23 = vpop.f32.mrf.mxu0  ;;  %v3470_v30 = vadd.f32 %v5999_v54, %v3328_v15  ;;  %6217 = vmatprep.mubr.msk.bf16.mxu1 %vm764_vm1, %v8311_v29 }
 0x4fe   : > { %v3582_v7 = vadd.f32 %v3521_v23, %v3461_v26  ;;  %v3429_v9 = vpop.f32.mrf.mxu1 }
 0x4ff   : > { %v6013_v19 = vpop.f32.mrf.mxu0  ;;  %v3468_v49 = vadd.f32 %v3429_v9, %v3326_v48 }
 0x500   : > { %v3587_v46 = vadd.f32 %v6013_v19, %v3466_v40  ;;  %v6000_v11 = vpop.f32.mrf.mxu1 }
 0x501   : > { %v3534_v20 = vpop.f32.mrf.mxu0  ;;  %v3471_v34 = vadd.f32 %v6000_v11, %v3329_v5 }
 0x502   : > { %v3585_v22 = vadd.f32 %v3534_v20, %v3464_v55  ;;  %v3432_v17 = vpop.f32.mrf.mxu1 }
 0x503   : > { %v6014_v13 = vpop.f32.mrf.mxu0  ;;  %v3469_v15 = vadd.f32 %v3432_v17, %v3327_v58 }
 0x504   : > { %v3588_v33 = vadd.f32 %v6014_v13, %v3467_v0  ;;  %v6003_v27 = vpop.f32.mrf.mxu1  ;;  %6218 = vmatmul.mubr.msk.bf16.gmra.mxu1 %vm764_vm1, %v4749_v42 }
 0x505   : > { %v3537_v24 = vpop.f32.mrf.mxu0  ;;  %v3474_v25 = vadd.f32 %v6003_v27, %v3332_v3 }
 0x506   : > { %v3586_v31 = vadd.f32 %v3537_v24, %v3465_v14  ;;  %v3445_v32 = vpop.f32.mrf.mxu1 }
 0x507   : > { %v6017_v38 = vpop.f32.mrf.mxu0  ;;  %v3472_v48 = vadd.f32 %v3445_v32, %v3330_v63 }
 0x508   : > { %v3591_v8 = vadd.f32 %v6017_v38, %v3470_v30  ;;  %v6004_v60 = vpop.f32.mrf.mxu1 }
 0x509   : > { %v3550_v18 = vpop.f32.mrf.mxu0  ;;  %v3475_v5 = vadd.f32 %v6004_v60, %v3333_v12 }
 0x50a   : > { %v3589_v10 = vadd.f32 %v3550_v18, %v3468_v49  ;;  %v3448_v45 = vpop.f32.mrf.mxu1 }
 0x50b   : > { %v6018_v1 = vpop.f32.mrf.mxu0  ;;  %v3473_v44 = vadd.f32 %v3448_v45, %v3331_v21 }
 0x50c   : > { %v3592_v51 = vadd.f32 %v6018_v1, %v3471_v34  ;;  %v6027_v58 = vpop.f32.mrf.mxu1 }
 0x50d   : > { %v3553_v53 = vpop.f32.mrf.mxu0  ;;  %v3704_v2 = vadd.f32 %v6027_v58, %v3583_v36 }
 0x50e   : > { %v3590_v28 = vadd.f32 %v3553_v53, %v3469_v15  ;;  %v3639_v35 = vpop.f32.mrf.mxu1 }
 0x50f   : > { %v6021_v26 = vpop.f32.mrf.mxu0  ;;  %v3702_v3 = vadd.f32 %v3639_v35, %v3581_v57 }
 0x510   : > { %v3595_v56 = vadd.f32 %v6021_v26, %v3474_v25  ;;  %v6028_v41 = vpop.f32.mrf.mxu1 }
 0x511   : > { %v3566_v50 = vpop.f32.mrf.mxu0  ;;  %v3705_v63 = vadd.f32 %v6028_v41, %v3584_v6 }
 0x512   : > { %v3593_v40 = vadd.f32 %v3566_v50, %v3472_v48  ;;  %v3642_v52 = vpop.f32.mrf.mxu1 }
 0x513   : > { %v6022_v39 = vpop.f32.mrf.mxu0  ;;  %v3703_v12 = vadd.f32 %v3642_v52, %v3582_v7 }
 0x514   : > { %v3596_v43 = vadd.f32 %v6022_v39, %v3475_v5  ;;  %v6031_v55 = vpop.f32.mrf.mxu1 }
 0x515   : > { %v3569_v62 = vpop.f32.mrf.mxu0  ;;  %v3708_v21 = vadd.f32 %v6031_v55, %v3587_v46 }
 0x516   : > { %v3594_v4 = vadd.f32 %v3569_v62, %v3473_v44  ;;  %v3655_v0 = vpop.f32.mrf.mxu1 }
 0x517   : > { %v6045_v37 = vpop.f32.mrf.mxu0  ;;  %v3706_v36 = vadd.f32 %v3655_v0, %v3585_v22 }
 0x518   : > { %v3847_v47 = vadd.f32 %v6045_v37, %v3704_v2  ;;  %v6032_v14 = vpop.f32.mrf.mxu1 }
 0x519   : > { %v3782_v54 = vpop.f32.mrf.mxu0  ;;  %v3709_v57 = vadd.f32 %v6032_v14, %v3588_v33 }
 0x51a   : > { %v3845_v59 = vadd.f32 %v3782_v54, %v3702_v3  ;;  %v3658_v23 = vpop.f32.mrf.mxu1 }
 0x51b   : > { %v6046_v30 = vpop.f32.mrf.mxu0  ;;  %v3707_v6 = vadd.f32 %v3658_v23, %v3586_v31 }
 0x51c   : > { %v3848_v29 = vadd.f32 %v6046_v30, %v3705_v63  ;;  %v6035_v16 = vpop.f32.mrf.mxu1 }
 0x51d   : > { %v3785_v61 = vpop.f32.mrf.mxu0  ;;  %v3712_v7 = vadd.f32 %v6035_v16, %v3591_v8 }
 0x51e   : > { %v3846_v9 = vadd.f32 %v3785_v61, %v3703_v12  ;;  %v3671_v19 = vpop.f32.mrf.mxu1 }
 0x51f   : > { %v6049_v49 = vpop.f32.mrf.mxu0  ;;  %v3710_v46 = vadd.f32 %v3671_v19, %v3589_v10 }
 0x520   : > { %v3851_v11 = vadd.f32 %v6049_v49, %v3708_v21  ;;  %v6036_v20 = vpop.f32.mrf.mxu1 }
 0x521   : > { %v3798_v34 = vpop.f32.mrf.mxu0  ;;  %v3713_v42 = vadd.f32 %v6036_v20, %v3592_v51 }
 0x522   : > { %v3849_v22 = vadd.f32 %v3798_v34, %v3706_v36  ;;  %v3674_v17 = vpop.f32.mrf.mxu1 }
 0x523   : > { %v6050_v13 = vpop.f32.mrf.mxu0  ;;  %v3711_v15 = vadd.f32 %v3674_v17, %v3590_v28 }
 0x524   : > { %v3852_v33 = vadd.f32 %v6050_v13, %v3709_v57  ;;  %v6039_v27 = vpop.f32.mrf.mxu1 }
 0x525   : > { %v3801_v24 = vpop.f32.mrf.mxu0  ;;  %v3716_v25 = vadd.f32 %v6039_v27, %v3595_v56 }
 0x526   : > { %v3850_v31 = vadd.f32 %v3801_v24, %v3707_v6  ;;  %v3687_v32 = vpop.f32.mrf.mxu1 }
 0x527   : > { %v6053_v38 = vpop.f32.mrf.mxu0  ;;  %v3714_v48 = vadd.f32 %v3687_v32, %v3593_v40 }
 0x528   : > { %v3855_v8 = vadd.f32 %v6053_v38, %v3712_v7  ;;  %v6040_v60 = vpop.f32.mrf.mxu1 }
 0x529   : > { %v3814_v18 = vpop.f32.mrf.mxu0  ;;  %v3717_v5 = vadd.f32 %v6040_v60, %v3596_v43 }
 0x52a   : > { %v3853_v10 = vadd.f32 %v3814_v18, %v3710_v46  ;;  %v3690_v45 = vpop.f32.mrf.mxu1 }
 0x52b   : > { %v6054_v1 = vpop.f32.mrf.mxu0  ;;  %v3715_v44 = vadd.f32 %v3690_v45, %v3594_v4 }
 0x52c   : > { %v3856_v51 = vadd.f32 %v6054_v1, %v3713_v42  ;;  %v6063_v58 = vpop.f32.mrf.mxu1 }
 0x52d   : > { %v3817_v53 = vpop.f32.mrf.mxu0  ;;  %v3968_v2 = vadd.f32 %v6063_v58, %v3847_v47 }
 0x52e   : > { %v3854_v28 = vadd.f32 %v3817_v53, %v3711_v15  ;;  %v3903_v35 = vpop.f32.mrf.mxu1 }
 0x52f   : > { %v6057_v26 = vpop.f32.mrf.mxu0  ;;  %v3966_v3 = vadd.f32 %v3903_v35, %v3845_v59 }
 0x530   : > { %v3859_v56 = vadd.f32 %v6057_v26, %v3716_v25  ;;  %v6064_v41 = vpop.f32.mrf.mxu1 }
 0x531   : > { %v3830_v50 = vpop.f32.mrf.mxu0  ;;  %v3969_v63 = vadd.f32 %v6064_v41, %v3848_v29 }
 0x532   : > { %v3857_v40 = vadd.f32 %v3830_v50, %v3714_v48  ;;  %v3906_v52 = vpop.f32.mrf.mxu1 }
 0x533   : > { %v6058_v39 = vpop.f32.mrf.mxu0  ;;  %v3967_v12 = vadd.f32 %v3906_v52, %v3846_v9 }
 0x534   : > { %v3860_v43 = vadd.f32 %v6058_v39, %v3717_v5  ;;  %v6067_v55 = vpop.f32.mrf.mxu1 }
 0x535   : > { %v3833_v62 = vpop.f32.mrf.mxu0  ;;  %v3972_v21 = vadd.f32 %v6067_v55, %v3851_v11 }
 0x536   : > { %v3858_v4 = vadd.f32 %v3833_v62, %v3715_v44  ;;  %v3919_v0 = vpop.f32.mrf.mxu1 }
 0x537   : > { %v6081_v37 = vpop.f32.mrf.mxu0  ;;  %v3970_v36 = vadd.f32 %v3919_v0, %v3849_v22 }
 0x538   : > { %v4099_v47 = vadd.f32 %v6081_v37, %v3968_v2  ;;  %v6068_v14 = vpop.f32.mrf.mxu1 }
 0x539   : > { %v4034_v54 = vpop.f32.mrf.mxu0  ;;  %v3973_v57 = vadd.f32 %v6068_v14, %v3852_v33 }
 0x53a   : > { %v4097_v59 = vadd.f32 %v4034_v54, %v3966_v3  ;;  %v3922_v23 = vpop.f32.mrf.mxu1 }
 0x53b   : > { %v6082_v30 = vpop.f32.mrf.mxu0  ;;  %v3971_v6 = vadd.f32 %v3922_v23, %v3850_v31 }
 0x53c   : > { %v4100_v29 = vadd.f32 %v6082_v30, %v3969_v63  ;;  %v6071_v16 = vpop.f32.mrf.mxu1 }
 0x53d   : > { %v4037_v61 = vpop.f32.mrf.mxu0  ;;  %v3976_v7 = vadd.f32 %v6071_v16, %v3855_v8 }
 0x53e   : > { %v4098_v9 = vadd.f32 %v4037_v61, %v3967_v12  ;;  %v3935_v19 = vpop.f32.mrf.mxu1 }
 0x53f   : > { %v6085_v49 = vpop.f32.mrf.mxu0  ;;  %v3974_v46 = vadd.f32 %v3935_v19, %v3853_v10 }
 0x540   : > { %v4103_v11 = vadd.f32 %v6085_v49, %v3972_v21  ;;  %v6072_v20 = vpop.f32.mrf.mxu1 }
 0x541   : > { %v4050_v34 = vpop.f32.mrf.mxu0  ;;  %v3977_v42 = vadd.f32 %v6072_v20, %v3856_v51 }
 0x542   : > { %v4101_v22 = vadd.f32 %v4050_v34, %v3970_v36  ;;  %v3938_v17 = vpop.f32.mrf.mxu1 }
 0x543   : > { %v6086_v13 = vpop.f32.mrf.mxu0  ;;  %v3975_v15 = vadd.f32 %v3938_v17, %v3854_v28 }
 0x544   : > { %v4104_v33 = vadd.f32 %v6086_v13, %v3973_v57  ;;  %v6075_v27 = vpop.f32.mrf.mxu1 }
 0x545   : > { %v4053_v24 = vpop.f32.mrf.mxu0  ;;  %v3980_v25 = vadd.f32 %v6075_v27, %v3859_v56 }
 0x546   : > { %v4102_v31 = vadd.f32 %v4053_v24, %v3971_v6  ;;  %v3951_v32 = vpop.f32.mrf.mxu1 }
 0x547   : > { %v6089_v38 = vpop.f32.mrf.mxu0  ;;  %v3978_v48 = vadd.f32 %v3951_v32, %v3857_v40 }
 0x548   : > { %v4107_v8 = vadd.f32 %v6089_v38, %v3976_v7  ;;  %v6076_v60 = vpop.f32.mrf.mxu1 }
 0x549   : > { %v4066_v18 = vpop.f32.mrf.mxu0  ;;  %v3981_v5 = vadd.f32 %v6076_v60, %v3860_v43 }
 0x54a   : > { %v4105_v10 = vadd.f32 %v4066_v18, %v3974_v46  ;;  %v3954_v45 = vpop.f32.mrf.mxu1 }
 0x54b   : > { %v6090_v1 = vpop.f32.mrf.mxu0  ;;  %v3979_v44 = vadd.f32 %v3954_v45, %v3858_v4 }
 0x54c   : > { %v4108_v51 = vadd.f32 %v6090_v1, %v3977_v42  ;;  %v6099_v58 = vpop.f32.mrf.mxu1 }
 0x54d   : > { %v4069_v53 = vpop.f32.mrf.mxu0  ;;  %v7833_v2 = vadd.f32 %v6099_v58, %v4099_v47 }
 0x54e   : > { %v4106_v28 = vadd.f32 %v4069_v53, %v3975_v15  ;;  %v4155_v35 = vpop.f32.mrf.mxu1 }
 0x54f   : > { %v6093_v26 = vpop.f32.mrf.mxu0  ;;  %v7835_v3 = vadd.f32 %v4155_v35, %v4097_v59 }
 0x550   : > { %v4111_v56 = vadd.f32 %v6093_v26, %v3980_v25  ;;  %v6100_v41 = vpop.f32.mrf.mxu1 }
 0x551   : > { %v4082_v50 = vpop.f32.mrf.mxu0  ;;  %v7837_v63 = vadd.f32 %v6100_v41, %v4100_v29 }
 0x552   : > { %v4109_v40 = vadd.f32 %v4082_v50, %v3978_v48  ;;  %v4158_v52 = vpop.f32.mrf.mxu1 }
 0x553   : > { %v6094_v39 = vpop.f32.mrf.mxu0  ;;  %v7839_v12 = vadd.f32 %v4158_v52, %v4098_v9 }
 0x554   : > { %v4112_v43 = vadd.f32 %v6094_v39, %v3981_v5  ;;  %v6103_v55 = vpop.f32.mrf.mxu1 }
 0x555   : > { %v4085_v62 = vpop.f32.mrf.mxu0  ;;  %v7841_v21 = vadd.f32 %v6103_v55, %v4103_v11 }
 0x556   : > { %v4110_v4 = vadd.f32 %v4085_v62, %v3979_v44  ;;  %v4171_v0 = vpop.f32.mrf.mxu1 }
 0x557   : > { %v7843_v37 = vpop.f32.mrf.mxu0  ;;  %v7845_v36 = vadd.f32 %v4171_v0, %v4101_v22 }
 0x558   : > { %v6104_v47 = vpop.f32.mrf.mxu1 }
 0x559   : > { %v7847_v14 = vpop.f32.mrf.mxu0  ;;  %v7849_v54 = vadd.f32 %v6104_v47, %v4104_v33 }
 0x55a   : > { %v4174_v57 = vpop.f32.mrf.mxu1 }
 0x55b   : > { %v7851_v59 = vpop.f32.mrf.mxu0  ;;  %v7853_v23 = vadd.f32 %v4174_v57, %v4102_v31 }
 0x55c   : > { %v6107_v30 = vpop.f32.mrf.mxu1 }
 0x55d   : > { %v7855_v6 = vpop.f32.mrf.mxu0  ;;  %v7857_v29 = vadd.f32 %v6107_v30, %v4107_v8 }
 0x55e   : > { %v4187_v16 = vpop.f32.mrf.mxu1 }
 0x55f   : > { %v7859_v61 = vpop.f32.mrf.mxu0  ;;  %v7861_v7 = vadd.f32 %v4187_v16, %v4105_v10 }
 0x560   : > { %v6108_v9 = vpop.f32.mrf.mxu1 }
 0x561   : > { %v7863_v19 = vpop.f32.mrf.mxu0  ;;  %v7865_v49 = vadd.f32 %v6108_v9, %v4108_v51 }
 0x562   : > { %v4190_v46 = vpop.f32.mrf.mxu1 }
 0x563   : > { %v7867_v11 = vpop.f32.mrf.mxu0  ;;  %v7869_v20 = vadd.f32 %v4190_v46, %v4106_v28 }
 0x564   : > { %v6111_v34 = vpop.f32.mrf.mxu1 }
 0x565   : > { %v7871_v42 = vpop.f32.mrf.mxu0  ;;  %v7873_v22 = vadd.f32 %v6111_v34, %v4111_v56 }
 0x566   : > { %v4203_v17 = vpop.f32.mrf.mxu1 }
 0x567   : > { %v7875_v13 = vpop.f32.mrf.mxu0  ;;  %v7877_v15 = vadd.f32 %v4203_v17, %v4109_v40 }
 0x568   : > { %v6112_v33 = vpop.f32.mrf.mxu1 }
 0x569   : > { %v7879_v27 = vpop.f32.mrf.mxu0  ;;  %v7881_v24 = vadd.f32 %v6112_v33, %v4112_v43 }
 0x56a   : > { %v4206_v25 = vpop.f32.mrf.mxu1 }
 0x56b   : > { %v7883_v31 = vpop.f32.mrf.mxu0  ;;  %v7885_v32 = vadd.f32 %v4206_v25, %v4110_v4 }
 0x56c   : > { %v7887_v38 = vpop.f32.mrf.mxu1 }
 0x56d   : > { %v7889_v48 = vpop.f32.mrf.mxu0 }
 0x56e   : > { %v7891_v8 = vpop.f32.mrf.mxu1 }
 0x56f   : > { %v7893_v60 = vpop.f32.mrf.mxu0 }
 0x570   : > { %v7895_v18 = vpop.f32.mrf.mxu1 }
 0x571   : > { %v7897_v5 = vpop.f32.mrf.mxu0 }
 0x572   : > { %v7899_v10 = vpop.f32.mrf.mxu1 }
 0x573   : > { %v7901_v45 = vpop.f32.mrf.mxu0 }
 0x574   : > { %v7903_v1 = vpop.f32.mrf.mxu1 }
 0x575   : > { %v7905_v44 = vpop.f32.mrf.mxu0 }
 0x576   : > { %v7907_v51 = vpop.f32.mrf.mxu1 }
 0x577   : > { %v7909_v58 = vpop.f32.mrf.mxu0 }
 0x578   : > { %v7911_v53 = vpop.f32.mrf.mxu1 }
 0x579   : > { %v7913_v28 = vpop.f32.mrf.mxu0 }
 0x57a   : > { %v7915_v35 = vpop.f32.mrf.mxu1 }
 0x57b   : > { %v7917_v26 = vpop.f32.mrf.mxu0 }
 0x57c   : > { %v7919_v56 = vpop.f32.mrf.mxu1 }
 0x57d   : > { %v7921_v41 = vpop.f32.mrf.mxu0 }
 0x57e   : > { %v7923_v50 = vpop.f32.mrf.mxu1 }
 0x57f   : > { %v7925_v40 = vpop.f32.mrf.mxu0 }
 0x580   : > { %v7927_v52 = vpop.f32.mrf.mxu1 }
 0x581   : > { %v7929_v39 = vpop.f32.mrf.mxu0 }
 0x582   : > { %v7931_v43 = vpop.f32.mrf.mxu1 }
 0x583   : > { %v7933_v55 = vpop.f32.mrf.mxu0 }
 0x584   : > { %v7935_v62 = vpop.f32.mrf.mxu1 }
 0x585   : > { %8312 = vst [vmem:[#allocation5_spill] sm:$0xff] %v7935_v62  ;;  %v7937_v4 = vpop.f32.mrf.mxu0 }
 0x586   : > { %v7939_v0 = vpop.f32.mrf.mxu1 }
 0x587   : > { %8313 = vst [vmem:[#allocation4_spill] sm:$0xff] %v7939_v0  ;;  %v7941_v47 = vpop.f32.mrf.mxu0 }
 0x588   : > { %8314 = vst [vmem:[#allocation6_spill] sm:$0xff] %v7941_v47  ;;  %v7943_v57 = vpop.f32.mrf.mxu1 }
 0x589   : > { %8315 = vst [vmem:[#allocation7_spill] sm:$0xff] %v7943_v57  ;;  %v7945_v30 = vpop.f32.mrf.mxu0 }
 0x58a   : > { %8316 = vst [vmem:[#allocation8_spill] sm:$0xff] %v7945_v30  ;;  %v7947_v16 = vpop.f32.mrf.mxu1 }
 0x58b   : > { %8317 = vst [vmem:[#allocation9_spill] sm:$0xff] %v7947_v16  ;;  %v7949_v9 = vpop.f32.mrf.mxu0 }
 0x58c   : > { %8318 = vst [vmem:[#allocation3_spill] sm:$0xff] %v7949_v9  ;;  %v7951_v46 = vpop.f32.mrf.mxu1 }
 0x58d   : > { %v7953_v34 = vpop.f32.mrf.mxu0 }
 0x58e   : > { %8319 = vst [vmem:[#allocation10_spill] sm:$0xff] %v7953_v34  ;;  %v7955_v17 = vpop.f32.mrf.mxu1 }
 0x58f   : > { %8320 = vst [vmem:[#allocation11_spill] sm:$0xff] %v7955_v17  ;;  %v7957_v33 = vpop.f32.mrf.mxu0 }
 0x590   : > { %8321 = vst [vmem:[#allocation12_spill] sm:$0xff] %v7957_v33  ;;  %v7959_v25 = vpop.f32.mrf.mxu1 }
 0x591   : > { %8322 = vst [vmem:[#allocation13_spill] sm:$0xff] %v7959_v25  ;;  %v7961_v0 = vpop.f32.mrf.mxu0 }
 0x592   : > { %8323 = vst [vmem:[#allocation14_spill] sm:$0xff] %v7961_v0  ;;  %v7963_v62 = vpop.f32.mrf.mxu1 }
 0x593   : > { %8324 = vst [vmem:[#allocation15_spill] sm:$0xff] %v7963_v62  ;;  %v7965_v57 = vpop.f32.mrf.mxu0 }
 0x594   : > { %8325 = vst [vmem:[#allocation16_spill] sm:$0xff] %v7965_v57  ;;  %v7967_v30 = vpop.f32.mrf.mxu1 }
 0x595   : > { %8326 = vst [vmem:[#allocation17_spill] sm:$0xff] %v7967_v30  ;;  %v7969_v16 = vpop.f32.mrf.mxu0 }
 0x596   : > { %8327 = vst [vmem:[#allocation18_spill] sm:$0xff] %v7969_v16  ;;  %v7971_v9 = vpop.f32.mrf.mxu1 }
 0x597   : > { %8328 = vst [vmem:[#allocation19_spill] sm:$0xff] %v7971_v9  ;;  %v7973_v47 = vpop.f32.mrf.mxu0  ;;  %v4341_v9 = vadd.f32 %v7843_v37, %v7833_v2  ;;  %v4346_v2 = vadd.f32 %v7867_v11, %v7849_v54  ;;  %v4348_v54 = vadd.f32 %v7889_v48, %v7869_v20  ;;  %v4352_v20 = vadd.f32 %v7905_v44, %v7885_v32 }
 0x598   : > { %v7975_v34 = vpop.f32.mrf.mxu1 }
 0x599   : > { %8329 = vst [vmem:[#allocation20_spill] sm:$0xff] %v7975_v34  ;;  %v7977_v17 = vpop.f32.mrf.mxu0  ;;  %v4339_v34 = vadd.f32 %v7847_v14, %v7835_v3  ;;  %v4344_v3 = vadd.f32 %v7871_v42, %v7853_v23  ;;  %v4462_v14 = vadd.f32 %v7887_v38, %v4341_v9  ;;  %v8341_v9 = vld [vmem:[#allocation3_spill] sm:$0xff] }
 0x59a   : > { %v7979_v33 = vpop.f32.mrf.mxu1 }
 0x59b   : > { %8330 = vst [vmem:[#allocation21_spill] sm:$0xff] %v7979_v33  ;;  %v7981_v25 = vpop.f32.mrf.mxu0  ;;  %v4342_v33 = vadd.f32 %v7851_v59, %v7837_v63  ;;  %v4349_v63 = vadd.f32 %v7875_v13, %v7857_v29  ;;  %v4353_v59 = vadd.f32 %v7893_v60, %v7873_v22  ;;  %v4460_v23 = vadd.f32 %v7891_v8, %v4339_v34  ;;  %v8342_v34 = vld [vmem:[#allocation10_spill] sm:$0xff] }
 0x59c   : > { %8331 = vst [vmem:[#allocation22_spill] sm:$0xff] %v7981_v25  ;;  %v7983_v0 = vpop.f32.mrf.mxu1  ;;  %v4605_v42 = vadd.f32 %v7909_v58, %v4462_v14  ;;  %v4467_v13 = vadd.f32 %v7911_v53, %v4346_v2  ;;  %v8335_v53 = vld [vmem:[#allocation6_spill] sm:$0xff] }
 0x59d   : > { %8332 = vst [vmem:[#allocation23_spill] sm:$0xff] %v7983_v0  ;;  %v7985_v62 = vpop.f32.mrf.mxu0  ;;  %v4340_v0 = vadd.f32 %v7855_v6, %v7839_v12  ;;  %v4347_v12 = vadd.f32 %v7879_v27, %v7861_v7  ;;  %v4463_v6 = vadd.f32 %v7895_v18, %v4342_v33  ;;  %v4354_v7 = vadd.f32 %v7901_v45, %v7881_v24  ;;  %v8343_v33 = vld [vmem:[#allocation9_spill] sm:$0xff]  ;;  %v8345_v14 = vld [vmem:[#allocation14_spill] sm:$0xff] }
 0x59e   : > { %v7987_v57 = vpop.f32.mrf.mxu1  ;;  %v4470_v38 = vadd.f32 %v7919_v56, %v4349_v63  ;;  %v4610_v45 = vadd.f32 %v7933_v55, %v4467_v13  ;;  %v4726_v44 = vadd.f32 %v7951_v46, %v4605_v42  ;;  %v8337_v56 = vld [vmem:[#allocation4_spill] sm:$0xff]  ;;  %v4473_v2 = vadd.f32 %v8343_v33, %v4352_v20  ;;  %v8349_v42 = vld [vmem:[#allocation15_spill] sm:$0xff]  ;;  %v8350_v13 = vld [vmem:[#allocation17_spill] sm:$0xff] }
 0x59f   : > { %8333 = vst [vmem:[#allocation24_spill] sm:$0xff] %v7987_v57  ;;  %v7989_v30 = vpop.f32.mrf.mxu0  ;;  %v4345_v57 = vadd.f32 %v7859_v61, %v7841_v21  ;;  %v4350_v21 = vadd.f32 %v7883_v31, %v7865_v49  ;;  %v4351_v61 = vadd.f32 %v7897_v5, %v7877_v15  ;;  %v4603_v15 = vadd.f32 %v7913_v28, %v4460_v23 }
 0x5a0   : > { %v7991_v16 = vpop.f32.mrf.mxu1  ;;  %v4606_v24 = vadd.f32 %v7917_v26, %v4463_v6  ;;  %v4465_v31 = vadd.f32 %v7915_v35, %v4344_v3  ;;  %v4468_v60 = vadd.f32 %v7923_v50, %v4347_v12  ;;  %v4613_v28 = vadd.f32 %v8335_v53, %v4470_v38  ;;  %v8336_v35 = vld [vmem:[#allocation5_spill] sm:$0xff]  ;;  %v8344_v3 = vld [vmem:[#allocation12_spill] sm:$0xff]  ;;  %v8351_v38 = vld [vmem:[#allocation19_spill] sm:$0xff] }
 0x5a1   : > { %8334 = vst [vmem:[#allocation25_spill] sm:$0xff] %v7991_v16  ;;  %v8001_v25 = vpop.f32.mrf.mxu0  ;;  %v4343_v16 = vadd.f32 %v7863_v19, %v7845_v36  ;;  %v4461_v19 = vadd.f32 %v7899_v10, %v4340_v0  ;;  %v4466_v49 = vadd.f32 %v7903_v1, %v4345_v57  ;;  %v4471_v18 = vadd.f32 %v7927_v52, %v4350_v21  ;;  %v8339_v0 = vld [vmem:[#allocation7_spill] sm:$0xff] }
 0x5a2   : > { %v8011_v37 = vpop.f32.mrf.mxu1  ;;  %v4469_v1 = vadd.f32 %v7931_v43, %v4348_v54  ;;  %v4608_v58 = vadd.f32 %v7937_v4, %v4465_v31  ;;  %v4474_v26 = vadd.f32 %v8336_v35, %v4353_v59  ;;  %v8340_v57 = vld [vmem:[#allocation11_spill] sm:$0xff]  ;;  %v4857_v43 = vadd.f32 %v7973_v47, %v4726_v44  ;;  %v8346_v59 = vld [vmem:[#allocation13_spill] sm:$0xff] }
 0x5a3   : > { %v8020_v36 = vpop.f32.mrf.mxu0  ;;  %v4464_v22 = vadd.f32 %v7907_v51, %v4343_v16  ;;  %v4604_v32 = vadd.f32 %v7921_v41, %v4461_v19  ;;  %v4609_v8 = vadd.f32 %v7925_v40, %v4466_v49  ;;  %v4472_v41 = vadd.f32 %v8337_v56, %v4351_v61  ;;  %v8338_v40 = vld [vmem:[#allocation8_spill] sm:$0xff]  ;;  %v8076_v21 = vld [vmem:[%s8239_s8] ss:$0 sm:$0xff]  ;;  %v8348_v49 = vld [vmem:[#allocation18_spill] sm:$0xff] }
 0x5a4   : > { %v8028_v29 = vpop.f32.mrf.mxu1  ;;  %v4611_v52 = vadd.f32 %v8338_v40, %v4468_v60  ;;  %v4724_v55 = vadd.f32 %v8340_v57, %v4603_v15  ;;  %v4614_v46 = vadd.f32 %v8341_v9, %v4471_v18  ;;  %v4612_v4 = vadd.f32 %v8342_v34, %v4469_v1  ;;  %v8352_v18 = vld [vmem:[#allocation20_spill] sm:$0xff]  ;;  %v8354_v35 = vld [vmem:[#allocation21_spill] sm:$0xff] }
 0x5a5   : > { %v8036_v11 = vpop.f32.mrf.mxu0  ;;  %v4607_v10 = vadd.f32 %v7929_v39, %v4464_v22  ;;  %v4475_v39 = vadd.f32 %v8339_v0, %v4354_v7  ;;  %v4617_v63 = vadd.f32 %v8344_v3, %v4474_v26  ;;  %v4615_v54 = vadd.f32 %v8345_v14, %v4472_v41  ;;  %v8347_v7 = vld [vmem:[#allocation16_spill] sm:$0xff]  ;;  %v8355_v26 = vld [vmem:[#allocation23_spill] sm:$0xff] }
 0x5a6   : > { %v8043_v27 = vpop.f32.mrf.mxu1  ;;  %v4727_v47 = vadd.f32 %v8346_v59, %v4606_v24  ;;  %v4855_v23 = vadd.f32 %v7977_v17, %v4724_v55  ;;  %v4616_v20 = vadd.f32 %v8348_v49, %v4473_v2  ;;  %v4725_v22 = vadd.f32 %v8349_v42, %v4604_v32  ;;  %v8353_v17 = vld [vmem:[#allocation22_spill] sm:$0xff]  ;;  %v8356_v41 = vld [vmem:[#allocation24_spill] sm:$0xff] }
 0x5a7   : > { %v8049_v48 = vpop.f32.mrf.mxu0  ;;  %v4618_v19 = vadd.f32 %v8347_v7, %v4475_v39  ;;  %v4730_v15 = vadd.f32 %v8350_v13, %v4609_v8  ;;  %v4728_v60 = vadd.f32 %v8351_v38, %v4607_v10  ;;  %v4731_v1 = vadd.f32 %v8352_v18, %v4610_v45 }
 0x5a8   : > { %v8055_v5 = vpop.f32.mrf.mxu1  ;;  %v4858_v53 = vadd.f32 %v8353_v17, %v4727_v47  ;;  %v4856_v32 = vadd.f32 %v7985_v62, %v4725_v22  ;;  %v4729_v8 = vadd.f32 %v8354_v35, %v4608_v58  ;;  %v4734_v10 = vadd.f32 %v8355_v26, %v4613_v28 }
 0x5a9   : > { %v4824_v51 = vpop.f32.mrf.mxu0  ;;  %v4861_v45 = vadd.f32 %v7989_v30, %v4730_v15  ;;  %v4732_v40 = vadd.f32 %v8356_v41, %v4611_v52  ;;  %v4859_v55 = vadd.f32 %v8001_v25, %v4728_v60  ;;  %v4733_v62 = vadd.f32 %v8011_v37, %v4612_v4 }
 0x5aa   : > { %v4712_v50 = vpop.f32.mrf.mxu1  ;;  %v4862_v28 = vadd.f32 %v8020_v36, %v4731_v1  ;;  %v4860_v33 = vadd.f32 %v8036_v11, %v4729_v8  ;;  %v4738_v30 = vadd.f32 %v8028_v29, %v4617_v63  ;;  %v4736_v2 = vadd.f32 %v8043_v27, %v4615_v54 }
 0x5ab   : > { %v6198_v16 = vpop.f32.mrf.mxu0  ;;  %v4865_v37 = vadd.f32 %v8049_v48, %v4734_v10  ;;  %v8113_v4 = vadd.f32 %v4824_v51, %v4732_v40  ;;  %v4739_v36 = vadd.f32 %v8055_v5, %v4618_v19  ;;  %v8122_v27 = vadd.f32 %v4712_v50, %v4616_v20 }
 0x5ac   : > { %v6207_v12 = vpop.f32.mrf.mxu1 }
 0x5ad   : > { %v4827_v6 = vpop.f32.mrf.mxu0  ;;  %v4978_v61 = vadd.f32 %v6207_v12, %v4857_v43  ;;  %v8357_v43 = vld [vmem:[#allocation25_spill] sm:$0xff] }
 0x5ae   : > { %v4913_v31 = vpop.f32.mrf.mxu1  ;;  %v4735_v9 = vadd.f32 %v8357_v43, %v4614_v46  ;;  %v8120_v63 = vadd.f32 %v4827_v6, %v4733_v62 }
 0x5af   : > { %v5001_v44 = vadd.f32 %v8076_v21, %v4978_v61  ;;  %v4976_v24 = vadd.f32 %v4913_v31, %v4855_v23  ;;  %v6201_v0 = vpop.f32.mrf.mxu0 }
 0x5b0   : > { %v6208_v56 = vpop.f32.mrf.mxu1  ;;  %v8118_v11 = vadd.f32 %v6198_v16, %v4735_v9  ;;  %v8126_v5 = vadd.f32 %v6201_v0, %v4738_v30 }
 0x5b1   : > { %v5658_v39 = vpack.c.bf16 %v5001_v44, %v5001_v44  ;;  %v4999_v57 = vadd.f32 %v8076_v21, %v4976_v24  ;;  %v4979_v34 = vadd.f32 %v6208_v56, %v4858_v53  ;;  %v5054_v3 = vmul.f32 %v5001_v44, %v5001_v44  ;;  %v4840_v14 = vpop.f32.mrf.mxu0 }
 0x5b2   : > { %v4916_v58 = vpop.f32.mrf.mxu1  ;;  %v5018_v61 = vsel %vm766_vm0, %v5001_v44, 0.0  ;;  %v8130_v16 = vadd.f32 %v4840_v14, %v4736_v2 }
 0x5b3   : > { %5175 = vst.msk [vmem:[%s8093_s29 + $0x8] sm:$0xf] %vm5172_vm13, %v5658_v39  ;;  %v5656_v52 = vpack.c.bf16 %v4999_v57, %v4999_v57  ;;  %v5002_v25 = vadd.f32 %v8076_v21, %v4979_v34  ;;  %v4977_v46 = vadd.f32 %v4916_v58, %v4856_v32  ;;  %v5052_v47 = vmul.f32 %v4999_v57, %v4999_v57  ;;  %v6202_v19 = vpop.f32.mrf.mxu0 }
 0x5b4   : > { %v6211_v12 = vpop.f32.mrf.mxu1  ;;  %v5071_v7 = vsel %vm766_vm0, %v5054_v3, 0.0  ;;  %v5015_v6 = vsel %vm766_vm0, %v4999_v57, 0.0  ;;  %v8141_v24 = vadd.f32 %v6202_v19, %v4739_v36 }
 0x5b5   : > { %5173 = vst.msk [vmem:[%s8093_s29] sm:$0xf] %vm5172_vm13, %v5656_v52  ;;  %v4982_v29 = vadd.f32 %v6211_v12, %v4861_v45  ;;  %v5659_v54 = vpack.c.bf16 %v5002_v25, %v5002_v25  ;;  %v5000_v48 = vadd.f32 %v8076_v21, %v4977_v46  ;;  %v5055_v22 = vmul.f32 %v5002_v25, %v5002_v25  ;;  %v4843_v62 = vpop.f32.mrf.mxu0 }
 0x5b6   : > { %v4929_v59 = vpop.f32.mrf.mxu1  ;;  %v5068_v60 = vsel %vm766_vm0, %v5052_v47, 0.0  ;;  %v5020_v17 = vsel %vm766_vm0, %v5002_v25, 0.0 }
 0x5b7   : > { %v5005_v51 = vadd.f32 %v8076_v21, %v4982_v29  ;;  %v4980_v23 = vadd.f32 %v4929_v59, %v4859_v55  ;;  %5176 = vst.msk [vmem:[%s8093_s29 + $0xc] sm:$0xf] %vm5172_vm13, %v5659_v54  ;;  %v5016_v49 = vsel %vm766_vm0, %v5000_v48, 0.0  ;;  %v5053_v20 = vmul.f32 %v5000_v48, %v5000_v48 }
 0x5b8   : > { %v6212_v50 = vpop.f32.mrf.mxu1  ;;  %v5657_v42 = vpack.c.bf16 %v5000_v48, %v5000_v48  ;;  %v5017_v13 = vadd.f32 %v5016_v49, %v5015_v6  ;;  %v5073_v45 = vsel %vm766_vm0, %v5055_v22, 0.0  ;;  %v4868_v29 = vadd.f32 %v4843_v62, %v8122_v27 }
 0x5b9   : > { %v5662_v15 = vpack.c.bf16 %v5005_v51, %v5005_v51  ;;  %v5003_v31 = vadd.f32 %v8076_v21, %v4980_v23  ;;  %v5069_v18 = vsel %vm766_vm0, %v5053_v20, 0.0  ;;  %v4983_v1 = vadd.f32 %v6212_v50, %v4862_v28 }
 0x5ba   : > { %v4932_v38 = vpop.f32.mrf.mxu1  ;;  %5174 = vst.msk [vmem:[%s8093_s29 + $0x4] sm:$0xf] %vm5172_vm13, %v5657_v42  ;;  %v5019_v53 = vadd.f32 %v5018_v61, %v5017_v13  ;;  %v5070_v32 = vadd.f32 %v5069_v18, %v5068_v60  ;;  %v5058_v57 = vmul.f32 %v5005_v51, %v5005_v51  ;;  %v5026_v54 = vsel %vm766_vm0, %v5005_v51, 0.0 }
 0x5bb   : > { %v4981_v44 = vadd.f32 %v4932_v38, %v4860_v33  ;;  %5179 = vst.msk [vmem:[%s8093_s29 + $0x18] sm:$0xf] %vm5172_vm13, %v5662_v15  ;;  %v5056_v8 = vmul.f32 %v5003_v31, %v5003_v31  ;;  %v5660_v26 = vpack.c.bf16 %v5003_v31, %v5003_v31  ;;  %v5006_v10 = vadd.f32 %v8076_v21, %v4983_v1 }
 0x5bc   : > { %v6215_v35 = vpop.f32.mrf.mxu1  ;;  %v5072_v41 = vadd.f32 %v5071_v7, %v5070_v32  ;;  %v5021_v40 = vadd.f32 %v5020_v17, %v5019_v53  ;;  %v5022_v55 = vsel %vm766_vm0, %v5003_v31, 0.0 }
 0x5bd   : > { %v5004_v56 = vadd.f32 %v8076_v21, %v4981_v44  ;;  %v4986_v0 = vadd.f32 %v6215_v35, %v4865_v37  ;;  %v5075_v43 = vsel %vm766_vm0, %v5056_v8, 0.0  ;;  %5177 = vst.msk [vmem:[%s8093_s29 + $0x10] sm:$0xf] %vm5172_vm13, %v5660_v26  ;;  %v5663_v9 = vpack.c.bf16 %v5006_v10, %v5006_v10 }
 0x5be   : > { %v4945_v39 = vpop.f32.mrf.mxu1  ;;  %v5023_v34 = vadd.f32 %v5022_v55, %v5021_v40  ;;  %v5074_v58 = vadd.f32 %v5073_v45, %v5072_v41  ;;  %v5059_v52 = vmul.f32 %v5006_v10, %v5006_v10  ;;  %v5028_v50 = vsel %vm766_vm0, %v5006_v10, 0.0 }
 0x5bf   : > { %v5024_v28 = vsel %vm766_vm0, %v5004_v56, 0.0  ;;  %v5057_v33 = vmul.f32 %v5004_v56, %v5004_v56  ;;  %5180 = vst.msk [vmem:[%s8093_s29 + $0x1c] sm:$0xf] %vm5172_vm13, %v5663_v9  ;;  %v5661_v2 = vpack.c.bf16 %v5004_v56, %v5004_v56  ;;  %v5009_v3 = vadd.f32 %v8076_v21, %v4986_v0 }
 0x5c0   : > { %v6216_v30 = vpop.f32.mrf.mxu1  ;;  %v4984_v25 = vadd.f32 %v4945_v39, %v8113_v4  ;;  %v5076_v46 = vadd.f32 %v5075_v43, %v5074_v58  ;;  %v5025_v12 = vadd.f32 %v5024_v28, %v5023_v34  ;;  %v5081_v6 = vsel %vm766_vm0, %v5059_v52, 0.0 }
 0x5c1   : > { %v5077_v37 = vsel %vm766_vm0, %v5057_v33, 0.0  ;;  %v4987_v36 = vadd.f32 %v6216_v30, %v8118_v11  ;;  %5178 = vst.msk [vmem:[%s8093_s29 + $0x14] sm:$0xf] %vm5172_vm13, %v5661_v2  ;;  %v5666_v59 = vpack.c.bf16 %v5009_v3, %v5009_v3  ;;  %v5079_v11 = vsel %vm766_vm0, %v5058_v57, 0.0 }
 0x5c2   : > { %v4948_v14 = vpop.f32.mrf.mxu1  ;;  %v5007_v47 = vadd.f32 %v8076_v21, %v4984_v25  ;;  %v5027_v48 = vadd.f32 %v5026_v54, %v5025_v12  ;;  %v5078_v4 = vadd.f32 %v5077_v37, %v5076_v46  ;;  %v5062_v49 = vmul.f32 %v5009_v3, %v5009_v3 }
 0x5c3   : > { %v5010_v23 = vadd.f32 %v8076_v21, %v4987_v36  ;;  %v4985_v61 = vadd.f32 %v4948_v14, %v8120_v63  ;;  %5183 = vst.msk [vmem:[%s8093_s29 + $0x28] sm:$0xf] %vm5172_vm13, %v5666_v59  ;;  %v5034_v56 = vsel %vm766_vm0, %v5009_v3, 0.0 }
 0x5c4   : > { %v6219_v7 = vpop.f32.mrf.mxu1  ;;  %v5060_v27 = vmul.f32 %v5007_v47, %v5007_v47  ;;  %v5664_v51 = vpack.c.bf16 %v5007_v47, %v5007_v47  ;;  %v5080_v19 = vadd.f32 %v5079_v11, %v5078_v4  ;;  %v5029_v20 = vadd.f32 %v5028_v50, %v5027_v48 }
 0x5c5   : > { %v5030_v22 = vsel %vm766_vm0, %v5007_v47, 0.0  ;;  %v5667_v63 = vpack.c.bf16 %v5010_v23, %v5010_v23  ;;  %v5008_v13 = vadd.f32 %v8076_v21, %v4985_v61  ;;  %v4990_v15 = vadd.f32 %v6219_v7, %v8126_v5 }
 0x5c6   : > { %v4961_v42 = vpop.f32.mrf.mxu1  ;;  %5181 = vst.msk [vmem:[%s8093_s29 + $0x20] sm:$0xf] %vm5172_vm13, %v5664_v51  ;;  %v5031_v31 = vadd.f32 %v5030_v22, %v5029_v20  ;;  %v5082_v38 = vadd.f32 %v5081_v6, %v5080_v19  ;;  %v5083_v60 = vsel %vm766_vm0, %v5060_v27, 0.0  ;;  %v5087_v40 = vsel %vm766_vm0, %v5062_v49, 0.0 }
 0x5c7   : > { %v4988_v18 = vadd.f32 %v4961_v42, %v8130_v16  ;;  %5184 = vst.msk [vmem:[%s8093_s29 + $0x2c] sm:$0xf] %vm5172_vm13, %v5667_v63  ;;  %v5032_v44 = vsel %vm766_vm0, %v5008_v13, 0.0  ;;  %v5061_v17 = vmul.f32 %v5008_v13, %v5008_v13  ;;  %v5665_v53 = vpack.c.bf16 %v5008_v13, %v5008_v13 }
 0x5c8   : > { %v6220_v1 = vpop.f32.mrf.mxu1  ;;  %v5013_v32 = vadd.f32 %v8076_v21, %v4990_v15  ;;  %v5084_v35 = vadd.f32 %v5083_v60, %v5082_v38  ;;  %v5033_v8 = vadd.f32 %v5032_v44, %v5031_v31  ;;  %v5063_v16 = vmul.f32 %v5010_v23, %v5010_v23 }
 0x5c9   : > { %v5011_v5 = vadd.f32 %v8076_v21, %v4988_v18  ;;  %v4991_v26 = vadd.f32 %v6220_v1, %v8141_v24  ;;  %v5085_v45 = vsel %vm766_vm0, %v5061_v17, 0.0  ;;  %5182 = vst.msk [vmem:[%s8093_s29 + $0x24] sm:$0xf] %vm5172_vm13, %v5665_v53  ;;  %v5036_v0 = vsel %vm766_vm0, %v5010_v23, 0.0 }
 0x5ca   : > { %v4964_v10 = vpop.f32.mrf.mxu1  ;;  %v5670_v41 = vpack.c.bf16 %v5013_v32, %v5013_v32  ;;  %v5035_v39 = vadd.f32 %v5034_v56, %v5033_v8  ;;  %v5086_v57 = vadd.f32 %v5085_v45, %v5084_v35  ;;  %v5089_v58 = vsel %vm766_vm0, %v5063_v16, 0.0 }
 0x5cb   : > { %v5064_v24 = vmul.f32 %v5011_v5, %v5011_v5  ;;  %v5668_v55 = vpack.c.bf16 %v5011_v5, %v5011_v5  ;;  %v5014_v43 = vadd.f32 %v8076_v21, %v4991_v26  ;;  %v4989_v9 = vadd.f32 %v4964_v10, %v4868_v29 }
 0x5cc   : > { %5187 = vst.msk [vmem:[%s8093_s29 + $0x38] sm:$0xf] %vm5172_vm13, %v5670_v41  ;;  %v5088_v62 = vadd.f32 %v5087_v40, %v5086_v57  ;;  %v5037_v34 = vadd.f32 %v5036_v0, %v5035_v39  ;;  %v5038_v28 = vsel %vm766_vm0, %v5011_v5, 0.0  ;;  %v5066_v52 = vmul.f32 %v5013_v32, %v5013_v32 }
 0x5cd   : > { %5185 = vst.msk [vmem:[%s8093_s29 + $0x30] sm:$0xf] %vm5172_vm13, %v5668_v55  ;;  %v5671_v33 = vpack.c.bf16 %v5014_v43, %v5014_v43  ;;  %v5012_v30 = vadd.f32 %v8076_v21, %v4989_v9  ;;  %v5091_v25 = vsel %vm766_vm0, %v5064_v24, 0.0  ;;  %v5042_v29 = vsel %vm766_vm0, %v5013_v32, 0.0 }
 0x5ce   : > { %v5039_v2 = vadd.f32 %v5038_v28, %v5037_v34  ;;  %v5090_v3 = vadd.f32 %v5089_v58, %v5088_v62  ;;  %v5067_v54 = vmul.f32 %v5014_v43, %v5014_v43  ;;  %v5095_v48 = vsel %vm766_vm0, %v5066_v52, 0.0 }
 0x5cf   : > { %5188 = vst.msk [vmem:[%s8093_s29 + $0x3c] sm:$0xf] %vm5172_vm13, %v5671_v33  ;;  %v5040_v46 = vsel %vm766_vm0, %v5012_v30, 0.0  ;;  %v5065_v12 = vmul.f32 %v5012_v30, %v5012_v30  ;;  %v5669_v37 = vpack.c.bf16 %v5012_v30, %v5012_v30  ;;  %v5044_v4 = vsel %vm766_vm0, %v5014_v43, 0.0 }
 0x5d0   : > { %v5092_v36 = vadd.f32 %v5091_v25, %v5090_v3  ;;  %v5041_v14 = vadd.f32 %v5040_v46, %v5039_v2  ;;  %v5097_v7 = vsel %vm766_vm0, %v5067_v54, 0.0 }
 0x5d1   : > { %v5093_v59 = vsel %vm766_vm0, %v5065_v12, 0.0  ;;  %5186 = vst.msk [vmem:[%s8093_s29 + $0x34] sm:$0xf] %vm5172_vm13, %v5669_v37 }
 0x5d2   : > { %v5043_v21 = vadd.f32 %v5042_v29, %v5041_v14  ;;  %v5094_v47 = vadd.f32 %v5093_v59, %v5092_v36 }
 0x5d4   : > { %v5045_v23 = vadd.f32 %v5044_v4, %v5043_v21  ;;  %v5096_v61 = vadd.f32 %v5095_v48, %v5094_v47 }
 0x5d6   : > { %v5046_v11 = vrot.slane %v5045_v23, 4  ;;  %v5098_v50 = vadd.f32 %v5097_v7, %v5096_v61 }
 0x5d8   : > { %v5047_v27 = vadd.f32 %v5046_v11, %v5045_v23  ;;  %v5099_v51 = vrot.slane %v5098_v50, 4 }
 0x5da   : > { %v5048_v6 = vrot.slane %v5047_v27, 2  ;;  %v5100_v19 = vadd.f32 %v5099_v51, %v5098_v50 }
 0x5dc   : > { %v5049_v49 = vadd.f32 %v5048_v6, %v5047_v27  ;;  %v5101_v20 = vrot.slane %v5100_v19, 2 }
 0x5de   : > { %v5050_v42 = vrot.slane %v5049_v49, 1  ;;  %v5102_v22 = vadd.f32 %v5101_v20, %v5100_v19 }
 0x5e0   : > { %v5103_v63 = vrot.slane %v5102_v22, 1  ;;  %v5051_v13 = vadd.f32 %v5050_v42, %v5049_v49 }
 0x5e2   : > { %v5104_v15 = vadd.f32 %v5103_v63, %v5102_v22 }
 0x5e4   : > { %v5105_v31 = vsel %vm2128_vm10, %v5051_v13, %v5104_v15 }
 0x5e5   : > { %5107 = vst.msk [vmem:[%s588_s21] sm:$0x3] %vm5106_vm14, %v5105_v31 }
 0x5e6 PF: > { %s21_s17 = sadd.s32 1, %s6350_s17   ;;  %s8358_s24 = sld [smem:[#allocation2_spill]] }
 0x5e7   : > { %p18_p13 = scmp.ge.s32.totalorder %s21_s17, 6   ;;  %s8359_s13 = smov %s6342_s15 }
 0x5e8   : > { %s8360_s14 = smov %s6346_s16  ;;  %s8361_s15 = smov %s8364_s18 }
 0x5e9   :  { %20 = sbr.rel (!%p18_p13) target bundleno = 4 (0x4), region = 126 }
 0x5ec   : > { %s8362_s16 = smov %s8358_s24 }

</bundles_post_ra>
